<compile_context>
chip_gen: v5e
topology: v5e:2x2
jax: 0.10.0
libtpu: 0.0.40
codegen_flags: <defaults>
</compile_context>

<pallas_src>
import functools

import jax
import jax.numpy as jnp
from jax.experimental import pallas as pl
from jax.experimental.pallas import tpu as pltpu


# ----------------------------------------------------------------------------
# Pallas kernels
# ----------------------------------------------------------------------------
def _linear_kernel(x_ref, w_ref, b_ref, o_ref, *, relu):
    y = jnp.dot(x_ref[...], w_ref[...], preferred_element_type=jnp.float32)
    y = y + b_ref[...]
    if relu:
        y = jnp.maximum(y, 0.0)
    o_ref[...] = y.astype(o_ref.dtype)


def _linear_skip_kernel(x_ref, skip_ref, w_ref, b_ref, o_ref, *, relu):
    # y = x @ w + b + skip  (fuses the "W(u) + K(u)" add and the ReLU)
    y = jnp.dot(x_ref[...], w_ref[...], preferred_element_type=jnp.float32)
    y = y + b_ref[...] + skip_ref[...]
    if relu:
        y = jnp.maximum(y, 0.0)
    o_ref[...] = y.astype(o_ref.dtype)


def _proj_kernel(x_ref, w1_ref, b1_ref, w2_ref, b2_ref, o_ref):
    # fused fc1 -> relu -> fc2
    h = jnp.dot(x_ref[...], w1_ref[...], preferred_element_type=jnp.float32)
    h = jnp.maximum(h + b1_ref[...], 0.0)
    y = jnp.dot(h, w2_ref[...], preferred_element_type=jnp.float32) + b2_ref[...]
    o_ref[...] = y.astype(o_ref.dtype)


def _spectral_kernel(x_ref, w_ref, o_ref):
    # Per-Fourier-mode complex multiply, folded into a single real batched
    # matmul via the 2x2 block embedding (weights pre-packed at init).
    # x: (K, B, 2Cin)  w: (K, 2Cin, 2Cout)  ->  o: (K, B, 2Cout)
    o_ref[...] = jnp.einsum(
        "kbi,kio->kbo", x_ref[...], w_ref[...],
        preferred_element_type=jnp.float32,
    ).astype(o_ref.dtype)


# ----------------------------------------------------------------------------
# Pallas wrappers
# ----------------------------------------------------------------------------
def _pick_tile(n, cap=2048):
    """Largest row tile: whole array if it fits, else biggest divisor % 8 == 0."""
    if n <= cap:
        return n
    for t in range(cap - cap % 8, 0, -8):
        if n % t == 0:
            return t
    return n


def pallas_linear(x, w, b, skip=None, relu=False, max_tile=2048):
    """y = x @ w + b (+ skip) (+ relu).   x:(N,K)  w:(K,M)  b:(1,M)  skip:(N,M)."""
    N, K = x.shape
    M = w.shape[1]
    tile = _pick_tile(N, max_tile)

    in_specs = [pl.BlockSpec((tile, K), lambda i: (i, 0))]
    args = [x]
    if skip is not None:
        in_specs.append(pl.BlockSpec((tile, M), lambda i: (i, 0)))
        args.append(skip)
    in_specs += [
        pl.BlockSpec((K, M), lambda i: (0, 0)),
        pl.BlockSpec((1, M), lambda i: (0, 0)),
    ]
    args += [w, b]

    kernel = functools.partial(
        _linear_skip_kernel if skip is not None else _linear_kernel, relu=relu
    )
    return pl.pallas_call(
        kernel,
        out_shape=jax.ShapeDtypeStruct((N, M), x.dtype),
        grid=(N // tile,),
        in_specs=in_specs,
        out_specs=pl.BlockSpec((tile, M), lambda i: (i, 0)),
        compiler_params=pltpu.CompilerParams(dimension_semantics=("parallel",)),
    )(*args)


def pallas_proj(x, w1, b1, w2, b2, max_tile=2048):
    """Fused  (x @ w1 + b1).relu() @ w2 + b2."""
    N, K = x.shape
    H = w1.shape[1]
    M = w2.shape[1]
    tile = _pick_tile(N, max_tile)
    return pl.pallas_call(
        _proj_kernel,
        out_shape=jax.ShapeDtypeStruct((N, M), x.dtype),
        grid=(N // tile,),
        in_specs=[
            pl.BlockSpec((tile, K), lambda i: (i, 0)),
            pl.BlockSpec((K, H), lambda i: (0, 0)),
            pl.BlockSpec((1, H), lambda i: (0, 0)),
            pl.BlockSpec((H, M), lambda i: (0, 0)),
            pl.BlockSpec((1, M), lambda i: (0, 0)),
        ],
        out_specs=pl.BlockSpec((tile, M), lambda i: (i, 0)),
        compiler_params=pltpu.CompilerParams(dimension_semantics=("parallel",)),
    )(x, w1, b1, w2, b2)


def pallas_spectral_mul(x_pack, w_pack):
    """Batched per-mode complex mode-mixing, one grid step for ALL modes.

    x_pack: (K, B, 2*Cin)  float32   ([real | imag] along channels)
    w_pack: (K, 2*Cin, 2*Cout) float32  (pre-packed 2x2 block embedding)
    returns (K, B, 2*Cout) float32
    """
    K, B, Ci2 = x_pack.shape
    Co2 = w_pack.shape[2]
    return pl.pallas_call(
        _spectral_kernel,
        out_shape=jax.ShapeDtypeStruct((K, B, Co2), jnp.float32),
        grid=(1,),
        in_specs=[
            pl.BlockSpec((K, B, Ci2), lambda i: (0, 0, 0)),
            pl.BlockSpec((K, Ci2, Co2), lambda i: (0, 0, 0)),
        ],
        out_specs=pl.BlockSpec((K, B, Co2), lambda i: (0, 0, 0)),
        compiler_params=pltpu.CompilerParams(dimension_semantics=("arbitrary",)),
    )(x_pack, w_pack)


# ----------------------------------------------------------------------------
# SpectralConv2d  (FFT in plain JAX, complex mode-mixing in Pallas)
# ----------------------------------------------------------------------------
def spectral_conv2d(x, w_pack, m1, m2):
    """x: (B, X, Y, Cin) float32 channel-last.  w_pack: (2*m1*m2, 2Cin, 2Cout)."""
    B, Sx, Sy, Cin = x.shape
    Cout = w_pack.shape[2] // 2
    Syh = Sy // 2 + 1
    assert Sx >= 2 * m1, (Sx, m1)

    x_ft = jnp.fft.rfft2(x, axes=(1, 2))  # (B, Sx, Syh, Cin) complex64

    # Gather both corners of kept modes and pack [real | imag] along channels.
    modes = jnp.concatenate(
        [x_ft[:, :m1, :m2, :], x_ft[:, Sx - m1:, :m2, :]], axis=1
    )  # (B, 2*m1, m2, Cin) complex
    x_pack = jnp.concatenate([jnp.real(modes), jnp.imag(modes)], axis=-1)
    K = 2 * m1 * m2
    x_pack = x_pack.transpose(1, 2, 0, 3).reshape(K, B, 2 * Cin)

    y = pallas_spectral_mul(x_pack, w_pack)                 # (K, B, 2*Cout)
    y = y.reshape(2 * m1, m2, B, 2 * Cout).transpose(2, 0, 1, 3)
    out_c = jax.lax.complex(y[..., :Cout], y[..., Cout:])   # (B, 2*m1, m2, Cout)

    # Build out_ft by concatenation + zero-padding (no zeros+scatter).
    pad_y = Syh - m2
    out_top = jnp.pad(out_c[:, :m1], ((0, 0), (0, 0), (0, pad_y), (0, 0)))
    out_bot = jnp.pad(out_c[:, m1:], ((0, 0), (0, 0), (0, pad_y), (0, 0)))
    mid = jnp.zeros((B, Sx - 2 * m1, Syh, Cout), dtype=out_top.dtype)
    out_ft = jnp.concatenate([out_top, mid, out_bot], axis=1)

    return jnp.fft.irfft2(out_ft, s=(Sx, Sy), axes=(1, 2)).astype(x.dtype)


# ----------------------------------------------------------------------------
# Parameters (deterministic, synthetic init) + one-time packing
# ----------------------------------------------------------------------------
def init_params(key, modes1, modes2, width, in_dim=3):
    ks = jax.random.split(key, 12)

    def lin(kw, kb, fan_in, fan_out):
        bound = 1.0 / float(fan_in) ** 0.5
        w = jax.random.uniform(kw, (fan_in, fan_out), jnp.float32, -bound, bound)
        b = jax.random.uniform(kb, (fan_out,), jnp.float32, -bound, bound)
        return w, b

    p = {}
    p["fc0_w"], p["fc0_b"] = lin(ks[0], ks[1], in_dim, width)
    p["w0_w"], p["w0_b"] = lin(ks[2], ks[3], width, width)   # Conv1d(width,width,1)
    p["w1_w"], p["w1_b"] = lin(ks[4], ks[5], width, width)   # defined but unused (matches reference forward)
    p["fc1_w"], p["fc1_b"] = lin(ks[6], ks[7], width, width)
    p["fc2_w"], p["fc2_b"] = lin(ks[8], ks[9], width, 1)

    scale = 1.0 / (width * width)

    def spec(k):
        k1, k2, k3, k4 = jax.random.split(k, 4)
        shp = (width, width, modes1, modes2)  # (in, out, m1, m2)
        return (
            scale * jax.random.uniform(k1, shp, jnp.float32),  # weights1 real
            scale * jax.random.uniform(k2, shp, jnp.float32),  # weights1 imag
            scale * jax.random.uniform(k3, shp, jnp.float32),  # weights2 real
            scale * jax.random.uniform(k4, shp, jnp.float32),  # weights2 imag
        )

    p["conv0"] = spec(ks[10])
    p["conv1"] = spec(ks[11])
    return p


def pack_params(params, row_pack):
    """One-time (outside jit) weight packing:
    * linear weights -> block-diagonal (row_pack copies) so the (N, C) output
      can be stored lane-dense as (N/row_pack, row_pack*C);
    * spectral complex weights -> per-mode real 2x2 block embedding, with all
      constant transposes hoisted here.
    """
    p = row_pack
    eye = jnp.eye(p, dtype=jnp.float32)

    def bd(w, b):
        return jnp.kron(eye, w), jnp.tile(b, p).reshape(1, -1)

    def spec_pack(w1r, w1i, w2r, w2i):
        def one(wr, wi):
            cin, cout = wr.shape[0], wr.shape[1]
            wr = wr.transpose(2, 3, 0, 1).reshape(-1, cin, cout)
            wi = wi.transpose(2, 3, 0, 1).reshape(-1, cin, cout)
            top = jnp.concatenate([wr, wi], axis=2)      # multiplies real(x)
            bot = jnp.concatenate([-wi, wr], axis=2)     # multiplies imag(x)
            return jnp.concatenate([top, bot], axis=1)   # (m1*m2, 2Cin, 2Cout)
        return jnp.concatenate([one(w1r, w1i), one(w2r, w2i)], axis=0)

    pp = {}
    pp["fc0_w"], pp["fc0_b"] = bd(params["fc0_w"], params["fc0_b"])
    pp["w0_w"], pp["w0_b"] = bd(params["w0_w"], params["w0_b"])
    pp["fc1_w"], pp["fc1_b"] = bd(params["fc1_w"], params["fc1_b"])
    pp["fc2_w"], pp["fc2_b"] = bd(params["fc2_w"], params["fc2_b"])
    pp["spec0"] = spec_pack(*params["conv0"])
    pp["spec1"] = spec_pack(*params["conv1"])
    return pp


# ----------------------------------------------------------------------------
# FNO2d forward
# ----------------------------------------------------------------------------
def fno2d_forward(pp, x, *, modes1, modes2, width, row_pack):
    B, Sx, Sy, in_dim = x.shape
    N = B * Sx * Sy
    p = row_pack
    assert N % p == 0, (N, p)

    # fc0: lift to `width` channels.  (N, in_dim) presented as (N/p, p*in_dim)
    # so the output is lane-dense (N/p, p*width); same row-major memory.
    h = pallas_linear(x.reshape(N // p, p * in_dim), pp["fc0_w"], pp["fc0_b"])

    # layer 0:  u = relu( SpectralConv0(u) + w0(u) )
    x1 = spectral_conv2d(h.reshape(B, Sx, Sy, width), pp["spec0"], modes1, modes2)
    h = pallas_linear(h, pp["w0_w"], pp["w0_b"],
                      skip=x1.reshape(N // p, p * width), relu=True)

    # layer 1:  u = SpectralConv1(u) + w0(u)   (reference reuses w0; no relu)
    x1 = spectral_conv2d(h.reshape(B, Sx, Sy, width), pp["spec1"], modes1, modes2)
    h = pallas_linear(h, pp["w0_w"], pp["w0_b"],
                      skip=x1.reshape(N // p, p * width), relu=False)

    # projection: fused fc1 -> relu -> fc2
    out = pallas_proj(h, pp["fc1_w"], pp["fc1_b"], pp["fc2_w"], pp["fc2_b"])
    return out.reshape(B, Sx, Sy, 1)


# ----------------------------------------------------------------------------
# Pure-JAX reference (for correctness check) — uses the RAW parameters
# ----------------------------------------------------------------------------
def reference_forward(params, x, modes1, modes2, width):
    B, Sx, Sy, _ = x.shape

    def lin(h, w, b):
        return h @ w + b

    def spec(h, wts):
        w1r, w1i, w2r, w2i = wts
        w1 = w1r + 1j * w1i
        w2 = w2r + 1j * w2i
        hf = jnp.fft.rfft2(h, axes=(1, 2))
        out = jnp.zeros((B, Sx, Sy // 2 + 1, width), jnp.complex64)
        out = out.at[:, :modes1, :modes2, :].set(
            jnp.einsum("bxyi,ioxy->bxyo", hf[:, :modes1, :modes2, :], w1))
        out = out.at[:, Sx - modes1:, :modes2, :].set(
            jnp.einsum("bxyi,ioxy->bxyo", hf[:, Sx - modes1:, :modes2, :], w2))
        return jnp.fft.irfft2(out, s=(Sx, Sy), axes=(1, 2)).astype(h.dtype)

    h = lin(x, params["fc0_w"], params["fc0_b"])
    h = jax.nn.relu(spec(h, params["conv0"]) + lin(h, params["w0_w"], params["w0_b"]))
    h = spec(h, params["conv1"]) + lin(h, params["w0_w"], params["w0_b"])
    h = jax.nn.relu(lin(h, params["fc1_w"], params["fc1_b"]))
    return lin(h, params["fc2_w"], params["fc2_b"])


if __name__ == "__main__":
    modes1 = modes2 = 6
    width = 32
    B, S, in_dim = 2, 16, 3
    row_pack = max(1, 128 // width)          # 4 -> lane-dense 128-wide outputs
    assert (B * S * S) % row_pack == 0

    key = jax.random.PRNGKey(0)
    kp, kx = jax.random.split(key)
    params = init_params(kp, modes1, modes2, width, in_dim)
    packed = pack_params(params, row_pack)   # constant-weight packing, once
    x = jax.random.normal(kx, (B, S, S, in_dim), jnp.float32)

    fwd = jax.jit(functools.partial(
        fno2d_forward, modes1=modes1, modes2=modes2, width=width, row_pack=row_pack))
    out = fwd(packed, x)
    jax.block_until_ready(out)

    assert out.shape == (B, S, S, 1), out.shape
    ref = reference_forward(params, x, modes1, modes2, width)
    err = float(jnp.max(jnp.abs(out - ref)))
    assert jnp.allclose(out, ref, rtol=1e-3, atol=1e-3), err

    print("KERNEL_OK")
</pallas_src>

<mosaic_0001>
module attributes {stable_mosaic.version = 11 : i64} {
  func.func @_linear_kernel(%arg0: i32, %arg1: memref<128x12xf32, #tpu.memory_space<vmem>>, %arg2: memref<12x128xf32, #tpu.memory_space<vmem>>, %arg3: memref<1x128xf32, #tpu.memory_space<vmem>>, %arg4: memref<128x128xf32, #tpu.memory_space<vmem>>) attributes {dimension_semantics = [#tpu.dimension_semantics<parallel>], iteration_bounds = array<i64: 1>, scalar_prefetch = 0 : i64, scratch_operands = 0 : i64, tpu.core_type = #tpu.core_type<tc>, window_params = [{transform_indices = @transform_0, window_bounds = array<i64: 128, 12>}, {pipeline_mode = #tpu.pipeline_mode<synchronous>, transform_indices = @transform_1, window_bounds = array<i64: 12, 128>}, {pipeline_mode = #tpu.pipeline_mode<synchronous>, transform_indices = @transform_2, window_bounds = array<i64: 1, 128>}, {transform_indices = @transform_3, window_bounds = array<i64: 128, 128>}]} {
    %c0 = arith.constant 0 : index
    %c0_0 = arith.constant 0 : index
    %0 = vector.load %arg1[%c0, %c0_0] : memref<128x12xf32, #tpu.memory_space<vmem>>, vector<128x12xf32>
    %c0_1 = arith.constant 0 : index
    %c0_2 = arith.constant 0 : index
    %1 = vector.load %arg2[%c0_1, %c0_2] : memref<12x128xf32, #tpu.memory_space<vmem>>, vector<12x128xf32>
    %cst = arith.constant dense<0.000000e+00> : vector<128x128xf32>
    %2 = tpu.matmul %0, %1, %cst {dimension_numbers = #tpu.dot_dimension_numbers<[1], [0], [0], [1], [0, 0, 1, 1], [], []>} : vector<128x12xf32>, vector<12x128xf32>, vector<128x128xf32> -> vector<128x128xf32>
    %c0_3 = arith.constant 0 : index
    %c0_4 = arith.constant 0 : index
    %3 = vector.load %arg3[%c0_3, %c0_4] : memref<1x128xf32, #tpu.memory_space<vmem>>, vector<1x128xf32>
    %4 = vector.broadcast %3 : vector<1x128xf32> to vector<128x128xf32>
    %5 = arith.addf %2, %4 : vector<128x128xf32>
    %c0_5 = arith.constant 0 : index
    %c0_6 = arith.constant 0 : index
    %6 = vector.load %arg4[%c0_5, %c0_6] : memref<128x128xf32, #tpu.memory_space<vmem>>, vector<128x128xf32>
    tpu.vector_store %arg4[%c0_5, %c0_6], %5 {strides = array<i32>} : memref<128x128xf32, #tpu.memory_space<vmem>>, vector<128x128xf32>,
    return
  }
  func.func @transform_0(%arg0: i32) -> (i32, i32) {
    %c0_i32 = arith.constant 0 : i32
    %c0_i32_0 = arith.constant 0 : i32
    return %arg0, %c0_i32 : i32, i32
  }
  func.func @transform_1(%arg0: i32) -> (i32, i32) {
    %c0_i32 = arith.constant 0 : i32
    %c0_i32_0 = arith.constant 0 : i32
    %c0_i32_1 = arith.constant 0 : i32
    return %c0_i32, %c0_i32_0 : i32, i32
  }
  func.func @transform_2(%arg0: i32) -> (i32, i32) {
    %c0_i32 = arith.constant 0 : i32
    %c0_i32_0 = arith.constant 0 : i32
    %c0_i32_1 = arith.constant 0 : i32
    return %c0_i32, %c0_i32_0 : i32, i32
  }
  func.func @transform_3(%arg0: i32) -> (i32, i32) {
    %c0_i32 = arith.constant 0 : i32
    %c0_i32_0 = arith.constant 0 : i32
    return %arg0, %c0_i32 : i32, i32
  }
}

module attributes {stable_mosaic.version = 11 : i64} {
  func.func @_spectral_kernel(%arg0: i32, %arg1: memref<72x2x64xf32, #tpu.memory_space<vmem>>, %arg2: memref<72x64x64xf32, #tpu.memory_space<vmem>>, %arg3: memref<72x2x64xf32, #tpu.memory_space<vmem>>) attributes {dimension_semantics = [#tpu.dimension_semantics<arbitrary>], iteration_bounds = array<i64: 1>, scalar_prefetch = 0 : i64, scratch_operands = 0 : i64, tpu.core_type = #tpu.core_type<tc>, window_params = [{pipeline_mode = #tpu.pipeline_mode<synchronous>, transform_indices = @transform_0, window_bounds = array<i64: 72, 2, 64>}, {pipeline_mode = #tpu.pipeline_mode<synchronous>, transform_indices = @transform_1, window_bounds = array<i64: 72, 64, 64>}, {pipeline_mode = #tpu.pipeline_mode<synchronous>, transform_indices = @transform_2, window_bounds = array<i64: 72, 2, 64>}]} {
    %c0 = arith.constant 0 : index
    %c0_0 = arith.constant 0 : index
    %c0_1 = arith.constant 0 : index
    %0 = vector.load %arg1[%c0, %c0_0, %c0_1] : memref<72x2x64xf32, #tpu.memory_space<vmem>>, vector<72x2x64xf32>
    %c0_2 = arith.constant 0 : index
    %c0_3 = arith.constant 0 : index
    %c0_4 = arith.constant 0 : index
    %1 = vector.load %arg2[%c0_2, %c0_3, %c0_4] : memref<72x64x64xf32, #tpu.memory_space<vmem>>, vector<72x64x64xf32>
    "tpu.trace_start"() <{level = 10 : i32, message = "kbi,kio->kbo"}> : () -> ()
    %cst = arith.constant dense<0.000000e+00> : vector<72x2x64xf32>
    %2 = tpu.matmul %0, %1, %cst {dimension_numbers = #tpu.dot_dimension_numbers<[2], [1], [1], [2], [0, 0, 0, 1, 1, 2], [0], [0]>} : vector<72x2x64xf32>, vector<72x64x64xf32>, vector<72x2x64xf32> -> vector<72x2x64xf32>
    "tpu.trace_stop"() : () -> ()
    %c0_5 = arith.constant 0 : index
    %c0_6 = arith.constant 0 : index
    %c0_7 = arith.constant 0 : index
    %3 = vector.load %arg3[%c0_5, %c0_6, %c0_7] : memref<72x2x64xf32, #tpu.memory_space<vmem>>, vector<72x2x64xf32>
    tpu.vector_store %arg3[%c0_5, %c0_6, %c0_7], %2 {strides = array<i32>} : memref<72x2x64xf32, #tpu.memory_space<vmem>>, vector<72x2x64xf32>,
    return
  }
  func.func @transform_0(%arg0: i32) -> (i32, i32, i32) {
    %c0_i32 = arith.constant 0 : i32
    %c0_i32_0 = arith.constant 0 : i32
    %c0_i32_1 = arith.constant 0 : i32
    %c0_i32_2 = arith.constant 0 : i32
    return %c0_i32, %c0_i32_0, %c0_i32_1 : i32, i32, i32
  }
  func.func @transform_1(%arg0: i32) -> (i32, i32, i32) {
    %c0_i32 = arith.constant 0 : i32
    %c0_i32_0 = arith.constant 0 : i32
    %c0_i32_1 = arith.constant 0 : i32
    %c0_i32_2 = arith.constant 0 : i32
    return %c0_i32, %c0_i32_0, %c0_i32_1 : i32, i32, i32
  }
  func.func @transform_2(%arg0: i32) -> (i32, i32, i32) {
    %c0_i32 = arith.constant 0 : i32
    %c0_i32_0 = arith.constant 0 : i32
    %c0_i32_1 = arith.constant 0 : i32
    %c0_i32_2 = arith.constant 0 : i32
    return %c0_i32, %c0_i32_0, %c0_i32_1 : i32, i32, i32
  }
}

module attributes {stable_mosaic.version = 11 : i64} {
  func.func @_linear_skip_kernel(%arg0: i32, %arg1: memref<128x128xf32, #tpu.memory_space<vmem>>, %arg2: memref<128x128xf32, #tpu.memory_space<vmem>>, %arg3: memref<128x128xf32, #tpu.memory_space<vmem>>, %arg4: memref<1x128xf32, #tpu.memory_space<vmem>>, %arg5: memref<128x128xf32, #tpu.memory_space<vmem>>) attributes {dimension_semantics = [#tpu.dimension_semantics<parallel>], iteration_bounds = array<i64: 1>, scalar_prefetch = 0 : i64, scratch_operands = 0 : i64, tpu.core_type = #tpu.core_type<tc>, window_params = [{transform_indices = @transform_0, window_bounds = array<i64: 128, 128>}, {transform_indices = @transform_1, window_bounds = array<i64: 128, 128>}, {pipeline_mode = #tpu.pipeline_mode<synchronous>, transform_indices = @transform_2, window_bounds = array<i64: 128, 128>}, {pipeline_mode = #tpu.pipeline_mode<synchronous>, transform_indices = @transform_3, window_bounds = array<i64: 1, 128>}, {transform_indices = @transform_4, window_bounds = array<i64: 128, 128>}]} {
    %c0 = arith.constant 0 : index
    %c0_0 = arith.constant 0 : index
    %0 = vector.load %arg1[%c0, %c0_0] : memref<128x128xf32, #tpu.memory_space<vmem>>, vector<128x128xf32>
    %c0_1 = arith.constant 0 : index
    %c0_2 = arith.constant 0 : index
    %1 = vector.load %arg3[%c0_1, %c0_2] : memref<128x128xf32, #tpu.memory_space<vmem>>, vector<128x128xf32>
    %cst = arith.constant dense<0.000000e+00> : vector<128x128xf32>
    %2 = tpu.matmul %0, %1, %cst {dimension_numbers = #tpu.dot_dimension_numbers<[1], [0], [0], [1], [0, 0, 1, 1], [], []>} : vector<128x128xf32>, vector<128x128xf32>, vector<128x128xf32> -> vector<128x128xf32>
    %c0_3 = arith.constant 0 : index
    %c0_4 = arith.constant 0 : index
    %3 = vector.load %arg4[%c0_3, %c0_4] : memref<1x128xf32, #tpu.memory_space<vmem>>, vector<1x128xf32>
    %4 = vector.broadcast %3 : vector<1x128xf32> to vector<128x128xf32>
    %5 = arith.addf %2, %4 : vector<128x128xf32>
    %c0_5 = arith.constant 0 : index
    %c0_6 = arith.constant 0 : index
    %6 = vector.load %arg2[%c0_5, %c0_6] : memref<128x128xf32, #tpu.memory_space<vmem>>, vector<128x128xf32>
    %7 = arith.addf %5, %6 : vector<128x128xf32>
    %cst_7 = arith.constant 0.000000e+00 : f32
    %8 = vector.broadcast %cst_7 : f32 to vector<128x128xf32>
    %9 = arith.maximumf %7, %8 : vector<128x128xf32>
    %c0_8 = arith.constant 0 : index
    %c0_9 = arith.constant 0 : index
    %10 = vector.load %arg5[%c0_8, %c0_9] : memref<128x128xf32, #tpu.memory_space<vmem>>, vector<128x128xf32>
    tpu.vector_store %arg5[%c0_8, %c0_9], %9 {strides = array<i32>} : memref<128x128xf32, #tpu.memory_space<vmem>>, vector<128x128xf32>,
    return
  }
  func.func @transform_0(%arg0: i32) -> (i32, i32) {
    %c0_i32 = arith.constant 0 : i32
    %c0_i32_0 = arith.constant 0 : i32
    return %arg0, %c0_i32 : i32, i32
  }
  func.func @transform_1(%arg0: i32) -> (i32, i32) {
    %c0_i32 = arith.constant 0 : i32
    %c0_i32_0 = arith.constant 0 : i32
    return %arg0, %c0_i32 : i32, i32
  }
  func.func @transform_2(%arg0: i32) -> (i32, i32) {
    %c0_i32 = arith.constant 0 : i32
    %c0_i32_0 = arith.constant 0 : i32
    %c0_i32_1 = arith.constant 0 : i32
    return %c0_i32, %c0_i32_0 : i32, i32
  }
  func.func @transform_3(%arg0: i32) -> (i32, i32) {
    %c0_i32 = arith.constant 0 : i32
    %c0_i32_0 = arith.constant 0 : i32
    %c0_i32_1 = arith.constant 0 : i32
    return %c0_i32, %c0_i32_0 : i32, i32
  }
  func.func @transform_4(%arg0: i32) -> (i32, i32) {
    %c0_i32 = arith.constant 0 : i32
    %c0_i32_0 = arith.constant 0 : i32
    return %arg0, %c0_i32 : i32, i32
  }
}

module attributes {stable_mosaic.version = 11 : i64} {
  func.func @_linear_skip_kernel(%arg0: i32, %arg1: memref<128x128xf32, #tpu.memory_space<vmem>>, %arg2: memref<128x128xf32, #tpu.memory_space<vmem>>, %arg3: memref<128x128xf32, #tpu.memory_space<vmem>>, %arg4: memref<1x128xf32, #tpu.memory_space<vmem>>, %arg5: memref<128x128xf32, #tpu.memory_space<vmem>>) attributes {dimension_semantics = [#tpu.dimension_semantics<parallel>], iteration_bounds = array<i64: 1>, scalar_prefetch = 0 : i64, scratch_operands = 0 : i64, tpu.core_type = #tpu.core_type<tc>, window_params = [{transform_indices = @transform_0, window_bounds = array<i64: 128, 128>}, {transform_indices = @transform_1, window_bounds = array<i64: 128, 128>}, {pipeline_mode = #tpu.pipeline_mode<synchronous>, transform_indices = @transform_2, window_bounds = array<i64: 128, 128>}, {pipeline_mode = #tpu.pipeline_mode<synchronous>, transform_indices = @transform_3, window_bounds = array<i64: 1, 128>}, {transform_indices = @transform_4, window_bounds = array<i64: 128, 128>}]} {
    %c0 = arith.constant 0 : index
    %c0_0 = arith.constant 0 : index
    %0 = vector.load %arg1[%c0, %c0_0] : memref<128x128xf32, #tpu.memory_space<vmem>>, vector<128x128xf32>
    %c0_1 = arith.constant 0 : index
    %c0_2 = arith.constant 0 : index
    %1 = vector.load %arg3[%c0_1, %c0_2] : memref<128x128xf32, #tpu.memory_space<vmem>>, vector<128x128xf32>
    %cst = arith.constant dense<0.000000e+00> : vector<128x128xf32>
    %2 = tpu.matmul %0, %1, %cst {dimension_numbers = #tpu.dot_dimension_numbers<[1], [0], [0], [1], [0, 0, 1, 1], [], []>} : vector<128x128xf32>, vector<128x128xf32>, vector<128x128xf32> -> vector<128x128xf32>
    %c0_3 = arith.constant 0 : index
    %c0_4 = arith.constant 0 : index
    %3 = vector.load %arg4[%c0_3, %c0_4] : memref<1x128xf32, #tpu.memory_space<vmem>>, vector<1x128xf32>
    %4 = vector.broadcast %3 : vector<1x128xf32> to vector<128x128xf32>
    %5 = arith.addf %2, %4 : vector<128x128xf32>
    %c0_5 = arith.constant 0 : index
    %c0_6 = arith.constant 0 : index
    %6 = vector.load %arg2[%c0_5, %c0_6] : memref<128x128xf32, #tpu.memory_space<vmem>>, vector<128x128xf32>
    %7 = arith.addf %5, %6 : vector<128x128xf32>
    %c0_7 = arith.constant 0 : index
    %c0_8 = arith.constant 0 : index
    %8 = vector.load %arg5[%c0_7, %c0_8] : memref<128x128xf32, #tpu.memory_space<vmem>>, vector<128x128xf32>
    tpu.vector_store %arg5[%c0_7, %c0_8], %7 {strides = array<i32>} : memref<128x128xf32, #tpu.memory_space<vmem>>, vector<128x128xf32>,
    return
  }
  func.func @transform_0(%arg0: i32) -> (i32, i32) {
    %c0_i32 = arith.constant 0 : i32
    %c0_i32_0 = arith.constant 0 : i32
    return %arg0, %c0_i32 : i32, i32
  }
  func.func @transform_1(%arg0: i32) -> (i32, i32) {
    %c0_i32 = arith.constant 0 : i32
    %c0_i32_0 = arith.constant 0 : i32
    return %arg0, %c0_i32 : i32, i32
  }
  func.func @transform_2(%arg0: i32) -> (i32, i32) {
    %c0_i32 = arith.constant 0 : i32
    %c0_i32_0 = arith.constant 0 : i32
    %c0_i32_1 = arith.constant 0 : i32
    return %c0_i32, %c0_i32_0 : i32, i32
  }
  func.func @transform_3(%arg0: i32) -> (i32, i32) {
    %c0_i32 = arith.constant 0 : i32
    %c0_i32_0 = arith.constant 0 : i32
    %c0_i32_1 = arith.constant 0 : i32
    return %c0_i32, %c0_i32_0 : i32, i32
  }
  func.func @transform_4(%arg0: i32) -> (i32, i32) {
    %c0_i32 = arith.constant 0 : i32
    %c0_i32_0 = arith.constant 0 : i32
    return %arg0, %c0_i32 : i32, i32
  }
}

module attributes {stable_mosaic.version = 11 : i64} {
  func.func @_proj_kernel(%arg0: i32, %arg1: memref<128x128xf32, #tpu.memory_space<vmem>>, %arg2: memref<128x128xf32, #tpu.memory_space<vmem>>, %arg3: memref<1x128xf32, #tpu.memory_space<vmem>>, %arg4: memref<128x4xf32, #tpu.memory_space<vmem>>, %arg5: memref<1x4xf32, #tpu.memory_space<vmem>>, %arg6: memref<128x4xf32, #tpu.memory_space<vmem>>) attributes {dimension_semantics = [#tpu.dimension_semantics<parallel>], iteration_bounds = array<i64: 1>, scalar_prefetch = 0 : i64, scratch_operands = 0 : i64, tpu.core_type = #tpu.core_type<tc>, window_params = [{transform_indices = @transform_0, window_bounds = array<i64: 128, 128>}, {pipeline_mode = #tpu.pipeline_mode<synchronous>, transform_indices = @transform_1, window_bounds = array<i64: 128, 128>}, {pipeline_mode = #tpu.pipeline_mode<synchronous>, transform_indices = @transform_2, window_bounds = array<i64: 1, 128>}, {pipeline_mode = #tpu.pipeline_mode<synchronous>, transform_indices = @transform_3, window_bounds = array<i64: 128, 4>}, {pipeline_mode = #tpu.pipeline_mode<synchronous>, transform_indices = @transform_4, window_bounds = array<i64: 1, 4>}, {transform_indices = @transform_5, window_bounds = array<i64: 128, 4>}]} {
    %c0 = arith.constant 0 : index
    %c0_0 = arith.constant 0 : index
    %0 = vector.load %arg1[%c0, %c0_0] : memref<128x128xf32, #tpu.memory_space<vmem>>, vector<128x128xf32>
    %c0_1 = arith.constant 0 : index
    %c0_2 = arith.constant 0 : index
    %1 = vector.load %arg2[%c0_1, %c0_2] : memref<128x128xf32, #tpu.memory_space<vmem>>, vector<128x128xf32>
    %cst = arith.constant dense<0.000000e+00> : vector<128x128xf32>
    %2 = tpu.matmul %0, %1, %cst {dimension_numbers = #tpu.dot_dimension_numbers<[1], [0], [0], [1], [0, 0, 1, 1], [], []>} : vector<128x128xf32>, vector<128x128xf32>, vector<128x128xf32> -> vector<128x128xf32>
    %c0_3 = arith.constant 0 : index
    %c0_4 = arith.constant 0 : index
    %3 = vector.load %arg3[%c0_3, %c0_4] : memref<1x128xf32, #tpu.memory_space<vmem>>, vector<1x128xf32>
    %4 = vector.broadcast %3 : vector<1x128xf32> to vector<128x128xf32>
    %5 = arith.addf %2, %4 : vector<128x128xf32>
    %cst_5 = arith.constant 0.000000e+00 : f32
    %6 = vector.broadcast %cst_5 : f32 to vector<128x128xf32>
    %7 = arith.maximumf %5, %6 : vector<128x128xf32>
    %c0_6 = arith.constant 0 : index
    %c0_7 = arith.constant 0 : index
    %8 = vector.load %arg4[%c0_6, %c0_7] : memref<128x4xf32, #tpu.memory_space<vmem>>, vector<128x4xf32>
    %cst_8 = arith.constant dense<0.000000e+00> : vector<128x4xf32>
    %9 = tpu.matmul %7, %8, %cst_8 {dimension_numbers = #tpu.dot_dimension_numbers<[1], [0], [0], [1], [0, 0, 1, 1], [], []>} : vector<128x128xf32>, vector<128x4xf32>, vector<128x4xf32> -> vector<128x4xf32>
    %c0_9 = arith.constant 0 : index
    %c0_10 = arith.constant 0 : index
    %10 = vector.load %arg5[%c0_9, %c0_10] : memref<1x4xf32, #tpu.memory_space<vmem>>, vector<1x4xf32>
    %11 = vector.broadcast %10 : vector<1x4xf32> to vector<128x4xf32>
    %12 = arith.addf %9, %11 : vector<128x4xf32>
    %c0_11 = arith.constant 0 : index
    %c0_12 = arith.constant 0 : index
    %13 = vector.load %arg6[%c0_11, %c0_12] : memref<128x4xf32, #tpu.memory_space<vmem>>, vector<128x4xf32>
    tpu.vector_store %arg6[%c0_11, %c0_12], %12 {strides = array<i32>} : memref<128x4xf32, #tpu.memory_space<vmem>>, vector<128x4xf32>,
    return
  }
  func.func @transform_0(%arg0: i32) -> (i32, i32) {
    %c0_i32 = arith.constant 0 : i32
    %c0_i32_0 = arith.constant 0 : i32
    return %arg0, %c0_i32 : i32, i32
  }
  func.func @transform_1(%arg0: i32) -> (i32, i32) {
    %c0_i32 = arith.constant 0 : i32
    %c0_i32_0 = arith.constant 0 : i32
    %c0_i32_1 = arith.constant 0 : i32
    return %c0_i32, %c0_i32_0 : i32, i32
  }
  func.func @transform_2(%arg0: i32) -> (i32, i32) {
    %c0_i32 = arith.constant 0 : i32
    %c0_i32_0 = arith.constant 0 : i32
    %c0_i32_1 = arith.constant 0 : i32
    return %c0_i32, %c0_i32_0 : i32, i32
  }
  func.func @transform_3(%arg0: i32) -> (i32, i32) {
    %c0_i32 = arith.constant 0 : i32
    %c0_i32_0 = arith.constant 0 : i32
    %c0_i32_1 = arith.constant 0 : i32
    return %c0_i32, %c0_i32_0 : i32, i32
  }
  func.func @transform_4(%arg0: i32) -> (i32, i32) {
    %c0_i32 = arith.constant 0 : i32
    %c0_i32_0 = arith.constant 0 : i32
    %c0_i32_1 = arith.constant 0 : i32
    return %c0_i32, %c0_i32_0 : i32, i32
  }
  func.func @transform_5(%arg0: i32) -> (i32, i32) {
    %c0_i32 = arith.constant 0 : i32
    %c0_i32_0 = arith.constant 0 : i32
    return %arg0, %c0_i32 : i32, i32
  }
}

</mosaic_0001>

<bundles_post_ra>
// kernel: fno2d_forward.6
= control target key start
LH: loop header
LB: loop body
LE: loop exit
PB: predicated region body
PF: predicated region fallthrough
CT: control target
= control target key end

     0   :  { %8 = vsyncpa [#allocation3], 0  ;;  %s428_s0 = inlined_call_operand.vmem [shape: f32[128,12], index: 0, kind: input, shape index: {}]   ;;  %s429_s1 = inlined_call_operand.hbm [shape: f32[12,128], index: 1, kind: input, shape index: {}]   ;;  %s430_s2 = inlined_call_operand.hbm [shape: f32[1,128], index: 2, kind: input, shape index: {}]   ;;  %s431_s3 = inlined_call_operand.vmem [shape: f32[128,128], index: 3, kind: output, shape index: {}]  }
   0x1   :  { %s16_s14 = sshll.u32 %s429_s1, 4  ;;  %s17_s14 = int_to_ptr.hbm [resolvable:$true] %s16_s14 }
   0x2   :  { %9 = vsyncpa [#allocation5], 0  ;;  %s286_s15 = smov [#allocation2]   ;;  %s30_s19 = sshll.u32 %s430_s2, 4  ;;  %s31_s19 = int_to_ptr.hbm [resolvable:$true] %s30_s19 }
   0x3   :  { %s18_s16 = sshll.u32 %s286_s15, 4  ;;  %s287_s20 = smov 128   ;;  %s19_s16 = int_to_ptr.vmem [resolvable:$true] %s18_s16 }
   0x4   :  { %s288_s21 = smov 8   ;;  %s289_s22 = smov [#allocation4]  }
   0x5   :  { %24 = dma.hbm_to_vmem [thread:$0]  %s17_s14, 256, %s19_s16, [#allocation3], %s287_s20, %s287_s20, %s288_s21  }
   0x6   :  { %s32_s23 = sshll.u32 %s289_s22, 4  ;;  %s33_s23 = int_to_ptr.vmem [resolvable:$true] %s32_s23 }
   0x7   :  { %35 = dma.hbm_to_vmem [thread:$0]  %s31_s19, 16, %s33_s23, [#allocation5]  }
   0x8   :  { %282 = dma.done.wait [#allocation3], 256  }
   0x9   :  { %283 = vsyncadd [#allocation3], 4294967040 }
   0xa   :  { %284 = dma.done.wait [#allocation5], 16  }
   0xb   :  { %285 = vsyncadd [#allocation5], 4294967280  ;;  %vm115_vm0 = vcmask 1043456   ;;  %v61_v0 = vld [vmem:[#allocation2 + $0x8] sm:$0xf]  ;;  %v60_v1 = vld [vmem:[#allocation2] sm:$0xff] }
   0xc   :  { %224 = vmatpush.msk.msra.mxu2 %vm115_vm0, %v61_v0  ;;  %225 = vmatpush.msk.msra.mxu3 %vm115_vm0, %v61_v0  ;;  %v52_v2 = vld [vmem:[%s428_s0 + $0x40] sm:$0xff]  ;;  %vm66_vm1 = vcmask 97280   ;;  %v53_v6 = vld [vmem:[%s428_s0 + $0x48] sm:$0xff]  ;;  %v54_v10 = vld [vmem:[%s428_s0 + $0x50] sm:$0xff] }
   0xd   :  { %v56_v3 = vld [vmem:[%s428_s0 + $0x60] sm:$0xff]  ;;  %206 = vmatpush.msk.msra.mxu0 %vm115_vm0, %v61_v0  ;;  %223 = vmatpush.msk.msra.mxu1 %vm115_vm0, %v61_v0  ;;  %v57_v7 = vld [vmem:[%s428_s0 + $0x68] sm:$0xff]  ;;  %v58_v11 = vld [vmem:[%s428_s0 + $0x70] sm:$0xff] }
   0xe   :  { %227 = vmatpush.msra.mxu2 %v60_v1  ;;  %228 = vmatpush.msra.mxu3 %v60_v1  ;;  %v44_v4 = vld [vmem:[%s428_s0] sm:$0xff]  ;;  %v45_v8 = vld [vmem:[%s428_s0 + $0x8] sm:$0xff]  ;;  %v46_v12 = vld [vmem:[%s428_s0 + $0x10] sm:$0xff] }
   0xf   :  { %v48_v5 = vld [vmem:[%s428_s0 + $0x20] sm:$0xff]  ;;  %215 = vmatmul.msk.f32.vlgmr.msra.gmra.mxu2 %vm66_vm1, %v52_v2  ;;  %219 = vmatmul.msk.f32.vlgmr.msra.gmra.mxu3 %vm66_vm1, %v56_v3  ;;  %v49_v9 = vld [vmem:[%s428_s0 + $0x28] sm:$0xff]  ;;  %v50_v13 = vld [vmem:[%s428_s0 + $0x30] sm:$0xff] }
  0x10   :  { %134 = vmatpush.msra.mxu0 %v60_v1  ;;  %226 = vmatpush.msra.mxu1 %v60_v1  ;;  %v55_v14 = vld [vmem:[%s428_s0 + $0x58] sm:$0xff]  ;;  %v233_v18 = vld [vmem:[#allocation4] ss:$0 sm:$0xff] }
  0x11   :  { %207 = vmatmul.msk.f32.vlgmr.msra.gmra.mxu0 %vm66_vm1, %v44_v4  ;;  %211 = vmatmul.msk.f32.vlgmr.msra.gmra.mxu1 %vm66_vm1, %v48_v5  ;;  %v59_v15 = vld [vmem:[%s428_s0 + $0x78] sm:$0xff] }
  0x12   :  { %v47_v16 = vld [vmem:[%s428_s0 + $0x18] sm:$0xff] }
  0x13   :  { %v51_v17 = vld [vmem:[%s428_s0 + $0x38] sm:$0xff] }
  0x17   :  { %216 = vmatmul.msk.f32.gmra.mxu2 %vm66_vm1, %v53_v6  ;;  %220 = vmatmul.msk.f32.gmra.mxu3 %vm66_vm1, %v57_v7 }
  0x19   :  { %208 = vmatmul.msk.f32.gmra.mxu0 %vm66_vm1, %v45_v8  ;;  %212 = vmatmul.msk.f32.gmra.mxu1 %vm66_vm1, %v49_v9 }
  0x1f   :  { %217 = vmatmul.msk.f32.gmra.mxu2 %vm66_vm1, %v54_v10  ;;  %221 = vmatmul.msk.f32.gmra.mxu3 %vm66_vm1, %v58_v11 }
  0x21   :  { %209 = vmatmul.msk.f32.gmra.mxu0 %vm66_vm1, %v46_v12  ;;  %213 = vmatmul.msk.f32.gmra.mxu1 %vm66_vm1, %v50_v13 }
  0x27   :  { %218 = vmatmul.msk.f32.gmra.mxu2 %vm66_vm1, %v55_v14  ;;  %222 = vmatmul.msk.f32.gmra.mxu3 %vm66_vm1, %v59_v15 }
  0x29   :  { %210 = vmatmul.msk.f32.gmra.mxu0 %vm66_vm1, %v47_v16  ;;  %214 = vmatmul.msk.f32.gmra.mxu1 %vm66_vm1, %v51_v17 }
  0x8e   :  { %v136_v19 = vpop.f32.mrf.mxu0  ;;  %v148_v20 = vpop.f32.mrf.mxu1 }
  0x8f   :  { %v137_v21 = vadd.f32 %v233_v18, %v136_v19  ;;  %v149_v22 = vadd.f32 %v233_v18, %v148_v20 }
  0x91   :  { %184 = vst [vmem:[%s431_s3] sm:$0xff] %v137_v21 }
  0x92   :  { %188 = vst [vmem:[%s431_s3 + $0x20] sm:$0xff] %v149_v22  ;;  %v160_v23 = vpop.f32.mrf.mxu2  ;;  %v172_v24 = vpop.f32.mrf.mxu3 }
  0x93   :  { %v161_v25 = vadd.f32 %v233_v18, %v160_v23  ;;  %v173_v26 = vadd.f32 %v233_v18, %v172_v24 }
  0x95   :  { %192 = vst [vmem:[%s431_s3 + $0x40] sm:$0xff] %v161_v25 }
  0x96   :  { %196 = vst [vmem:[%s431_s3 + $0x60] sm:$0xff] %v173_v26  ;;  %v139_v27 = vpop.f32.mrf.mxu0  ;;  %v151_v28 = vpop.f32.mrf.mxu1 }
  0x97   :  { %v140_v29 = vadd.f32 %v233_v18, %v139_v27  ;;  %v152_v30 = vadd.f32 %v233_v18, %v151_v28 }
  0x99   :  { %185 = vst [vmem:[%s431_s3 + $0x8] sm:$0xff] %v140_v29 }
  0x9a   :  { %189 = vst [vmem:[%s431_s3 + $0x28] sm:$0xff] %v152_v30  ;;  %v163_v31 = vpop.f32.mrf.mxu2  ;;  %v175_v32 = vpop.f32.mrf.mxu3 }
  0x9b   :  { %v164_v33 = vadd.f32 %v233_v18, %v163_v31  ;;  %v176_v34 = vadd.f32 %v233_v18, %v175_v32 }
  0x9d   :  { %193 = vst [vmem:[%s431_s3 + $0x48] sm:$0xff] %v164_v33 }
  0x9e   :  { %197 = vst [vmem:[%s431_s3 + $0x68] sm:$0xff] %v176_v34  ;;  %v142_v35 = vpop.f32.mrf.mxu0  ;;  %v154_v36 = vpop.f32.mrf.mxu1 }
  0x9f   :  { %v143_v37 = vadd.f32 %v233_v18, %v142_v35  ;;  %v155_v38 = vadd.f32 %v233_v18, %v154_v36 }
  0xa1   :  { %186 = vst [vmem:[%s431_s3 + $0x10] sm:$0xff] %v143_v37 }
  0xa2   :  { %190 = vst [vmem:[%s431_s3 + $0x30] sm:$0xff] %v155_v38  ;;  %v166_v39 = vpop.f32.mrf.mxu2  ;;  %v178_v40 = vpop.f32.mrf.mxu3 }
  0xa3   :  { %v167_v41 = vadd.f32 %v233_v18, %v166_v39  ;;  %v179_v42 = vadd.f32 %v233_v18, %v178_v40 }
  0xa5   :  { %194 = vst [vmem:[%s431_s3 + $0x50] sm:$0xff] %v167_v41 }
  0xa6   :  { %198 = vst [vmem:[%s431_s3 + $0x70] sm:$0xff] %v179_v42  ;;  %v145_v43 = vpop.f32.mrf.mxu0  ;;  %v157_v44 = vpop.f32.mrf.mxu1 }
  0xa7   :  { %v146_v45 = vadd.f32 %v233_v18, %v145_v43  ;;  %v158_v46 = vadd.f32 %v233_v18, %v157_v44 }
  0xa9   :  { %187 = vst [vmem:[%s431_s3 + $0x18] sm:$0xff] %v146_v45 }
  0xaa   :  { %191 = vst [vmem:[%s431_s3 + $0x38] sm:$0xff] %v158_v46  ;;  %v169_v47 = vpop.f32.mrf.mxu2  ;;  %v181_v48 = vpop.f32.mrf.mxu3 }
  0xab   :  { %v170_v49 = vadd.f32 %v233_v18, %v169_v47  ;;  %v182_v50 = vadd.f32 %v233_v18, %v181_v48 }
  0xad   :  { %195 = vst [vmem:[%s431_s3 + $0x58] sm:$0xff] %v170_v49 }
  0xae   :  { %199 = vst [vmem:[%s431_s3 + $0x78] sm:$0xff] %v182_v50 }
  0xaf   :  { %204 = vsyncpa [#allocation3], 1 }
  0xb0   :  { %205 = vsyncpa [#allocation5], 1 }

// kernel: fno2d_forward.7
= control target key start
LH: loop header
LB: loop body
LE: loop exit
PB: predicated region body
PF: predicated region fallthrough
CT: control target
= control target key end

     0   :  { %vm659_vm0 = vcmask 523264   ;;  %vm2316_vm1 = vcmask 517120   ;;  %s4784_s1 = inlined_call_operand.vmem [shape: f32[72,64,64], index: 1, kind: input, shape index: {}]   ;;  %s4785_s0 = inlined_call_operand.vmem [shape: f32[72,2,64], index: 0, kind: input, shape index: {}]   ;;  %s4786_s2 = inlined_call_operand.vmem [shape: f32[72,2,64], index: 2, kind: output, shape index: {}]  }
   0x1   :  { %v106_v0 = vld [vmem:[%s4784_s1 + $0xb8] sm:$0xff]  ;;  %v105_v2 = vld [vmem:[%s4784_s1 + $0xb0] sm:$0xff]  ;;  %v104_v4 = vld [vmem:[%s4784_s1 + $0xa8] sm:$0xff] }
   0x2   :  { %v114_v1 = vld [vmem:[%s4784_s1 + $0xf8] sm:$0xff]  ;;  %717 = vmatpush.msra.mxu2 %v106_v0  ;;  %v113_v3 = vld [vmem:[%s4784_s1 + $0xf0] sm:$0xff]  ;;  %v112_v5 = vld [vmem:[%s4784_s1 + $0xe8] sm:$0xff] }
   0x3   :  { %740 = vmatpush.msra.mxu3 %v114_v1  ;;  %v90_v6 = vld [vmem:[%s4784_s1 + $0x38] sm:$0xff]  ;;  %v89_v8 = vld [vmem:[%s4784_s1 + $0x30] sm:$0xff]  ;;  %v103_v10 = vld [vmem:[%s4784_s1 + $0xa0] sm:$0xff] }
   0x4   :  { %v98_v7 = vld [vmem:[%s4784_s1 + $0x78] sm:$0xff]  ;;  %718 = vmatpush.msra.mxu2 %v105_v2  ;;  %v97_v9 = vld [vmem:[%s4784_s1 + $0x70] sm:$0xff]  ;;  %671 = vmatpush.msra.mxu0 %v90_v6  ;;  %v111_v11 = vld [vmem:[%s4784_s1 + $0xe0] sm:$0xff] }
   0x5   :  { %741 = vmatpush.msra.mxu3 %v113_v3  ;;  %694 = vmatpush.msra.mxu1 %v98_v7  ;;  %v88_v12 = vld [vmem:[%s4784_s1 + $0x28] sm:$0xff]  ;;  %v102_v14 = vld [vmem:[%s4784_s1 + $0x98] sm:$0xff]  ;;  %v87_v16 = vld [vmem:[%s4784_s1 + $0x20] sm:$0xff] }
   0x6   :  { %719 = vmatpush.msra.mxu2 %v104_v4  ;;  %v96_v13 = vld [vmem:[%s4784_s1 + $0x68] sm:$0xff]  ;;  %672 = vmatpush.msra.mxu0 %v89_v8  ;;  %v110_v15 = vld [vmem:[%s4784_s1 + $0xd8] sm:$0xff]  ;;  %v95_v17 = vld [vmem:[%s4784_s1 + $0x60] sm:$0xff] }
   0x7   :  { %742 = vmatpush.msra.mxu3 %v112_v5  ;;  %695 = vmatpush.msra.mxu1 %v97_v9  ;;  %v101_v18 = vld [vmem:[%s4784_s1 + $0x90] sm:$0xff]  ;;  %v86_v20 = vld [vmem:[%s4784_s1 + $0x18] sm:$0xff]  ;;  %v100_v22 = vld [vmem:[%s4784_s1 + $0x88] sm:$0xff] }
   0x8   :  { %720 = vmatpush.msra.mxu2 %v103_v10  ;;  %673 = vmatpush.msra.mxu0 %v88_v12  ;;  %v109_v19 = vld [vmem:[%s4784_s1 + $0xd0] sm:$0xff]  ;;  %v94_v21 = vld [vmem:[%s4784_s1 + $0x58] sm:$0xff]  ;;  %v108_v23 = vld [vmem:[%s4784_s1 + $0xc8] sm:$0xff] }
   0x9   :  { %743 = vmatpush.msra.mxu3 %v111_v11  ;;  %696 = vmatpush.msra.mxu1 %v96_v13  ;;  %v85_v24 = vld [vmem:[%s4784_s1 + $0x10] sm:$0xff]  ;;  %v99_v26 = vld [vmem:[%s4784_s1 + $0x80] sm:$0xff]  ;;  %v138_v28 = vld [vmem:[%s4784_s1 + $0x1b8] sm:$0xff] }
   0xa   :  { %721 = vmatpush.msra.mxu2 %v102_v14  ;;  %674 = vmatpush.msra.mxu0 %v87_v16  ;;  %v93_v25 = vld [vmem:[%s4784_s1 + $0x50] sm:$0xff]  ;;  %v107_v27 = vld [vmem:[%s4784_s1 + $0xc0] sm:$0xff]  ;;  %v146_v29 = vld [vmem:[%s4784_s1 + $0x1f8] sm:$0xff] }
   0xb   :  { %744 = vmatpush.msra.mxu3 %v110_v15  ;;  %697 = vmatpush.msra.mxu1 %v95_v17  ;;  %v84_v30 = vld [vmem:[%s4784_s1 + $0x8] sm:$0xff]  ;;  %v137_v32 = vld [vmem:[%s4784_s1 + $0x1b0] sm:$0xff]  ;;  %v83_v34 = vld [vmem:[%s4784_s1] sm:$0xff] }
   0xc   :  { %722 = vmatpush.msra.mxu2 %v101_v18  ;;  %675 = vmatpush.msra.mxu0 %v86_v20  ;;  %v92_v31 = vld [vmem:[%s4784_s1 + $0x48] sm:$0xff]  ;;  %v145_v33 = vld [vmem:[%s4784_s1 + $0x1f0] sm:$0xff]  ;;  %v91_v35 = vld [vmem:[%s4784_s1 + $0x40] sm:$0xff] }
   0xd   :  { %745 = vmatpush.msra.mxu3 %v109_v19  ;;  %698 = vmatpush.msra.mxu1 %v94_v21  ;;  %v136_v36 = vld [vmem:[%s4784_s1 + $0x1a8] sm:$0xff]  ;;  %v122_v38 = vld [vmem:[%s4784_s1 + $0x138] sm:$0xff]  ;;  %v135_v40 = vld [vmem:[%s4784_s1 + $0x1a0] sm:$0xff] }
   0xe   :  { %723 = vmatpush.msra.mxu2 %v100_v22  ;;  %676 = vmatpush.msra.mxu0 %v85_v24  ;;  %v144_v37 = vld [vmem:[%s4784_s1 + $0x1e8] sm:$0xff]  ;;  %v130_v39 = vld [vmem:[%s4784_s1 + $0x178] sm:$0xff]  ;;  %v143_v41 = vld [vmem:[%s4784_s1 + $0x1e0] sm:$0xff] }
   0xf   :  { %746 = vmatpush.msra.mxu3 %v108_v23  ;;  %699 = vmatpush.msra.mxu1 %v93_v25  ;;  %v121_v42 = vld [vmem:[%s4784_s1 + $0x130] sm:$0xff]  ;;  %v134_v44 = vld [vmem:[%s4784_s1 + $0x198] sm:$0xff]  ;;  %v120_v46 = vld [vmem:[%s4784_s1 + $0x128] sm:$0xff] }
  0x10   :  { %724 = vmatpush.msra.mxu2 %v99_v26  ;;  %677 = vmatpush.msra.mxu0 %v84_v30  ;;  %v129_v43 = vld [vmem:[%s4784_s1 + $0x170] sm:$0xff]  ;;  %v142_v45 = vld [vmem:[%s4784_s1 + $0x1d8] sm:$0xff]  ;;  %v128_v47 = vld [vmem:[%s4784_s1 + $0x168] sm:$0xff] }
  0x11   :  { %747 = vmatpush.msra.mxu3 %v107_v27  ;;  %700 = vmatpush.msra.mxu1 %v92_v31  ;;  %v133_v48 = vld [vmem:[%s4784_s1 + $0x190] sm:$0xff]  ;;  %v119_v50 = vld [vmem:[%s4784_s1 + $0x120] sm:$0xff]  ;;  %v132_v52 = vld [vmem:[%s4784_s1 + $0x188] sm:$0xff] }
  0x12   :  { %809 = vmatpush.msrb.mxu2 %v138_v28  ;;  %678 = vmatpush.msra.mxu0 %v83_v34  ;;  %v141_v49 = vld [vmem:[%s4784_s1 + $0x1d0] sm:$0xff]  ;;  %v127_v51 = vld [vmem:[%s4784_s1 + $0x160] sm:$0xff]  ;;  %v140_v53 = vld [vmem:[%s4784_s1 + $0x1c8] sm:$0xff] }
  0x13   :  { %832 = vmatpush.msrb.mxu3 %v146_v29  ;;  %701 = vmatpush.msra.mxu1 %v91_v35  ;;  %v118_v54 = vld [vmem:[%s4784_s1 + $0x118] sm:$0xff]  ;;  %v131_v56 = vld [vmem:[%s4784_s1 + $0x180] sm:$0xff]  ;;  %v117_v62 = vld [vmem:[%s4784_s1 + $0x110] sm:$0xff] }
  0x14   :  { %810 = vmatpush.msrb.mxu2 %v137_v32  ;;  %763 = vmatpush.msrb.mxu0 %v122_v38  ;;  %v126_v55 = vld [vmem:[%s4784_s1 + $0x158] sm:$0xff]  ;;  %v139_v57 = vld [vmem:[%s4784_s1 + $0x1c0] sm:$0xff]  ;;  %v125_v63 = vld [vmem:[%s4784_s1 + $0x150] sm:$0xff] }
  0x15   :  { %833 = vmatpush.msrb.mxu3 %v145_v33  ;;  %786 = vmatpush.msrb.mxu1 %v130_v39  ;;  %v13_v58 = vld [vmem:[%s4785_s0 + $0x4] sm:$0x3]  ;;  %v14_v59 = vld [vmem:[%s4785_s0 + $0x6] sm:$0x3]  ;;  %v170_v60 = vld [vmem:[%s4784_s1 + $0x2b8] sm:$0xff] }
  0x16   :  { %811 = vmatpush.msrb.mxu2 %v136_v36  ;;  %764 = vmatpush.msrb.mxu0 %v121_v42  ;;  %v178_v61 = vld [vmem:[%s4784_s1 + $0x2f8] sm:$0xff]  ;;  %v169_v0 = vld [vmem:[%s4784_s1 + $0x2b0] sm:$0xff]  ;;  %v116_v2 = vld [vmem:[%s4784_s1 + $0x108] sm:$0xff] }
  0x17   :  { %834 = vmatpush.msrb.mxu3 %v144_v37  ;;  %787 = vmatpush.msrb.mxu1 %v129_v43  ;;  %v177_v1 = vld [vmem:[%s4784_s1 + $0x2f0] sm:$0xff]  ;;  %v124_v3 = vld [vmem:[%s4784_s1 + $0x148] sm:$0xff]  ;;  %v115_v6 = vld [vmem:[%s4784_s1 + $0x100] sm:$0xff] }
  0x18   :  { %812 = vmatpush.msrb.mxu2 %v135_v40  ;;  %765 = vmatpush.msrb.mxu0 %v120_v46  ;;  %v168_v4 = vld [vmem:[%s4784_s1 + $0x2a8] sm:$0xff]  ;;  %v123_v7 = vld [vmem:[%s4784_s1 + $0x140] sm:$0xff]  ;;  %v154_v10 = vld [vmem:[%s4784_s1 + $0x238] sm:$0xff] }
  0x19   :  { %835 = vmatpush.msrb.mxu3 %v143_v41  ;;  %788 = vmatpush.msrb.mxu1 %v128_v47  ;;  %v176_v5 = vld [vmem:[%s4784_s1 + $0x2e8] sm:$0xff]  ;;  %v11_v8 = vld [vmem:[%s4785_s0] sm:$0x3]  ;;  %v12_v9 = vld [vmem:[%s4785_s0 + $0x2] sm:$0x3] }
  0x1a   :  { %813 = vmatpush.msrb.mxu2 %v134_v44  ;;  %766 = vmatpush.msrb.mxu0 %v119_v50  ;;  %v162_v11 = vld [vmem:[%s4784_s1 + $0x278] sm:$0xff]  ;;  %v167_v12 = vld [vmem:[%s4784_s1 + $0x2a0] sm:$0xff]  ;;  %v153_v14 = vld [vmem:[%s4784_s1 + $0x230] sm:$0xff] }
  0x1b   :  { %836 = vmatpush.msrb.mxu3 %v142_v45  ;;  %789 = vmatpush.msrb.mxu1 %v127_v51  ;;  %v175_v13 = vld [vmem:[%s4784_s1 + $0x2e0] sm:$0xff]  ;;  %v161_v15 = vld [vmem:[%s4784_s1 + $0x270] sm:$0xff]  ;;  %v166_v16 = vld [vmem:[%s4784_s1 + $0x298] sm:$0xff] }
  0x1c   :  { %814 = vmatpush.msrb.mxu2 %v133_v48  ;;  %767 = vmatpush.msrb.mxu0 %v118_v54  ;;  %v174_v17 = vld [vmem:[%s4784_s1 + $0x2d8] sm:$0xff]  ;;  %v152_v18 = vld [vmem:[%s4784_s1 + $0x228] sm:$0xff]  ;;  %v165_v20 = vld [vmem:[%s4784_s1 + $0x290] sm:$0xff] }
  0x1d   :  { %837 = vmatpush.msrb.mxu3 %v141_v49  ;;  %790 = vmatpush.msrb.mxu1 %v126_v55  ;;  %v160_v19 = vld [vmem:[%s4784_s1 + $0x268] sm:$0xff]  ;;  %v173_v21 = vld [vmem:[%s4784_s1 + $0x2d0] sm:$0xff]  ;;  %v151_v22 = vld [vmem:[%s4784_s1 + $0x220] sm:$0xff] }
  0x1e   :  { %815 = vmatpush.msrb.mxu2 %v132_v52  ;;  %2396 = vmatmul.msk.f32.vlgmr.msra.gmra.mxu3 %vm659_vm0, %v14_v59  ;;  %v159_v23 = vld [vmem:[%s4784_s1 + $0x260] sm:$0xff]  ;;  %v164_v24 = vld [vmem:[%s4784_s1 + $0x288] sm:$0xff]  ;;  %v150_v26 = vld [vmem:[%s4784_s1 + $0x218] sm:$0xff] }
  0x1f   :  { %838 = vmatpush.msrb.mxu3 %v140_v53  ;;  %2395 = vmatmul.msk.f32.vlgmr.msra.gmra.mxu2 %vm659_vm0, %v13_v58  ;;  %v172_v25 = vld [vmem:[%s4784_s1 + $0x2c8] sm:$0xff]  ;;  %v158_v27 = vld [vmem:[%s4784_s1 + $0x258] sm:$0xff]  ;;  %v163_v28 = vld [vmem:[%s4784_s1 + $0x280] sm:$0xff] }
  0x20   :  { %816 = vmatpush.msrb.mxu2 %v131_v56  ;;  %768 = vmatpush.msrb.mxu0 %v117_v62  ;;  %v171_v29 = vld [vmem:[%s4784_s1 + $0x2c0] sm:$0xff]  ;;  %v17_v30 = vld [vmem:[%s4785_s0 + $0xc] sm:$0x3]  ;;  %v18_v31 = vld [vmem:[%s4785_s0 + $0xe] sm:$0x3] }
  0x21   :  { %839 = vmatpush.msrb.mxu3 %v139_v57  ;;  %791 = vmatpush.msrb.mxu1 %v125_v63  ;;  %v202_v32 = vld [vmem:[%s4784_s1 + $0x3b8] sm:$0xff]  ;;  %v149_v34 = vld [vmem:[%s4784_s1 + $0x210] sm:$0xff]  ;;  %v148_v38 = vld [vmem:[%s4784_s1 + $0x208] sm:$0xff] }
  0x22   :  { %901 = vmatpush.msra.mxu2 %v170_v60  ;;  %769 = vmatpush.msrb.mxu0 %v116_v2  ;;  %v210_v33 = vld [vmem:[%s4784_s1 + $0x3f8] sm:$0xff]  ;;  %v157_v35 = vld [vmem:[%s4784_s1 + $0x250] sm:$0xff]  ;;  %v156_v39 = vld [vmem:[%s4784_s1 + $0x248] sm:$0xff] }
  0x23   :  { %924 = vmatpush.msra.mxu3 %v178_v61  ;;  %792 = vmatpush.msrb.mxu1 %v124_v3  ;;  %v201_v36 = vld [vmem:[%s4784_s1 + $0x3b0] sm:$0xff]  ;;  %v200_v40 = vld [vmem:[%s4784_s1 + $0x3a8] sm:$0xff]  ;;  %v147_v42 = vld [vmem:[%s4784_s1 + $0x200] sm:$0xff] }
  0x24   :  { %902 = vmatpush.msra.mxu2 %v169_v0  ;;  %770 = vmatpush.msrb.mxu0 %v115_v6  ;;  %v209_v37 = vld [vmem:[%s4784_s1 + $0x3f0] sm:$0xff]  ;;  %v208_v41 = vld [vmem:[%s4784_s1 + $0x3e8] sm:$0xff]  ;;  %v155_v43 = vld [vmem:[%s4784_s1 + $0x240] sm:$0xff] }
  0x25   :  { %925 = vmatpush.msra.mxu3 %v177_v1  ;;  %793 = vmatpush.msrb.mxu1 %v123_v7  ;;  %v15_v44 = vld [vmem:[%s4785_s0 + $0x8] sm:$0x3]  ;;  %v16_v45 = vld [vmem:[%s4785_s0 + $0xa] sm:$0x3]  ;;  %v186_v46 = vld [vmem:[%s4784_s1 + $0x338] sm:$0xff] }
  0x26   :  { %903 = vmatpush.msra.mxu2 %v168_v4  ;;  %2393 = vmatmul.msk.f32.vlgmr.msra.gmra.mxu0 %vm659_vm0, %v11_v8  ;;  %v194_v47 = vld [vmem:[%s4784_s1 + $0x378] sm:$0xff]  ;;  %v199_v48 = vld [vmem:[%s4784_s1 + $0x3a0] sm:$0xff]  ;;  %v185_v50 = vld [vmem:[%s4784_s1 + $0x330] sm:$0xff] }
  0x27   :  { %926 = vmatpush.msra.mxu3 %v176_v5  ;;  %2394 = vmatmul.msk.f32.vlgmr.msra.gmra.mxu1 %vm659_vm0, %v12_v9  ;;  %v207_v49 = vld [vmem:[%s4784_s1 + $0x3e0] sm:$0xff]  ;;  %v193_v51 = vld [vmem:[%s4784_s1 + $0x370] sm:$0xff]  ;;  %v198_v52 = vld [vmem:[%s4784_s1 + $0x398] sm:$0xff] }
  0x28   :  { %855 = vmatpush.msra.mxu0 %v154_v10  ;;  %878 = vmatpush.msra.mxu1 %v162_v11  ;;  %v206_v53 = vld [vmem:[%s4784_s1 + $0x3d8] sm:$0xff]  ;;  %v184_v54 = vld [vmem:[%s4784_s1 + $0x328] sm:$0xff]  ;;  %v197_v56 = vld [vmem:[%s4784_s1 + $0x390] sm:$0xff] }
  0x29   :  { %904 = vmatpush.msra.mxu2 %v167_v12  ;;  %927 = vmatpush.msra.mxu3 %v175_v13  ;;  %v192_v55 = vld [vmem:[%s4784_s1 + $0x368] sm:$0xff]  ;;  %v205_v57 = vld [vmem:[%s4784_s1 + $0x3d0] sm:$0xff]  ;;  %v183_v58 = vld [vmem:[%s4784_s1 + $0x320] sm:$0xff] }
  0x2a   :  { %856 = vmatpush.msra.mxu0 %v153_v14  ;;  %879 = vmatpush.msra.mxu1 %v161_v15  ;;  %v191_v59 = vld [vmem:[%s4784_s1 + $0x360] sm:$0xff]  ;;  %v196_v60 = vld [vmem:[%s4784_s1 + $0x388] sm:$0xff]  ;;  %v182_v62 = vld [vmem:[%s4784_s1 + $0x318] sm:$0xff] }
  0x2b   :  { %905 = vmatpush.msra.mxu2 %v166_v16  ;;  %928 = vmatpush.msra.mxu3 %v174_v17  ;;  %v204_v61 = vld [vmem:[%s4784_s1 + $0x3c8] sm:$0xff]  ;;  %v190_v63 = vld [vmem:[%s4784_s1 + $0x358] sm:$0xff]  ;;  %v195_v0 = vld [vmem:[%s4784_s1 + $0x380] sm:$0xff] }
  0x2c   :  { %857 = vmatpush.msra.mxu0 %v152_v18  ;;  %880 = vmatpush.msra.mxu1 %v160_v19  ;;  %v203_v1 = vld [vmem:[%s4784_s1 + $0x3c0] sm:$0xff]  ;;  %v21_v2 = vld [vmem:[%s4785_s0 + $0x14] sm:$0x3]  ;;  %v22_v3 = vld [vmem:[%s4785_s0 + $0x16] sm:$0x3] }
  0x2d   :  { %906 = vmatpush.msra.mxu2 %v165_v20  ;;  %929 = vmatpush.msra.mxu3 %v173_v21  ;;  %v234_v4 = vld [vmem:[%s4784_s1 + $0x4b8] sm:$0xff]  ;;  %v181_v6 = vld [vmem:[%s4784_s1 + $0x310] sm:$0xff]  ;;  %v180_v10 = vld [vmem:[%s4784_s1 + $0x308] sm:$0xff] }
  0x2e   :  { %858 = vmatpush.msra.mxu0 %v151_v22  ;;  %881 = vmatpush.msra.mxu1 %v159_v23  ;;  %v242_v5 = vld [vmem:[%s4784_s1 + $0x4f8] sm:$0xff]  ;;  %v189_v7 = vld [vmem:[%s4784_s1 + $0x350] sm:$0xff]  ;;  %v188_v11 = vld [vmem:[%s4784_s1 + $0x348] sm:$0xff] }
  0x2f   :  { %907 = vmatpush.msra.mxu2 %v164_v24  ;;  %930 = vmatpush.msra.mxu3 %v172_v25  ;;  %v233_v8 = vld [vmem:[%s4784_s1 + $0x4b0] sm:$0xff]  ;;  %v232_v12 = vld [vmem:[%s4784_s1 + $0x4a8] sm:$0xff]  ;;  %v179_v14 = vld [vmem:[%s4784_s1 + $0x300] sm:$0xff] }
  0x30   :  { %859 = vmatpush.msra.mxu0 %v150_v26  ;;  %882 = vmatpush.msra.mxu1 %v158_v27  ;;  %v241_v9 = vld [vmem:[%s4784_s1 + $0x4f0] sm:$0xff]  ;;  %v240_v13 = vld [vmem:[%s4784_s1 + $0x4e8] sm:$0xff]  ;;  %v187_v15 = vld [vmem:[%s4784_s1 + $0x340] sm:$0xff] }
  0x31   :  { %908 = vmatpush.msra.mxu2 %v163_v28  ;;  %931 = vmatpush.msra.mxu3 %v171_v29  ;;  %v19_v16 = vld [vmem:[%s4785_s0 + $0x10] sm:$0x3]  ;;  %v20_v17 = vld [vmem:[%s4785_s0 + $0x12] sm:$0x3]  ;;  %v218_v18 = vld [vmem:[%s4784_s1 + $0x438] sm:$0xff] }
  0x32   :  { %2399 = vmatmul.msk.f32.vlgmr.msrb.gmra.mxu2 %vm659_vm0, %v17_v30  ;;  %2400 = vmatmul.msk.f32.vlgmr.msrb.gmra.mxu3 %vm659_vm0, %v18_v31  ;;  %v226_v19 = vld [vmem:[%s4784_s1 + $0x478] sm:$0xff]  ;;  %v231_v20 = vld [vmem:[%s4784_s1 + $0x4a0] sm:$0xff]  ;;  %v217_v22 = vld [vmem:[%s4784_s1 + $0x430] sm:$0xff] }
  0x33   :  { %993 = vmatpush.msrb.mxu2 %v202_v32  ;;  %1016 = vmatpush.msrb.mxu3 %v210_v33  ;;  %v239_v21 = vld [vmem:[%s4784_s1 + $0x4e0] sm:$0xff]  ;;  %v225_v23 = vld [vmem:[%s4784_s1 + $0x470] sm:$0xff]  ;;  %v230_v24 = vld [vmem:[%s4784_s1 + $0x498] sm:$0xff] }
  0x34   :  { %860 = vmatpush.msra.mxu0 %v149_v34  ;;  %883 = vmatpush.msra.mxu1 %v157_v35  ;;  %v238_v25 = vld [vmem:[%s4784_s1 + $0x4d8] sm:$0xff]  ;;  %v216_v26 = vld [vmem:[%s4784_s1 + $0x428] sm:$0xff]  ;;  %v229_v28 = vld [vmem:[%s4784_s1 + $0x490] sm:$0xff] }
  0x35   :  { %994 = vmatpush.msrb.mxu2 %v201_v36  ;;  %1017 = vmatpush.msrb.mxu3 %v209_v37  ;;  %v224_v27 = vld [vmem:[%s4784_s1 + $0x468] sm:$0xff]  ;;  %v237_v29 = vld [vmem:[%s4784_s1 + $0x4d0] sm:$0xff]  ;;  %v215_v30 = vld [vmem:[%s4784_s1 + $0x420] sm:$0xff] }
  0x36   :  { %861 = vmatpush.msra.mxu0 %v148_v38  ;;  %884 = vmatpush.msra.mxu1 %v156_v39  ;;  %v223_v31 = vld [vmem:[%s4784_s1 + $0x460] sm:$0xff]  ;;  %v228_v32 = vld [vmem:[%s4784_s1 + $0x488] sm:$0xff]  ;;  %v214_v34 = vld [vmem:[%s4784_s1 + $0x418] sm:$0xff] }
  0x37   :  { %995 = vmatpush.msrb.mxu2 %v200_v40  ;;  %1018 = vmatpush.msrb.mxu3 %v208_v41  ;;  %v236_v33 = vld [vmem:[%s4784_s1 + $0x4c8] sm:$0xff]  ;;  %v222_v35 = vld [vmem:[%s4784_s1 + $0x458] sm:$0xff]  ;;  %v227_v36 = vld [vmem:[%s4784_s1 + $0x480] sm:$0xff] }
  0x38   :  { %862 = vmatpush.msra.mxu0 %v147_v42  ;;  %885 = vmatpush.msra.mxu1 %v155_v43  ;;  %v235_v37 = vld [vmem:[%s4784_s1 + $0x4c0] sm:$0xff]  ;;  %v25_v38 = vld [vmem:[%s4785_s0 + $0x1c] sm:$0x3]  ;;  %v26_v39 = vld [vmem:[%s4785_s0 + $0x1e] sm:$0x3] }
  0x39   :  { %2397 = vmatmul.msk.f32.vlgmr.msrb.gmra.mxu0 %vm659_vm0, %v15_v44  ;;  %2398 = vmatmul.msk.f32.vlgmr.msrb.gmra.mxu1 %vm659_vm0, %v16_v45  ;;  %v266_v40 = vld [vmem:[%s4784_s1 + $0x5b8] sm:$0xff]  ;;  %v213_v42 = vld [vmem:[%s4784_s1 + $0x410] sm:$0xff] }
  0x3a   :  { %947 = vmatpush.msrb.mxu0 %v186_v46  ;;  %970 = vmatpush.msrb.mxu1 %v194_v47  ;;  %v274_v41 = vld [vmem:[%s4784_s1 + $0x5f8] sm:$0xff]  ;;  %v221_v43 = vld [vmem:[%s4784_s1 + $0x450] sm:$0xff]  ;;  %v212_v46 = vld [vmem:[%s4784_s1 + $0x408] sm:$0xff] }
  0x3b   :  { %996 = vmatpush.msrb.mxu2 %v199_v48  ;;  %1019 = vmatpush.msrb.mxu3 %v207_v49  ;;  %v265_v44 = vld [vmem:[%s4784_s1 + $0x5b0] sm:$0xff]  ;;  %v220_v47 = vld [vmem:[%s4784_s1 + $0x448] sm:$0xff] }
  0x3c   :  { %948 = vmatpush.msrb.mxu0 %v185_v50  ;;  %971 = vmatpush.msrb.mxu1 %v193_v51  ;;  %v273_v45 = vld [vmem:[%s4784_s1 + $0x5f0] sm:$0xff]  ;;  %v264_v48 = vld [vmem:[%s4784_s1 + $0x5a8] sm:$0xff]  ;;  %v211_v50 = vld [vmem:[%s4784_s1 + $0x400] sm:$0xff] }
  0x3d   :  { %997 = vmatpush.msrb.mxu2 %v198_v52  ;;  %1020 = vmatpush.msrb.mxu3 %v206_v53  ;;  %v272_v49 = vld [vmem:[%s4784_s1 + $0x5e8] sm:$0xff]  ;;  %v219_v51 = vld [vmem:[%s4784_s1 + $0x440] sm:$0xff]  ;;  %v23_v52 = vld [vmem:[%s4785_s0 + $0x18] sm:$0x3] }
  0x3e   :  { %949 = vmatpush.msrb.mxu0 %v184_v54  ;;  %972 = vmatpush.msrb.mxu1 %v192_v55  ;;  %v24_v53 = vld [vmem:[%s4785_s0 + $0x1a] sm:$0x3] }
  0x3f   :  { %998 = vmatpush.msrb.mxu2 %v197_v56  ;;  %1021 = vmatpush.msrb.mxu3 %v205_v57  ;;  %v250_v54 = vld [vmem:[%s4784_s1 + $0x538] sm:$0xff]  ;;  %v263_v56 = vld [vmem:[%s4784_s1 + $0x5a0] sm:$0xff] }
  0x40   :  { %950 = vmatpush.msrb.mxu0 %v183_v58  ;;  %973 = vmatpush.msrb.mxu1 %v191_v59  ;;  %v258_v55 = vld [vmem:[%s4784_s1 + $0x578] sm:$0xff]  ;;  %v271_v57 = vld [vmem:[%s4784_s1 + $0x5e0] sm:$0xff]  ;;  %v249_v58 = vld [vmem:[%s4784_s1 + $0x530] sm:$0xff] }
  0x41   :  { %999 = vmatpush.msrb.mxu2 %v196_v60  ;;  %1022 = vmatpush.msrb.mxu3 %v204_v61  ;;  %v257_v59 = vld [vmem:[%s4784_s1 + $0x570] sm:$0xff]  ;;  %v262_v60 = vld [vmem:[%s4784_s1 + $0x598] sm:$0xff] }
  0x42   :  { %951 = vmatpush.msrb.mxu0 %v182_v62  ;;  %974 = vmatpush.msrb.mxu1 %v190_v63  ;;  %v270_v61 = vld [vmem:[%s4784_s1 + $0x5d8] sm:$0xff]  ;;  %v248_v62 = vld [vmem:[%s4784_s1 + $0x528] sm:$0xff] }
  0x43   :  { %1000 = vmatpush.msrb.mxu2 %v195_v0  ;;  %1023 = vmatpush.msrb.mxu3 %v203_v1  ;;  %v256_v63 = vld [vmem:[%s4784_s1 + $0x568] sm:$0xff]  ;;  %v261_v0 = vld [vmem:[%s4784_s1 + $0x590] sm:$0xff] }
  0x44   :  { %2403 = vmatmul.msk.f32.vlgmr.msra.gmra.mxu2 %vm659_vm0, %v21_v2  ;;  %2404 = vmatmul.msk.f32.vlgmr.msra.gmra.mxu3 %vm659_vm0, %v22_v3  ;;  %v269_v1 = vld [vmem:[%s4784_s1 + $0x5d0] sm:$0xff]  ;;  %v247_v2 = vld [vmem:[%s4784_s1 + $0x520] sm:$0xff] }
  0x45   :  { %1085 = vmatpush.msra.mxu2 %v234_v4  ;;  %1108 = vmatpush.msra.mxu3 %v242_v5  ;;  %v255_v3 = vld [vmem:[%s4784_s1 + $0x560] sm:$0xff]  ;;  %v260_v4 = vld [vmem:[%s4784_s1 + $0x588] sm:$0xff] }
  0x46   :  { %952 = vmatpush.msrb.mxu0 %v181_v6  ;;  %975 = vmatpush.msrb.mxu1 %v189_v7  ;;  %v268_v5 = vld [vmem:[%s4784_s1 + $0x5c8] sm:$0xff]  ;;  %v246_v6 = vld [vmem:[%s4784_s1 + $0x518] sm:$0xff] }
  0x47   :  { %1086 = vmatpush.msra.mxu2 %v233_v8  ;;  %1109 = vmatpush.msra.mxu3 %v241_v9  ;;  %v254_v7 = vld [vmem:[%s4784_s1 + $0x558] sm:$0xff]  ;;  %v259_v8 = vld [vmem:[%s4784_s1 + $0x580] sm:$0xff] }
  0x48   :  { %953 = vmatpush.msrb.mxu0 %v180_v10  ;;  %976 = vmatpush.msrb.mxu1 %v188_v11  ;;  %v267_v9 = vld [vmem:[%s4784_s1 + $0x5c0] sm:$0xff] }
  0x49   :  { %1087 = vmatpush.msra.mxu2 %v232_v12  ;;  %1110 = vmatpush.msra.mxu3 %v240_v13  ;;  %v29_v10 = vld [vmem:[%s4785_s0 + $0x24] sm:$0x3]  ;;  %v30_v11 = vld [vmem:[%s4785_s0 + $0x26] sm:$0x3]  ;;  %v298_v12 = vld [vmem:[%s4784_s1 + $0x6b8] sm:$0xff] }
  0x4a   :  { %954 = vmatpush.msrb.mxu0 %v179_v14  ;;  %977 = vmatpush.msrb.mxu1 %v187_v15  ;;  %v306_v13 = vld [vmem:[%s4784_s1 + $0x6f8] sm:$0xff]  ;;  %v245_v14 = vld [vmem:[%s4784_s1 + $0x510] sm:$0xff] }
  0x4b   :  { %2401 = vmatmul.msk.f32.vlgmr.msra.gmra.mxu0 %vm659_vm0, %v19_v16  ;;  %2402 = vmatmul.msk.f32.vlgmr.msra.gmra.mxu1 %vm659_vm0, %v20_v17  ;;  %v253_v15 = vld [vmem:[%s4784_s1 + $0x550] sm:$0xff] }
  0x4c   :  { %1039 = vmatpush.msra.mxu0 %v218_v18  ;;  %1062 = vmatpush.msra.mxu1 %v226_v19  ;;  %v297_v16 = vld [vmem:[%s4784_s1 + $0x6b0] sm:$0xff]  ;;  %v244_v18 = vld [vmem:[%s4784_s1 + $0x508] sm:$0xff] }
  0x4d   :  { %1088 = vmatpush.msra.mxu2 %v231_v20  ;;  %1111 = vmatpush.msra.mxu3 %v239_v21  ;;  %v305_v17 = vld [vmem:[%s4784_s1 + $0x6f0] sm:$0xff]  ;;  %v252_v19 = vld [vmem:[%s4784_s1 + $0x548] sm:$0xff] }
  0x4e   :  { %1040 = vmatpush.msra.mxu0 %v217_v22  ;;  %1063 = vmatpush.msra.mxu1 %v225_v23  ;;  %v296_v20 = vld [vmem:[%s4784_s1 + $0x6a8] sm:$0xff]  ;;  %v243_v22 = vld [vmem:[%s4784_s1 + $0x500] sm:$0xff] }
  0x4f   :  { %1089 = vmatpush.msra.mxu2 %v230_v24  ;;  %1112 = vmatpush.msra.mxu3 %v238_v25  ;;  %v304_v21 = vld [vmem:[%s4784_s1 + $0x6e8] sm:$0xff]  ;;  %v251_v23 = vld [vmem:[%s4784_s1 + $0x540] sm:$0xff] }
  0x50   :  { %1041 = vmatpush.msra.mxu0 %v216_v26  ;;  %1064 = vmatpush.msra.mxu1 %v224_v27  ;;  %v27_v24 = vld [vmem:[%s4785_s0 + $0x20] sm:$0x3]  ;;  %v28_v25 = vld [vmem:[%s4785_s0 + $0x22] sm:$0x3]  ;;  %v282_v26 = vld [vmem:[%s4784_s1 + $0x638] sm:$0xff] }
  0x51   :  { %1090 = vmatpush.msra.mxu2 %v229_v28  ;;  %1113 = vmatpush.msra.mxu3 %v237_v29  ;;  %v290_v27 = vld [vmem:[%s4784_s1 + $0x678] sm:$0xff]  ;;  %v295_v28 = vld [vmem:[%s4784_s1 + $0x6a0] sm:$0xff] }
  0x52   :  { %1042 = vmatpush.msra.mxu0 %v215_v30  ;;  %1065 = vmatpush.msra.mxu1 %v223_v31  ;;  %v303_v29 = vld [vmem:[%s4784_s1 + $0x6e0] sm:$0xff]  ;;  %v281_v30 = vld [vmem:[%s4784_s1 + $0x630] sm:$0xff] }
  0x53   :  { %1091 = vmatpush.msra.mxu2 %v228_v32  ;;  %1114 = vmatpush.msra.mxu3 %v236_v33  ;;  %v289_v31 = vld [vmem:[%s4784_s1 + $0x670] sm:$0xff]  ;;  %v294_v32 = vld [vmem:[%s4784_s1 + $0x698] sm:$0xff] }
  0x54   :  { %1043 = vmatpush.msra.mxu0 %v214_v34  ;;  %1066 = vmatpush.msra.mxu1 %v222_v35  ;;  %v302_v33 = vld [vmem:[%s4784_s1 + $0x6d8] sm:$0xff]  ;;  %v280_v34 = vld [vmem:[%s4784_s1 + $0x628] sm:$0xff] }
  0x55   :  { %1092 = vmatpush.msra.mxu2 %v227_v36  ;;  %1115 = vmatpush.msra.mxu3 %v235_v37  ;;  %v288_v35 = vld [vmem:[%s4784_s1 + $0x668] sm:$0xff]  ;;  %v293_v36 = vld [vmem:[%s4784_s1 + $0x690] sm:$0xff] }
  0x56   :  { %2407 = vmatmul.msk.f32.vlgmr.msrb.gmra.mxu2 %vm659_vm0, %v25_v38  ;;  %2408 = vmatmul.msk.f32.vlgmr.msrb.gmra.mxu3 %vm659_vm0, %v26_v39  ;;  %v301_v37 = vld [vmem:[%s4784_s1 + $0x6d0] sm:$0xff]  ;;  %v279_v38 = vld [vmem:[%s4784_s1 + $0x620] sm:$0xff] }
  0x57   :  { %1177 = vmatpush.msrb.mxu2 %v266_v40  ;;  %1200 = vmatpush.msrb.mxu3 %v274_v41  ;;  %v287_v39 = vld [vmem:[%s4784_s1 + $0x660] sm:$0xff]  ;;  %v292_v40 = vld [vmem:[%s4784_s1 + $0x688] sm:$0xff] }
  0x58   :  { %1044 = vmatpush.msra.mxu0 %v213_v42  ;;  %1067 = vmatpush.msra.mxu1 %v221_v43  ;;  %v300_v41 = vld [vmem:[%s4784_s1 + $0x6c8] sm:$0xff]  ;;  %v278_v42 = vld [vmem:[%s4784_s1 + $0x618] sm:$0xff] }
  0x59   :  { %1178 = vmatpush.msrb.mxu2 %v265_v44  ;;  %1201 = vmatpush.msrb.mxu3 %v273_v45  ;;  %v286_v43 = vld [vmem:[%s4784_s1 + $0x658] sm:$0xff]  ;;  %v291_v44 = vld [vmem:[%s4784_s1 + $0x680] sm:$0xff] }
  0x5a   :  { %1045 = vmatpush.msra.mxu0 %v212_v46  ;;  %1068 = vmatpush.msra.mxu1 %v220_v47  ;;  %v299_v45 = vld [vmem:[%s4784_s1 + $0x6c0] sm:$0xff]  ;;  %v33_v46 = vld [vmem:[%s4785_s0 + $0x2c] sm:$0x3]  ;;  %v34_v47 = vld [vmem:[%s4785_s0 + $0x2e] sm:$0x3] }
  0x5b   :  { %1179 = vmatpush.msrb.mxu2 %v264_v48  ;;  %1202 = vmatpush.msrb.mxu3 %v272_v49  ;;  %v330_v48 = vld [vmem:[%s4784_s1 + $0x7b8] sm:$0xff] }
  0x5c   :  { %1046 = vmatpush.msra.mxu0 %v211_v50  ;;  %1069 = vmatpush.msra.mxu1 %v219_v51  ;;  %v338_v49 = vld [vmem:[%s4784_s1 + $0x7f8] sm:$0xff]  ;;  %v277_v50 = vld [vmem:[%s4784_s1 + $0x610] sm:$0xff] }
  0x5d   :  { %2405 = vmatmul.msk.f32.vlgmr.msrb.gmra.mxu0 %vm659_vm0, %v23_v52  ;;  %2406 = vmatmul.msk.f32.vlgmr.msrb.gmra.mxu1 %vm659_vm0, %v24_v53  ;;  %v285_v51 = vld [vmem:[%s4784_s1 + $0x650] sm:$0xff] }
  0x5e   :  { %1131 = vmatpush.msrb.mxu0 %v250_v54  ;;  %1154 = vmatpush.msrb.mxu1 %v258_v55  ;;  %v329_v52 = vld [vmem:[%s4784_s1 + $0x7b0] sm:$0xff]  ;;  %v276_v54 = vld [vmem:[%s4784_s1 + $0x608] sm:$0xff] }
  0x5f   :  { %1180 = vmatpush.msrb.mxu2 %v263_v56  ;;  %1203 = vmatpush.msrb.mxu3 %v271_v57  ;;  %v337_v53 = vld [vmem:[%s4784_s1 + $0x7f0] sm:$0xff]  ;;  %v284_v55 = vld [vmem:[%s4784_s1 + $0x648] sm:$0xff] }
  0x60   :  { %1132 = vmatpush.msrb.mxu0 %v249_v58  ;;  %1155 = vmatpush.msrb.mxu1 %v257_v59  ;;  %v328_v56 = vld [vmem:[%s4784_s1 + $0x7a8] sm:$0xff]  ;;  %v275_v58 = vld [vmem:[%s4784_s1 + $0x600] sm:$0xff] }
  0x61   :  { %1181 = vmatpush.msrb.mxu2 %v262_v60  ;;  %1204 = vmatpush.msrb.mxu3 %v270_v61  ;;  %v336_v57 = vld [vmem:[%s4784_s1 + $0x7e8] sm:$0xff]  ;;  %v283_v59 = vld [vmem:[%s4784_s1 + $0x640] sm:$0xff] }
  0x62   :  { %1133 = vmatpush.msrb.mxu0 %v248_v62  ;;  %1156 = vmatpush.msrb.mxu1 %v256_v63  ;;  %v31_v60 = vld [vmem:[%s4785_s0 + $0x28] sm:$0x3]  ;;  %v32_v61 = vld [vmem:[%s4785_s0 + $0x2a] sm:$0x3]  ;;  %v314_v62 = vld [vmem:[%s4784_s1 + $0x738] sm:$0xff] }
  0x63   :  { %1182 = vmatpush.msrb.mxu2 %v261_v0  ;;  %1205 = vmatpush.msrb.mxu3 %v269_v1  ;;  %v322_v63 = vld [vmem:[%s4784_s1 + $0x778] sm:$0xff]  ;;  %v327_v0 = vld [vmem:[%s4784_s1 + $0x7a0] sm:$0xff] }
  0x64   :  { %1134 = vmatpush.msrb.mxu0 %v247_v2  ;;  %1157 = vmatpush.msrb.mxu1 %v255_v3  ;;  %v335_v1 = vld [vmem:[%s4784_s1 + $0x7e0] sm:$0xff]  ;;  %v313_v2 = vld [vmem:[%s4784_s1 + $0x730] sm:$0xff] }
  0x65   :  { %1183 = vmatpush.msrb.mxu2 %v260_v4  ;;  %1206 = vmatpush.msrb.mxu3 %v268_v5  ;;  %v321_v3 = vld [vmem:[%s4784_s1 + $0x770] sm:$0xff]  ;;  %v326_v4 = vld [vmem:[%s4784_s1 + $0x798] sm:$0xff] }
  0x66   :  { %1135 = vmatpush.msrb.mxu0 %v246_v6  ;;  %1158 = vmatpush.msrb.mxu1 %v254_v7  ;;  %v334_v5 = vld [vmem:[%s4784_s1 + $0x7d8] sm:$0xff]  ;;  %v312_v6 = vld [vmem:[%s4784_s1 + $0x728] sm:$0xff] }
  0x67   :  { %1184 = vmatpush.msrb.mxu2 %v259_v8  ;;  %1207 = vmatpush.msrb.mxu3 %v267_v9  ;;  %v320_v7 = vld [vmem:[%s4784_s1 + $0x768] sm:$0xff]  ;;  %v325_v8 = vld [vmem:[%s4784_s1 + $0x790] sm:$0xff] }
  0x68   :  { %2411 = vmatmul.msk.f32.vlgmr.msra.gmra.mxu2 %vm659_vm0, %v29_v10  ;;  %2412 = vmatmul.msk.f32.vlgmr.msra.gmra.mxu3 %vm659_vm0, %v30_v11  ;;  %v333_v9 = vld [vmem:[%s4784_s1 + $0x7d0] sm:$0xff]  ;;  %v311_v10 = vld [vmem:[%s4784_s1 + $0x720] sm:$0xff] }
  0x69   :  { %1269 = vmatpush.msra.mxu2 %v298_v12  ;;  %1292 = vmatpush.msra.mxu3 %v306_v13  ;;  %v319_v11 = vld [vmem:[%s4784_s1 + $0x760] sm:$0xff]  ;;  %v324_v12 = vld [vmem:[%s4784_s1 + $0x788] sm:$0xff] }
  0x6a   :  { %1136 = vmatpush.msrb.mxu0 %v245_v14  ;;  %1159 = vmatpush.msrb.mxu1 %v253_v15  ;;  %v332_v13 = vld [vmem:[%s4784_s1 + $0x7c8] sm:$0xff]  ;;  %v310_v14 = vld [vmem:[%s4784_s1 + $0x718] sm:$0xff] }
  0x6b   :  { %1270 = vmatpush.msra.mxu2 %v297_v16  ;;  %1293 = vmatpush.msra.mxu3 %v305_v17  ;;  %v318_v15 = vld [vmem:[%s4784_s1 + $0x758] sm:$0xff]  ;;  %v323_v16 = vld [vmem:[%s4784_s1 + $0x780] sm:$0xff] }
  0x6c   :  { %1137 = vmatpush.msrb.mxu0 %v244_v18  ;;  %1160 = vmatpush.msrb.mxu1 %v252_v19  ;;  %v331_v17 = vld [vmem:[%s4784_s1 + $0x7c0] sm:$0xff]  ;;  %v37_v18 = vld [vmem:[%s4785_s0 + $0x34] sm:$0x3]  ;;  %v38_v19 = vld [vmem:[%s4785_s0 + $0x36] sm:$0x3] }
  0x6d   :  { %1271 = vmatpush.msra.mxu2 %v296_v20  ;;  %1294 = vmatpush.msra.mxu3 %v304_v21  ;;  %v362_v20 = vld [vmem:[%s4784_s1 + $0x8b8] sm:$0xff] }
  0x6e   :  { %1138 = vmatpush.msrb.mxu0 %v243_v22  ;;  %1161 = vmatpush.msrb.mxu1 %v251_v23  ;;  %v370_v21 = vld [vmem:[%s4784_s1 + $0x8f8] sm:$0xff]  ;;  %v309_v22 = vld [vmem:[%s4784_s1 + $0x710] sm:$0xff] }
  0x6f   :  { %2409 = vmatmul.msk.f32.vlgmr.msra.gmra.mxu0 %vm659_vm0, %v27_v24  ;;  %2410 = vmatmul.msk.f32.vlgmr.msra.gmra.mxu1 %vm659_vm0, %v28_v25  ;;  %v317_v23 = vld [vmem:[%s4784_s1 + $0x750] sm:$0xff] }
  0x70   :  { %1223 = vmatpush.msra.mxu0 %v282_v26  ;;  %1246 = vmatpush.msra.mxu1 %v290_v27  ;;  %v361_v24 = vld [vmem:[%s4784_s1 + $0x8b0] sm:$0xff]  ;;  %v308_v26 = vld [vmem:[%s4784_s1 + $0x708] sm:$0xff] }
  0x71   :  { %1272 = vmatpush.msra.mxu2 %v295_v28  ;;  %1295 = vmatpush.msra.mxu3 %v303_v29  ;;  %v369_v25 = vld [vmem:[%s4784_s1 + $0x8f0] sm:$0xff]  ;;  %v316_v27 = vld [vmem:[%s4784_s1 + $0x748] sm:$0xff] }
  0x72   :  { %1224 = vmatpush.msra.mxu0 %v281_v30  ;;  %1247 = vmatpush.msra.mxu1 %v289_v31  ;;  %v360_v28 = vld [vmem:[%s4784_s1 + $0x8a8] sm:$0xff]  ;;  %v307_v30 = vld [vmem:[%s4784_s1 + $0x700] sm:$0xff] }
  0x73   :  { %1273 = vmatpush.msra.mxu2 %v294_v32  ;;  %1296 = vmatpush.msra.mxu3 %v302_v33  ;;  %v368_v29 = vld [vmem:[%s4784_s1 + $0x8e8] sm:$0xff]  ;;  %v315_v31 = vld [vmem:[%s4784_s1 + $0x740] sm:$0xff]  ;;  %v35_v32 = vld [vmem:[%s4785_s0 + $0x30] sm:$0x3] }
  0x74   :  { %1225 = vmatpush.msra.mxu0 %v280_v34  ;;  %1248 = vmatpush.msra.mxu1 %v288_v35  ;;  %v36_v33 = vld [vmem:[%s4785_s0 + $0x32] sm:$0x3]  ;;  %v346_v34 = vld [vmem:[%s4784_s1 + $0x838] sm:$0xff] }
  0x75   :  { %1274 = vmatpush.msra.mxu2 %v293_v36  ;;  %1297 = vmatpush.msra.mxu3 %v301_v37  ;;  %v354_v35 = vld [vmem:[%s4784_s1 + $0x878] sm:$0xff]  ;;  %v359_v36 = vld [vmem:[%s4784_s1 + $0x8a0] sm:$0xff] }
  0x76   :  { %1226 = vmatpush.msra.mxu0 %v279_v38  ;;  %1249 = vmatpush.msra.mxu1 %v287_v39  ;;  %v367_v37 = vld [vmem:[%s4784_s1 + $0x8e0] sm:$0xff]  ;;  %v345_v38 = vld [vmem:[%s4784_s1 + $0x830] sm:$0xff] }
  0x77   :  { %1275 = vmatpush.msra.mxu2 %v292_v40  ;;  %1298 = vmatpush.msra.mxu3 %v300_v41  ;;  %v353_v39 = vld [vmem:[%s4784_s1 + $0x870] sm:$0xff]  ;;  %v358_v40 = vld [vmem:[%s4784_s1 + $0x898] sm:$0xff] }
  0x78   :  { %1227 = vmatpush.msra.mxu0 %v278_v42  ;;  %1250 = vmatpush.msra.mxu1 %v286_v43  ;;  %v366_v41 = vld [vmem:[%s4784_s1 + $0x8d8] sm:$0xff]  ;;  %v344_v42 = vld [vmem:[%s4784_s1 + $0x828] sm:$0xff] }
  0x79   :  { %1276 = vmatpush.msra.mxu2 %v291_v44  ;;  %1299 = vmatpush.msra.mxu3 %v299_v45  ;;  %v352_v43 = vld [vmem:[%s4784_s1 + $0x868] sm:$0xff]  ;;  %v357_v44 = vld [vmem:[%s4784_s1 + $0x890] sm:$0xff] }
  0x7a   :  { %2415 = vmatmul.msk.f32.vlgmr.msrb.gmra.mxu2 %vm659_vm0, %v33_v46  ;;  %2416 = vmatmul.msk.f32.vlgmr.msrb.gmra.mxu3 %vm659_vm0, %v34_v47  ;;  %v365_v45 = vld [vmem:[%s4784_s1 + $0x8d0] sm:$0xff]  ;;  %v343_v46 = vld [vmem:[%s4784_s1 + $0x820] sm:$0xff] }
  0x7b   :  { %1361 = vmatpush.msrb.mxu2 %v330_v48  ;;  %1384 = vmatpush.msrb.mxu3 %v338_v49  ;;  %v351_v47 = vld [vmem:[%s4784_s1 + $0x860] sm:$0xff]  ;;  %v356_v48 = vld [vmem:[%s4784_s1 + $0x888] sm:$0xff] }
  0x7c   :  { %1228 = vmatpush.msra.mxu0 %v277_v50  ;;  %1251 = vmatpush.msra.mxu1 %v285_v51  ;;  %v364_v49 = vld [vmem:[%s4784_s1 + $0x8c8] sm:$0xff]  ;;  %v342_v50 = vld [vmem:[%s4784_s1 + $0x818] sm:$0xff] }
  0x7d   :  { %1362 = vmatpush.msrb.mxu2 %v329_v52  ;;  %1385 = vmatpush.msrb.mxu3 %v337_v53  ;;  %v350_v51 = vld [vmem:[%s4784_s1 + $0x858] sm:$0xff]  ;;  %v355_v52 = vld [vmem:[%s4784_s1 + $0x880] sm:$0xff] }
  0x7e   :  { %1229 = vmatpush.msra.mxu0 %v276_v54  ;;  %1252 = vmatpush.msra.mxu1 %v284_v55  ;;  %v363_v53 = vld [vmem:[%s4784_s1 + $0x8c0] sm:$0xff]  ;;  %v41_v54 = vld [vmem:[%s4785_s0 + $0x3c] sm:$0x3]  ;;  %v42_v55 = vld [vmem:[%s4785_s0 + $0x3e] sm:$0x3] }
  0x7f   :  { %1363 = vmatpush.msrb.mxu2 %v328_v56  ;;  %1386 = vmatpush.msrb.mxu3 %v336_v57  ;;  %v394_v56 = vld [vmem:[%s4784_s1 + $0x9b8] sm:$0xff] }
  0x80   :  { %1230 = vmatpush.msra.mxu0 %v275_v58  ;;  %1253 = vmatpush.msra.mxu1 %v283_v59  ;;  %v402_v57 = vld [vmem:[%s4784_s1 + $0x9f8] sm:$0xff]  ;;  %v341_v58 = vld [vmem:[%s4784_s1 + $0x810] sm:$0xff] }
  0x81   :  { %2413 = vmatmul.msk.f32.vlgmr.msrb.gmra.mxu0 %vm659_vm0, %v31_v60  ;;  %2414 = vmatmul.msk.f32.vlgmr.msrb.gmra.mxu1 %vm659_vm0, %v32_v61  ;;  %v349_v59 = vld [vmem:[%s4784_s1 + $0x850] sm:$0xff] }
  0x82   :  { %1315 = vmatpush.msrb.mxu0 %v314_v62  ;;  %1338 = vmatpush.msrb.mxu1 %v322_v63  ;;  %v393_v60 = vld [vmem:[%s4784_s1 + $0x9b0] sm:$0xff]  ;;  %v340_v62 = vld [vmem:[%s4784_s1 + $0x808] sm:$0xff] }
  0x83   :  { %1364 = vmatpush.msrb.mxu2 %v327_v0  ;;  %1387 = vmatpush.msrb.mxu3 %v335_v1  ;;  %v401_v61 = vld [vmem:[%s4784_s1 + $0x9f0] sm:$0xff]  ;;  %v348_v63 = vld [vmem:[%s4784_s1 + $0x848] sm:$0xff] }
  0x84   :  { %1316 = vmatpush.msrb.mxu0 %v313_v2  ;;  %1339 = vmatpush.msrb.mxu1 %v321_v3  ;;  %v392_v0 = vld [vmem:[%s4784_s1 + $0x9a8] sm:$0xff]  ;;  %v339_v2 = vld [vmem:[%s4784_s1 + $0x800] sm:$0xff] }
  0x85   :  { %1365 = vmatpush.msrb.mxu2 %v326_v4  ;;  %1388 = vmatpush.msrb.mxu3 %v334_v5  ;;  %v400_v1 = vld [vmem:[%s4784_s1 + $0x9e8] sm:$0xff]  ;;  %v347_v3 = vld [vmem:[%s4784_s1 + $0x840] sm:$0xff]  ;;  %v39_v4 = vld [vmem:[%s4785_s0 + $0x38] sm:$0x3] }
  0x86   :  { %1317 = vmatpush.msrb.mxu0 %v312_v6  ;;  %1340 = vmatpush.msrb.mxu1 %v320_v7  ;;  %v40_v5 = vld [vmem:[%s4785_s0 + $0x3a] sm:$0x3] }
  0x87   :  { %1366 = vmatpush.msrb.mxu2 %v325_v8  ;;  %1389 = vmatpush.msrb.mxu3 %v333_v9  ;;  %v378_v6 = vld [vmem:[%s4784_s1 + $0x938] sm:$0xff] }
  0x88   :  { %1318 = vmatpush.msrb.mxu0 %v311_v10  ;;  %1341 = vmatpush.msrb.mxu1 %v319_v11  ;;  %v386_v7 = vld [vmem:[%s4784_s1 + $0x978] sm:$0xff]  ;;  %v391_v10 = vld [vmem:[%s4784_s1 + $0x9a0] sm:$0xff] }
  0x89   :  { %1367 = vmatpush.msrb.mxu2 %v324_v12  ;;  %1390 = vmatpush.msrb.mxu3 %v332_v13  ;;  %v399_v11 = vld [vmem:[%s4784_s1 + $0x9e0] sm:$0xff] }
  0x8a   :  { %1319 = vmatpush.msrb.mxu0 %v310_v14  ;;  %1342 = vmatpush.msrb.mxu1 %v318_v15  ;;  %v377_v14 = vld [vmem:[%s4784_s1 + $0x930] sm:$0xff] }
  0x8b   :  { %1368 = vmatpush.msrb.mxu2 %v323_v16  ;;  %1391 = vmatpush.msrb.mxu3 %v331_v17  ;;  %v385_v15 = vld [vmem:[%s4784_s1 + $0x970] sm:$0xff]  ;;  %v390_v16 = vld [vmem:[%s4784_s1 + $0x998] sm:$0xff] }
  0x8c   :  { %2419 = vmatmul.msk.f32.vlgmr.msra.gmra.mxu2 %vm659_vm0, %v37_v18  ;;  %2420 = vmatmul.msk.f32.vlgmr.msra.gmra.mxu3 %vm659_vm0, %v38_v19  ;;  %v398_v17 = vld [vmem:[%s4784_s1 + $0x9d8] sm:$0xff]  ;;  %v376_v18 = vld [vmem:[%s4784_s1 + $0x928] sm:$0xff] }
  0x8d   :  { %1453 = vmatpush.msra.mxu2 %v362_v20  ;;  %1476 = vmatpush.msra.mxu3 %v370_v21  ;;  %v384_v19 = vld [vmem:[%s4784_s1 + $0x968] sm:$0xff]  ;;  %v389_v20 = vld [vmem:[%s4784_s1 + $0x990] sm:$0xff] }
  0x8e   :  { %1320 = vmatpush.msrb.mxu0 %v309_v22  ;;  %1343 = vmatpush.msrb.mxu1 %v317_v23  ;;  %v397_v21 = vld [vmem:[%s4784_s1 + $0x9d0] sm:$0xff]  ;;  %v375_v22 = vld [vmem:[%s4784_s1 + $0x920] sm:$0xff] }
  0x8f   :  { %1454 = vmatpush.msra.mxu2 %v361_v24  ;;  %1477 = vmatpush.msra.mxu3 %v369_v25  ;;  %v383_v23 = vld [vmem:[%s4784_s1 + $0x960] sm:$0xff]  ;;  %v388_v24 = vld [vmem:[%s4784_s1 + $0x988] sm:$0xff] }
  0x90   :  { %1321 = vmatpush.msrb.mxu0 %v308_v26  ;;  %1344 = vmatpush.msrb.mxu1 %v316_v27  ;;  %v396_v25 = vld [vmem:[%s4784_s1 + $0x9c8] sm:$0xff]  ;;  %v374_v26 = vld [vmem:[%s4784_s1 + $0x918] sm:$0xff] }
  0x91   :  { %1455 = vmatpush.msra.mxu2 %v360_v28  ;;  %1478 = vmatpush.msra.mxu3 %v368_v29  ;;  %v382_v27 = vld [vmem:[%s4784_s1 + $0x958] sm:$0xff]  ;;  %v387_v28 = vld [vmem:[%s4784_s1 + $0x980] sm:$0xff] }
  0x92   :  { %1322 = vmatpush.msrb.mxu0 %v307_v30  ;;  %1345 = vmatpush.msrb.mxu1 %v315_v31  ;;  %v395_v29 = vld [vmem:[%s4784_s1 + $0x9c0] sm:$0xff] }
  0x93   :  { %2417 = vmatmul.msk.f32.vlgmr.msra.gmra.mxu0 %vm659_vm0, %v35_v32  ;;  %2418 = vmatmul.msk.f32.vlgmr.msra.gmra.mxu1 %vm659_vm0, %v36_v33  ;;  %v45_v30 = vld [vmem:[%s4785_s0 + $0x44] sm:$0x3]  ;;  %v46_v31 = vld [vmem:[%s4785_s0 + $0x46] sm:$0x3]  ;;  %v426_v32 = vld [vmem:[%s4784_s1 + $0xab8] sm:$0xff] }
  0x94   :  { %1407 = vmatpush.msra.mxu0 %v346_v34  ;;  %1430 = vmatpush.msra.mxu1 %v354_v35  ;;  %v434_v33 = vld [vmem:[%s4784_s1 + $0xaf8] sm:$0xff]  ;;  %v373_v34 = vld [vmem:[%s4784_s1 + $0x910] sm:$0xff] }
  0x95   :  { %1456 = vmatpush.msra.mxu2 %v359_v36  ;;  %1479 = vmatpush.msra.mxu3 %v367_v37  ;;  %v381_v35 = vld [vmem:[%s4784_s1 + $0x950] sm:$0xff] }
  0x96   :  { %1408 = vmatpush.msra.mxu0 %v345_v38  ;;  %1431 = vmatpush.msra.mxu1 %v353_v39  ;;  %v425_v36 = vld [vmem:[%s4784_s1 + $0xab0] sm:$0xff]  ;;  %v372_v38 = vld [vmem:[%s4784_s1 + $0x908] sm:$0xff] }
  0x97   :  { %1457 = vmatpush.msra.mxu2 %v358_v40  ;;  %1480 = vmatpush.msra.mxu3 %v366_v41  ;;  %v433_v37 = vld [vmem:[%s4784_s1 + $0xaf0] sm:$0xff]  ;;  %v380_v39 = vld [vmem:[%s4784_s1 + $0x948] sm:$0xff] }
  0x98   :  { %1409 = vmatpush.msra.mxu0 %v344_v42  ;;  %1432 = vmatpush.msra.mxu1 %v352_v43  ;;  %v424_v40 = vld [vmem:[%s4784_s1 + $0xaa8] sm:$0xff]  ;;  %v371_v42 = vld [vmem:[%s4784_s1 + $0x900] sm:$0xff] }
  0x99   :  { %1458 = vmatpush.msra.mxu2 %v357_v44  ;;  %1481 = vmatpush.msra.mxu3 %v365_v45  ;;  %v432_v41 = vld [vmem:[%s4784_s1 + $0xae8] sm:$0xff]  ;;  %v379_v43 = vld [vmem:[%s4784_s1 + $0x940] sm:$0xff] }
  0x9a   :  { %1410 = vmatpush.msra.mxu0 %v343_v46  ;;  %1433 = vmatpush.msra.mxu1 %v351_v47  ;;  %v43_v44 = vld [vmem:[%s4785_s0 + $0x40] sm:$0x3]  ;;  %v44_v45 = vld [vmem:[%s4785_s0 + $0x42] sm:$0x3]  ;;  %v410_v46 = vld [vmem:[%s4784_s1 + $0xa38] sm:$0xff] }
  0x9b   :  { %1459 = vmatpush.msra.mxu2 %v356_v48  ;;  %1482 = vmatpush.msra.mxu3 %v364_v49  ;;  %v418_v47 = vld [vmem:[%s4784_s1 + $0xa78] sm:$0xff] }
  0x9c   :  { %1411 = vmatpush.msra.mxu0 %v342_v50  ;;  %1434 = vmatpush.msra.mxu1 %v350_v51  ;;  %v423_v50 = vld [vmem:[%s4784_s1 + $0xaa0] sm:$0xff] }
  0x9d   :  { %1460 = vmatpush.msra.mxu2 %v355_v52  ;;  %1483 = vmatpush.msra.mxu3 %v363_v53  ;;  %v431_v51 = vld [vmem:[%s4784_s1 + $0xae0] sm:$0xff] }
  0x9e   :  { %2423 = vmatmul.msk.f32.vlgmr.msrb.gmra.mxu2 %vm659_vm0, %v41_v54  ;;  %2424 = vmatmul.msk.f32.vlgmr.msrb.gmra.mxu3 %vm659_vm0, %v42_v55  ;;  %v409_v54 = vld [vmem:[%s4784_s1 + $0xa30] sm:$0xff] }
  0x9f   :  { %1545 = vmatpush.msrb.mxu2 %v394_v56  ;;  %1568 = vmatpush.msrb.mxu3 %v402_v57  ;;  %v417_v55 = vld [vmem:[%s4784_s1 + $0xa70] sm:$0xff]  ;;  %v422_v56 = vld [vmem:[%s4784_s1 + $0xa98] sm:$0xff] }
  0xa0   :  { %1412 = vmatpush.msra.mxu0 %v341_v58  ;;  %1435 = vmatpush.msra.mxu1 %v349_v59  ;;  %v430_v57 = vld [vmem:[%s4784_s1 + $0xad8] sm:$0xff]  ;;  %v408_v58 = vld [vmem:[%s4784_s1 + $0xa28] sm:$0xff] }
  0xa1   :  { %1546 = vmatpush.msrb.mxu2 %v393_v60  ;;  %1569 = vmatpush.msrb.mxu3 %v401_v61  ;;  %v749_v9 = vpop.f32.mrf.mxu3  ;;  %v416_v59 = vld [vmem:[%s4784_s1 + $0xa68] sm:$0xff]  ;;  %v421_v60 = vld [vmem:[%s4784_s1 + $0xa90] sm:$0xff] }
  0xa2   :  { %1413 = vmatpush.msra.mxu0 %v340_v62  ;;  %1436 = vmatpush.msra.mxu1 %v348_v63  ;;  %v726_v8 = vpop.f32.mrf.mxu2  ;;  %2320 = vst.msk [vmem:[%s4786_s2 + $0x6] sm:$0x3] %vm2316_vm1, %v749_v9  ;;  %v429_v61 = vld [vmem:[%s4784_s1 + $0xad0] sm:$0xff]  ;;  %v407_v62 = vld [vmem:[%s4784_s1 + $0xa20] sm:$0xff]  ;;  %v466_v9 = vld [vmem:[%s4784_s1 + $0xbf8] sm:$0xff] }
  0xa3   :  { %1547 = vmatpush.msrb.mxu2 %v392_v0  ;;  %1570 = vmatpush.msrb.mxu3 %v400_v1  ;;  %v680_v12 = vpop.f32.mrf.mxu0  ;;  %2319 = vst.msk [vmem:[%s4786_s2 + $0x4] sm:$0x3] %vm2316_vm1, %v726_v8  ;;  %v415_v63 = vld [vmem:[%s4784_s1 + $0xa60] sm:$0xff]  ;;  %v420_v0 = vld [vmem:[%s4784_s1 + $0xa88] sm:$0xff]  ;;  %v458_v8 = vld [vmem:[%s4784_s1 + $0xbb8] sm:$0xff] }
  0xa4   :  { %1414 = vmatpush.msra.mxu0 %v339_v2  ;;  %1437 = vmatpush.msra.mxu1 %v347_v3  ;;  %v703_v13 = vpop.f32.mrf.mxu1  ;;  %2317 = vst.msk [vmem:[%s4786_s2] sm:$0x3] %vm2316_vm1, %v680_v12  ;;  %v428_v1 = vld [vmem:[%s4784_s1 + $0xac8] sm:$0xff]  ;;  %v406_v2 = vld [vmem:[%s4784_s1 + $0xa18] sm:$0xff]  ;;  %v457_v12 = vld [vmem:[%s4784_s1 + $0xbb0] sm:$0xff] }
  0xa5   :  { %2421 = vmatmul.msk.f32.vlgmr.msrb.gmra.mxu0 %vm659_vm0, %v39_v4  ;;  %2422 = vmatmul.msk.f32.vlgmr.msrb.gmra.mxu1 %vm659_vm0, %v40_v5  ;;  %2318 = vst.msk [vmem:[%s4786_s2 + $0x2] sm:$0x3] %vm2316_vm1, %v703_v13  ;;  %v414_v3 = vld [vmem:[%s4784_s1 + $0xa58] sm:$0xff]  ;;  %v419_v4 = vld [vmem:[%s4784_s1 + $0xa80] sm:$0xff]  ;;  %v465_v13 = vld [vmem:[%s4784_s1 + $0xbf0] sm:$0xff] }
  0xa6   :  { %1499 = vmatpush.msrb.mxu0 %v378_v6  ;;  %1522 = vmatpush.msrb.mxu1 %v386_v7  ;;  %v427_v5 = vld [vmem:[%s4784_s1 + $0xac0] sm:$0xff]  ;;  %v49_v6 = vld [vmem:[%s4785_s0 + $0x4c] sm:$0x3]  ;;  %v50_v7 = vld [vmem:[%s4785_s0 + $0x4e] sm:$0x3] }
  0xa7   :  { %1548 = vmatpush.msrb.mxu2 %v391_v10  ;;  %1571 = vmatpush.msrb.mxu3 %v399_v11  ;;  %v405_v10 = vld [vmem:[%s4784_s1 + $0xa10] sm:$0xff] }
  0xa8   :  { %1500 = vmatpush.msrb.mxu0 %v377_v14  ;;  %1523 = vmatpush.msrb.mxu1 %v385_v15  ;;  %v413_v11 = vld [vmem:[%s4784_s1 + $0xa50] sm:$0xff]  ;;  %v404_v14 = vld [vmem:[%s4784_s1 + $0xa08] sm:$0xff] }
  0xa9   :  { %1549 = vmatpush.msrb.mxu2 %v390_v16  ;;  %1572 = vmatpush.msrb.mxu3 %v398_v17  ;;  %v412_v15 = vld [vmem:[%s4784_s1 + $0xa48] sm:$0xff] }
  0xaa   :  { %1501 = vmatpush.msrb.mxu0 %v376_v18  ;;  %1524 = vmatpush.msrb.mxu1 %v384_v19  ;;  %v456_v16 = vld [vmem:[%s4784_s1 + $0xba8] sm:$0xff]  ;;  %v403_v18 = vld [vmem:[%s4784_s1 + $0xa00] sm:$0xff] }
  0xab   :  { %1550 = vmatpush.msrb.mxu2 %v389_v20  ;;  %1573 = vmatpush.msrb.mxu3 %v397_v21  ;;  %v464_v17 = vld [vmem:[%s4784_s1 + $0xbe8] sm:$0xff]  ;;  %v411_v19 = vld [vmem:[%s4784_s1 + $0xa40] sm:$0xff] }
  0xac   :  { %1502 = vmatpush.msrb.mxu0 %v375_v22  ;;  %1525 = vmatpush.msrb.mxu1 %v383_v23  ;;  %v47_v20 = vld [vmem:[%s4785_s0 + $0x48] sm:$0x3]  ;;  %v48_v21 = vld [vmem:[%s4785_s0 + $0x4a] sm:$0x3]  ;;  %v442_v22 = vld [vmem:[%s4784_s1 + $0xb38] sm:$0xff] }
  0xad   :  { %1551 = vmatpush.msrb.mxu2 %v388_v24  ;;  %1574 = vmatpush.msrb.mxu3 %v396_v25  ;;  %v450_v23 = vld [vmem:[%s4784_s1 + $0xb78] sm:$0xff] }
  0xae   :  { %1503 = vmatpush.msrb.mxu0 %v374_v26  ;;  %1526 = vmatpush.msrb.mxu1 %v382_v27  ;;  %v455_v26 = vld [vmem:[%s4784_s1 + $0xba0] sm:$0xff] }
  0xaf   :  { %1552 = vmatpush.msrb.mxu2 %v387_v28  ;;  %1575 = vmatpush.msrb.mxu3 %v395_v29  ;;  %v463_v27 = vld [vmem:[%s4784_s1 + $0xbe0] sm:$0xff] }
  0xb0   :  { %2427 = vmatmul.msk.f32.vlgmr.msra.gmra.mxu2 %vm659_vm0, %v45_v30  ;;  %2428 = vmatmul.msk.f32.vlgmr.msra.gmra.mxu3 %vm659_vm0, %v46_v31  ;;  %v441_v30 = vld [vmem:[%s4784_s1 + $0xb30] sm:$0xff] }
  0xb1   :  { %1637 = vmatpush.msra.mxu2 %v426_v32  ;;  %1660 = vmatpush.msra.mxu3 %v434_v33  ;;  %v449_v31 = vld [vmem:[%s4784_s1 + $0xb70] sm:$0xff]  ;;  %v454_v32 = vld [vmem:[%s4784_s1 + $0xb98] sm:$0xff] }
  0xb2   :  { %1504 = vmatpush.msrb.mxu0 %v373_v34  ;;  %1527 = vmatpush.msrb.mxu1 %v381_v35  ;;  %v462_v33 = vld [vmem:[%s4784_s1 + $0xbd8] sm:$0xff]  ;;  %v440_v34 = vld [vmem:[%s4784_s1 + $0xb28] sm:$0xff] }
  0xb3   :  { %1638 = vmatpush.msra.mxu2 %v425_v36  ;;  %1661 = vmatpush.msra.mxu3 %v433_v37  ;;  %v448_v35 = vld [vmem:[%s4784_s1 + $0xb68] sm:$0xff]  ;;  %v453_v36 = vld [vmem:[%s4784_s1 + $0xb90] sm:$0xff] }
  0xb4   :  { %1505 = vmatpush.msrb.mxu0 %v372_v38  ;;  %1528 = vmatpush.msrb.mxu1 %v380_v39  ;;  %v461_v37 = vld [vmem:[%s4784_s1 + $0xbd0] sm:$0xff]  ;;  %v439_v38 = vld [vmem:[%s4784_s1 + $0xb20] sm:$0xff] }
  0xb5   :  { %1639 = vmatpush.msra.mxu2 %v424_v40  ;;  %1662 = vmatpush.msra.mxu3 %v432_v41  ;;  %v818_v48 = vpop.f32.mrf.mxu2  ;;  %v841_v49 = vpop.f32.mrf.mxu3  ;;  %v447_v39 = vld [vmem:[%s4784_s1 + $0xb60] sm:$0xff]  ;;  %v452_v40 = vld [vmem:[%s4784_s1 + $0xb88] sm:$0xff] }
  0xb6   :  { %1506 = vmatpush.msrb.mxu0 %v371_v42  ;;  %1529 = vmatpush.msrb.mxu1 %v379_v43  ;;  %v772_v52 = vpop.f32.mrf.mxu0  ;;  %v795_v53 = vpop.f32.mrf.mxu1  ;;  %2323 = vst.msk [vmem:[%s4786_s2 + $0xc] sm:$0x3] %vm2316_vm1, %v818_v48  ;;  %v460_v41 = vld [vmem:[%s4784_s1 + $0xbc8] sm:$0xff]  ;;  %v438_v42 = vld [vmem:[%s4784_s1 + $0xb18] sm:$0xff] }
  0xb7   :  { %2425 = vmatmul.msk.f32.vlgmr.msra.gmra.mxu0 %vm659_vm0, %v43_v44  ;;  %2426 = vmatmul.msk.f32.vlgmr.msra.gmra.mxu1 %vm659_vm0, %v44_v45  ;;  %2321 = vst.msk [vmem:[%s4786_s2 + $0x8] sm:$0x3] %vm2316_vm1, %v772_v52  ;;  %v446_v43 = vld [vmem:[%s4784_s1 + $0xb58] sm:$0xff]  ;;  %v451_v44 = vld [vmem:[%s4784_s1 + $0xb80] sm:$0xff]  ;;  %v489_v52 = vld [vmem:[%s4784_s1 + $0xcb0] sm:$0xff] }
  0xb8   :  { %1591 = vmatpush.msra.mxu0 %v410_v46  ;;  %1614 = vmatpush.msra.mxu1 %v418_v47  ;;  %2322 = vst.msk [vmem:[%s4786_s2 + $0xa] sm:$0x3] %vm2316_vm1, %v795_v53  ;;  %v459_v45 = vld [vmem:[%s4784_s1 + $0xbc0] sm:$0xff]  ;;  %v53_v46 = vld [vmem:[%s4785_s0 + $0x54] sm:$0x3]  ;;  %v490_v48 = vld [vmem:[%s4784_s1 + $0xcb8] sm:$0xff] }
  0xb9   :  { %1640 = vmatpush.msra.mxu2 %v423_v50  ;;  %1663 = vmatpush.msra.mxu3 %v431_v51  ;;  %2324 = vst.msk [vmem:[%s4786_s2 + $0xe] sm:$0x3] %vm2316_vm1, %v841_v49  ;;  %v54_v47 = vld [vmem:[%s4785_s0 + $0x56] sm:$0x3]  ;;  %v498_v49 = vld [vmem:[%s4784_s1 + $0xcf8] sm:$0xff] }
  0xba   :  { %1592 = vmatpush.msra.mxu0 %v409_v54  ;;  %1615 = vmatpush.msra.mxu1 %v417_v55  ;;  %v437_v50 = vld [vmem:[%s4784_s1 + $0xb10] sm:$0xff]  ;;  %v436_v54 = vld [vmem:[%s4784_s1 + $0xb08] sm:$0xff] }
  0xbb   :  { %1641 = vmatpush.msra.mxu2 %v422_v56  ;;  %1664 = vmatpush.msra.mxu3 %v430_v57  ;;  %v445_v51 = vld [vmem:[%s4784_s1 + $0xb50] sm:$0xff]  ;;  %v444_v55 = vld [vmem:[%s4784_s1 + $0xb48] sm:$0xff] }
  0xbc   :  { %1593 = vmatpush.msra.mxu0 %v408_v58  ;;  %1616 = vmatpush.msra.mxu1 %v416_v59  ;;  %v497_v53 = vld [vmem:[%s4784_s1 + $0xcf0] sm:$0xff]  ;;  %v488_v56 = vld [vmem:[%s4784_s1 + $0xca8] sm:$0xff]  ;;  %v435_v58 = vld [vmem:[%s4784_s1 + $0xb00] sm:$0xff] }
  0xbd   :  { %1642 = vmatpush.msra.mxu2 %v421_v60  ;;  %1665 = vmatpush.msra.mxu3 %v429_v61  ;;  %v496_v57 = vld [vmem:[%s4784_s1 + $0xce8] sm:$0xff]  ;;  %v443_v59 = vld [vmem:[%s4784_s1 + $0xb40] sm:$0xff]  ;;  %v51_v60 = vld [vmem:[%s4785_s0 + $0x50] sm:$0x3] }
  0xbe   :  { %1594 = vmatpush.msra.mxu0 %v407_v62  ;;  %1617 = vmatpush.msra.mxu1 %v415_v63  ;;  %v52_v61 = vld [vmem:[%s4785_s0 + $0x52] sm:$0x3]  ;;  %v474_v62 = vld [vmem:[%s4784_s1 + $0xc38] sm:$0xff] }
  0xbf   :  { %1643 = vmatpush.msra.mxu2 %v420_v0  ;;  %1666 = vmatpush.msra.mxu3 %v428_v1  ;;  %v482_v63 = vld [vmem:[%s4784_s1 + $0xc78] sm:$0xff] }
  0xc0   :  { %1595 = vmatpush.msra.mxu0 %v406_v2  ;;  %1618 = vmatpush.msra.mxu1 %v414_v3  ;;  %v487_v2 = vld [vmem:[%s4784_s1 + $0xca0] sm:$0xff] }
  0xc1   :  { %1644 = vmatpush.msra.mxu2 %v419_v4  ;;  %1667 = vmatpush.msra.mxu3 %v427_v5  ;;  %v495_v3 = vld [vmem:[%s4784_s1 + $0xce0] sm:$0xff] }
  0xc2   :  { %2431 = vmatmul.msk.f32.vlgmr.msrb.gmra.mxu2 %vm659_vm0, %v49_v6  ;;  %2432 = vmatmul.msk.f32.vlgmr.msrb.gmra.mxu3 %vm659_vm0, %v50_v7  ;;  %v473_v6 = vld [vmem:[%s4784_s1 + $0xc30] sm:$0xff] }
  0xc3   :  { %1729 = vmatpush.msrb.mxu2 %v458_v8  ;;  %1752 = vmatpush.msrb.mxu3 %v466_v9  ;;  %v481_v7 = vld [vmem:[%s4784_s1 + $0xc70] sm:$0xff]  ;;  %v486_v8 = vld [vmem:[%s4784_s1 + $0xc98] sm:$0xff] }
  0xc4   :  { %1596 = vmatpush.msra.mxu0 %v405_v10  ;;  %1619 = vmatpush.msra.mxu1 %v413_v11  ;;  %v494_v9 = vld [vmem:[%s4784_s1 + $0xcd8] sm:$0xff]  ;;  %v472_v10 = vld [vmem:[%s4784_s1 + $0xc28] sm:$0xff] }
  0xc5   :  { %1730 = vmatpush.msrb.mxu2 %v457_v12  ;;  %1753 = vmatpush.msrb.mxu3 %v465_v13  ;;  %v480_v11 = vld [vmem:[%s4784_s1 + $0xc68] sm:$0xff]  ;;  %v485_v12 = vld [vmem:[%s4784_s1 + $0xc90] sm:$0xff] }
  0xc6   :  { %1597 = vmatpush.msra.mxu0 %v404_v14  ;;  %1620 = vmatpush.msra.mxu1 %v412_v15  ;;  %v493_v13 = vld [vmem:[%s4784_s1 + $0xcd0] sm:$0xff]  ;;  %v471_v14 = vld [vmem:[%s4784_s1 + $0xc20] sm:$0xff] }
  0xc7   :  { %1731 = vmatpush.msrb.mxu2 %v456_v16  ;;  %1754 = vmatpush.msrb.mxu3 %v464_v17  ;;  %v910_v24 = vpop.f32.mrf.mxu2  ;;  %v933_v25 = vpop.f32.mrf.mxu3  ;;  %v479_v15 = vld [vmem:[%s4784_s1 + $0xc60] sm:$0xff]  ;;  %v484_v16 = vld [vmem:[%s4784_s1 + $0xc88] sm:$0xff] }
  0xc8   :  { %1598 = vmatpush.msra.mxu0 %v403_v18  ;;  %1621 = vmatpush.msra.mxu1 %v411_v19  ;;  %v864_v28 = vpop.f32.mrf.mxu0  ;;  %v887_v29 = vpop.f32.mrf.mxu1  ;;  %2327 = vst.msk [vmem:[%s4786_s2 + $0x14] sm:$0x3] %vm2316_vm1, %v910_v24  ;;  %v492_v17 = vld [vmem:[%s4784_s1 + $0xcc8] sm:$0xff]  ;;  %v470_v18 = vld [vmem:[%s4784_s1 + $0xc18] sm:$0xff] }
  0xc9   :  { %2429 = vmatmul.msk.f32.vlgmr.msrb.gmra.mxu0 %vm659_vm0, %v47_v20  ;;  %2430 = vmatmul.msk.f32.vlgmr.msrb.gmra.mxu1 %vm659_vm0, %v48_v21  ;;  %2325 = vst.msk [vmem:[%s4786_s2 + $0x10] sm:$0x3] %vm2316_vm1, %v864_v28  ;;  %v478_v19 = vld [vmem:[%s4784_s1 + $0xc58] sm:$0xff]  ;;  %v483_v20 = vld [vmem:[%s4784_s1 + $0xc80] sm:$0xff]  ;;  %v521_v28 = vld [vmem:[%s4784_s1 + $0xdb0] sm:$0xff] }
  0xca   :  { %1683 = vmatpush.msrb.mxu0 %v442_v22  ;;  %1706 = vmatpush.msrb.mxu1 %v450_v23  ;;  %2326 = vst.msk [vmem:[%s4786_s2 + $0x12] sm:$0x3] %vm2316_vm1, %v887_v29  ;;  %v491_v21 = vld [vmem:[%s4784_s1 + $0xcc0] sm:$0xff]  ;;  %v57_v22 = vld [vmem:[%s4785_s0 + $0x5c] sm:$0x3]  ;;  %v529_v29 = vld [vmem:[%s4784_s1 + $0xdf0] sm:$0xff] }
  0xcb   :  { %1732 = vmatpush.msrb.mxu2 %v455_v26  ;;  %1755 = vmatpush.msrb.mxu3 %v463_v27  ;;  %2328 = vst.msk [vmem:[%s4786_s2 + $0x16] sm:$0x3] %vm2316_vm1, %v933_v25  ;;  %v58_v23 = vld [vmem:[%s4785_s0 + $0x5e] sm:$0x3]  ;;  %v469_v26 = vld [vmem:[%s4784_s1 + $0xc10] sm:$0xff] }
  0xcc   :  { %1684 = vmatpush.msrb.mxu0 %v441_v30  ;;  %1707 = vmatpush.msrb.mxu1 %v449_v31  ;;  %v522_v24 = vld [vmem:[%s4784_s1 + $0xdb8] sm:$0xff]  ;;  %v477_v27 = vld [vmem:[%s4784_s1 + $0xc50] sm:$0xff]  ;;  %v468_v30 = vld [vmem:[%s4784_s1 + $0xc08] sm:$0xff] }
  0xcd   :  { %1733 = vmatpush.msrb.mxu2 %v454_v32  ;;  %1756 = vmatpush.msrb.mxu3 %v462_v33  ;;  %v530_v25 = vld [vmem:[%s4784_s1 + $0xdf8] sm:$0xff]  ;;  %v476_v31 = vld [vmem:[%s4784_s1 + $0xc48] sm:$0xff] }
  0xce   :  { %1685 = vmatpush.msrb.mxu0 %v440_v34  ;;  %1708 = vmatpush.msrb.mxu1 %v448_v35  ;;  %v520_v32 = vld [vmem:[%s4784_s1 + $0xda8] sm:$0xff]  ;;  %v467_v34 = vld [vmem:[%s4784_s1 + $0xc00] sm:$0xff] }
  0xcf   :  { %1734 = vmatpush.msrb.mxu2 %v453_v36  ;;  %1757 = vmatpush.msrb.mxu3 %v461_v37  ;;  %v528_v33 = vld [vmem:[%s4784_s1 + $0xde8] sm:$0xff]  ;;  %v475_v35 = vld [vmem:[%s4784_s1 + $0xc40] sm:$0xff]  ;;  %v55_v36 = vld [vmem:[%s4785_s0 + $0x58] sm:$0x3] }
  0xd0   :  { %1686 = vmatpush.msrb.mxu0 %v439_v38  ;;  %1709 = vmatpush.msrb.mxu1 %v447_v39  ;;  %v56_v37 = vld [vmem:[%s4785_s0 + $0x5a] sm:$0x3] }
  0xd1   :  { %1735 = vmatpush.msrb.mxu2 %v452_v40  ;;  %1758 = vmatpush.msrb.mxu3 %v460_v41  ;;  %v506_v38 = vld [vmem:[%s4784_s1 + $0xd38] sm:$0xff] }
  0xd2   :  { %1687 = vmatpush.msrb.mxu0 %v438_v42  ;;  %1710 = vmatpush.msrb.mxu1 %v446_v43  ;;  %v514_v39 = vld [vmem:[%s4784_s1 + $0xd78] sm:$0xff]  ;;  %v519_v42 = vld [vmem:[%s4784_s1 + $0xda0] sm:$0xff] }
  0xd3   :  { %1736 = vmatpush.msrb.mxu2 %v451_v44  ;;  %1759 = vmatpush.msrb.mxu3 %v459_v45  ;;  %v527_v43 = vld [vmem:[%s4784_s1 + $0xde0] sm:$0xff] }
  0xd4   :  { %2435 = vmatmul.msk.f32.vlgmr.msra.gmra.mxu2 %vm659_vm0, %v53_v46  ;;  %2436 = vmatmul.msk.f32.vlgmr.msra.gmra.mxu3 %vm659_vm0, %v54_v47  ;;  %v505_v46 = vld [vmem:[%s4784_s1 + $0xd30] sm:$0xff] }
  0xd5   :  { %1821 = vmatpush.msra.mxu2 %v490_v48  ;;  %1844 = vmatpush.msra.mxu3 %v498_v49  ;;  %v513_v47 = vld [vmem:[%s4784_s1 + $0xd70] sm:$0xff]  ;;  %v518_v48 = vld [vmem:[%s4784_s1 + $0xd98] sm:$0xff] }
  0xd6   :  { %1688 = vmatpush.msrb.mxu0 %v437_v50  ;;  %1711 = vmatpush.msrb.mxu1 %v445_v51  ;;  %v526_v49 = vld [vmem:[%s4784_s1 + $0xdd8] sm:$0xff]  ;;  %v504_v50 = vld [vmem:[%s4784_s1 + $0xd28] sm:$0xff] }
  0xd7   :  { %1822 = vmatpush.msra.mxu2 %v489_v52  ;;  %1845 = vmatpush.msra.mxu3 %v497_v53  ;;  %v512_v51 = vld [vmem:[%s4784_s1 + $0xd68] sm:$0xff]  ;;  %v517_v52 = vld [vmem:[%s4784_s1 + $0xd90] sm:$0xff] }
  0xd8   :  { %1689 = vmatpush.msrb.mxu0 %v436_v54  ;;  %1712 = vmatpush.msrb.mxu1 %v444_v55  ;;  %v525_v53 = vld [vmem:[%s4784_s1 + $0xdd0] sm:$0xff]  ;;  %v503_v54 = vld [vmem:[%s4784_s1 + $0xd20] sm:$0xff] }
  0xd9   :  { %1823 = vmatpush.msra.mxu2 %v488_v56  ;;  %1846 = vmatpush.msra.mxu3 %v496_v57  ;;  %v1002_v0 = vpop.f32.mrf.mxu2  ;;  %v1025_v1 = vpop.f32.mrf.mxu3  ;;  %v511_v55 = vld [vmem:[%s4784_s1 + $0xd60] sm:$0xff]  ;;  %v516_v56 = vld [vmem:[%s4784_s1 + $0xd88] sm:$0xff] }
  0xda   :  { %1690 = vmatpush.msrb.mxu0 %v435_v58  ;;  %1713 = vmatpush.msrb.mxu1 %v443_v59  ;;  %v956_v4 = vpop.f32.mrf.mxu0  ;;  %v979_v5 = vpop.f32.mrf.mxu1  ;;  %2331 = vst.msk [vmem:[%s4786_s2 + $0x1c] sm:$0x3] %vm2316_vm1, %v1002_v0  ;;  %v524_v57 = vld [vmem:[%s4784_s1 + $0xdc8] sm:$0xff]  ;;  %v502_v58 = vld [vmem:[%s4784_s1 + $0xd18] sm:$0xff] }
  0xdb   :  { %2433 = vmatmul.msk.f32.vlgmr.msra.gmra.mxu0 %vm659_vm0, %v51_v60  ;;  %2434 = vmatmul.msk.f32.vlgmr.msra.gmra.mxu1 %vm659_vm0, %v52_v61  ;;  %2329 = vst.msk [vmem:[%s4786_s2 + $0x18] sm:$0x3] %vm2316_vm1, %v956_v4  ;;  %v510_v59 = vld [vmem:[%s4784_s1 + $0xd58] sm:$0xff]  ;;  %v515_v60 = vld [vmem:[%s4784_s1 + $0xd80] sm:$0xff]  ;;  %v553_v4 = vld [vmem:[%s4784_s1 + $0xeb0] sm:$0xff] }
  0xdc   :  { %1775 = vmatpush.msra.mxu0 %v474_v62  ;;  %1798 = vmatpush.msra.mxu1 %v482_v63  ;;  %2330 = vst.msk [vmem:[%s4786_s2 + $0x1a] sm:$0x3] %vm2316_vm1, %v979_v5  ;;  %v523_v61 = vld [vmem:[%s4784_s1 + $0xdc0] sm:$0xff]  ;;  %v554_v0 = vld [vmem:[%s4784_s1 + $0xeb8] sm:$0xff]  ;;  %v561_v5 = vld [vmem:[%s4784_s1 + $0xef0] sm:$0xff] }
  0xdd   :  { %1824 = vmatpush.msra.mxu2 %v487_v2  ;;  %1847 = vmatpush.msra.mxu3 %v495_v3  ;;  %2332 = vst.msk [vmem:[%s4786_s2 + $0x1e] sm:$0x3] %vm2316_vm1, %v1025_v1  ;;  %v61_v62 = vld [vmem:[%s4785_s0 + $0x64] sm:$0x3]  ;;  %v62_v63 = vld [vmem:[%s4785_s0 + $0x66] sm:$0x3] }
  0xde   :  { %1776 = vmatpush.msra.mxu0 %v473_v6  ;;  %1799 = vmatpush.msra.mxu1 %v481_v7  ;;  %v562_v1 = vld [vmem:[%s4784_s1 + $0xef8] sm:$0xff]  ;;  %v501_v2 = vld [vmem:[%s4784_s1 + $0xd10] sm:$0xff]  ;;  %v500_v6 = vld [vmem:[%s4784_s1 + $0xd08] sm:$0xff] }
  0xdf   :  { %1825 = vmatpush.msra.mxu2 %v486_v8  ;;  %1848 = vmatpush.msra.mxu3 %v494_v9  ;;  %v509_v3 = vld [vmem:[%s4784_s1 + $0xd50] sm:$0xff]  ;;  %v508_v7 = vld [vmem:[%s4784_s1 + $0xd48] sm:$0xff] }
  0xe0   :  { %1777 = vmatpush.msra.mxu0 %v472_v10  ;;  %1800 = vmatpush.msra.mxu1 %v480_v11  ;;  %v552_v8 = vld [vmem:[%s4784_s1 + $0xea8] sm:$0xff]  ;;  %v499_v10 = vld [vmem:[%s4784_s1 + $0xd00] sm:$0xff] }
  0xe1   :  { %1826 = vmatpush.msra.mxu2 %v485_v12  ;;  %1849 = vmatpush.msra.mxu3 %v493_v13  ;;  %v560_v9 = vld [vmem:[%s4784_s1 + $0xee8] sm:$0xff]  ;;  %v507_v11 = vld [vmem:[%s4784_s1 + $0xd40] sm:$0xff] }
  0xe2   :  { %1778 = vmatpush.msra.mxu0 %v471_v14  ;;  %1801 = vmatpush.msra.mxu1 %v479_v15  ;;  %v59_v12 = vld [vmem:[%s4785_s0 + $0x60] sm:$0x3]  ;;  %v60_v13 = vld [vmem:[%s4785_s0 + $0x62] sm:$0x3]  ;;  %v538_v14 = vld [vmem:[%s4784_s1 + $0xe38] sm:$0xff] }
  0xe3   :  { %1827 = vmatpush.msra.mxu2 %v484_v16  ;;  %1850 = vmatpush.msra.mxu3 %v492_v17  ;;  %v546_v15 = vld [vmem:[%s4784_s1 + $0xe78] sm:$0xff] }
  0xe4   :  { %1779 = vmatpush.msra.mxu0 %v470_v18  ;;  %1802 = vmatpush.msra.mxu1 %v478_v19  ;;  %v551_v18 = vld [vmem:[%s4784_s1 + $0xea0] sm:$0xff] }
  0xe5   :  { %1828 = vmatpush.msra.mxu2 %v483_v20  ;;  %1851 = vmatpush.msra.mxu3 %v491_v21  ;;  %v559_v19 = vld [vmem:[%s4784_s1 + $0xee0] sm:$0xff] }
  0xe6   :  { %2439 = vmatmul.msk.f32.vlgmr.msrb.gmra.mxu2 %vm659_vm0, %v57_v22  ;;  %2440 = vmatmul.msk.f32.vlgmr.msrb.gmra.mxu3 %vm659_vm0, %v58_v23  ;;  %v537_v22 = vld [vmem:[%s4784_s1 + $0xe30] sm:$0xff] }
  0xe7   :  { %1913 = vmatpush.msrb.mxu2 %v522_v24  ;;  %1936 = vmatpush.msrb.mxu3 %v530_v25  ;;  %v545_v23 = vld [vmem:[%s4784_s1 + $0xe70] sm:$0xff]  ;;  %v550_v24 = vld [vmem:[%s4784_s1 + $0xe98] sm:$0xff] }
  0xe8   :  { %1780 = vmatpush.msra.mxu0 %v469_v26  ;;  %1803 = vmatpush.msra.mxu1 %v477_v27  ;;  %v558_v25 = vld [vmem:[%s4784_s1 + $0xed8] sm:$0xff]  ;;  %v536_v26 = vld [vmem:[%s4784_s1 + $0xe28] sm:$0xff] }
  0xe9   :  { %1914 = vmatpush.msrb.mxu2 %v521_v28  ;;  %1937 = vmatpush.msrb.mxu3 %v529_v29  ;;  %v544_v27 = vld [vmem:[%s4784_s1 + $0xe68] sm:$0xff]  ;;  %v549_v28 = vld [vmem:[%s4784_s1 + $0xe90] sm:$0xff] }
  0xea   :  { %1781 = vmatpush.msra.mxu0 %v468_v30  ;;  %1804 = vmatpush.msra.mxu1 %v476_v31  ;;  %v557_v29 = vld [vmem:[%s4784_s1 + $0xed0] sm:$0xff]  ;;  %v535_v30 = vld [vmem:[%s4784_s1 + $0xe20] sm:$0xff] }
  0xeb   :  { %1915 = vmatpush.msrb.mxu2 %v520_v32  ;;  %1938 = vmatpush.msrb.mxu3 %v528_v33  ;;  %v1094_v40 = vpop.f32.mrf.mxu2  ;;  %v1117_v41 = vpop.f32.mrf.mxu3  ;;  %v543_v31 = vld [vmem:[%s4784_s1 + $0xe60] sm:$0xff]  ;;  %v548_v32 = vld [vmem:[%s4784_s1 + $0xe88] sm:$0xff] }
  0xec   :  { %1782 = vmatpush.msra.mxu0 %v467_v34  ;;  %1805 = vmatpush.msra.mxu1 %v475_v35  ;;  %v1048_v44 = vpop.f32.mrf.mxu0  ;;  %v1071_v45 = vpop.f32.mrf.mxu1  ;;  %2335 = vst.msk [vmem:[%s4786_s2 + $0x24] sm:$0x3] %vm2316_vm1, %v1094_v40  ;;  %v556_v33 = vld [vmem:[%s4784_s1 + $0xec8] sm:$0xff]  ;;  %v534_v34 = vld [vmem:[%s4784_s1 + $0xe18] sm:$0xff] }
  0xed   :  { %2437 = vmatmul.msk.f32.vlgmr.msrb.gmra.mxu0 %vm659_vm0, %v55_v36  ;;  %2438 = vmatmul.msk.f32.vlgmr.msrb.gmra.mxu1 %vm659_vm0, %v56_v37  ;;  %2333 = vst.msk [vmem:[%s4786_s2 + $0x20] sm:$0x3] %vm2316_vm1, %v1048_v44  ;;  %v542_v35 = vld [vmem:[%s4784_s1 + $0xe58] sm:$0xff]  ;;  %v547_v36 = vld [vmem:[%s4784_s1 + $0xe80] sm:$0xff]  ;;  %v585_v44 = vld [vmem:[%s4784_s1 + $0xfb0] sm:$0xff] }
  0xee   :  { %1867 = vmatpush.msrb.mxu0 %v506_v38  ;;  %1890 = vmatpush.msrb.mxu1 %v514_v39  ;;  %2334 = vst.msk [vmem:[%s4786_s2 + $0x22] sm:$0x3] %vm2316_vm1, %v1071_v45  ;;  %v555_v37 = vld [vmem:[%s4784_s1 + $0xec0] sm:$0xff]  ;;  %v65_v38 = vld [vmem:[%s4785_s0 + $0x6c] sm:$0x3]  ;;  %v586_v40 = vld [vmem:[%s4784_s1 + $0xfb8] sm:$0xff] }
  0xef   :  { %1916 = vmatpush.msrb.mxu2 %v519_v42  ;;  %1939 = vmatpush.msrb.mxu3 %v527_v43  ;;  %2336 = vst.msk [vmem:[%s4786_s2 + $0x26] sm:$0x3] %vm2316_vm1, %v1117_v41  ;;  %v66_v39 = vld [vmem:[%s4785_s0 + $0x6e] sm:$0x3]  ;;  %v594_v41 = vld [vmem:[%s4784_s1 + $0xff8] sm:$0xff]  ;;  %v533_v42 = vld [vmem:[%s4784_s1 + $0xe10] sm:$0xff] }
  0xf0   :  { %1868 = vmatpush.msrb.mxu0 %v505_v46  ;;  %1891 = vmatpush.msrb.mxu1 %v513_v47  ;;  %v541_v43 = vld [vmem:[%s4784_s1 + $0xe50] sm:$0xff]  ;;  %v532_v46 = vld [vmem:[%s4784_s1 + $0xe08] sm:$0xff] }
  0xf1   :  { %1917 = vmatpush.msrb.mxu2 %v518_v48  ;;  %1940 = vmatpush.msrb.mxu3 %v526_v49  ;;  %v593_v45 = vld [vmem:[%s4784_s1 + $0xff0] sm:$0xff]  ;;  %v540_v47 = vld [vmem:[%s4784_s1 + $0xe48] sm:$0xff] }
  0xf2   :  { %1869 = vmatpush.msrb.mxu0 %v504_v50  ;;  %1892 = vmatpush.msrb.mxu1 %v512_v51  ;;  %v584_v48 = vld [vmem:[%s4784_s1 + $0xfa8] sm:$0xff]  ;;  %v531_v50 = vld [vmem:[%s4784_s1 + $0xe00] sm:$0xff] }
  0xf3   :  { %1918 = vmatpush.msrb.mxu2 %v517_v52  ;;  %1941 = vmatpush.msrb.mxu3 %v525_v53  ;;  %v592_v49 = vld [vmem:[%s4784_s1 + $0xfe8] sm:$0xff]  ;;  %v539_v51 = vld [vmem:[%s4784_s1 + $0xe40] sm:$0xff] }
  0xf4   :  { %1870 = vmatpush.msrb.mxu0 %v503_v54  ;;  %1893 = vmatpush.msrb.mxu1 %v511_v55  ;;  %v63_v52 = vld [vmem:[%s4785_s0 + $0x68] sm:$0x3]  ;;  %v64_v53 = vld [vmem:[%s4785_s0 + $0x6a] sm:$0x3]  ;;  %v570_v54 = vld [vmem:[%s4784_s1 + $0xf38] sm:$0xff] }
  0xf5   :  { %1919 = vmatpush.msrb.mxu2 %v516_v56  ;;  %1942 = vmatpush.msrb.mxu3 %v524_v57  ;;  %v578_v55 = vld [vmem:[%s4784_s1 + $0xf78] sm:$0xff] }
  0xf6   :  { %1871 = vmatpush.msrb.mxu0 %v502_v58  ;;  %1894 = vmatpush.msrb.mxu1 %v510_v59  ;;  %v583_v58 = vld [vmem:[%s4784_s1 + $0xfa0] sm:$0xff] }
  0xf7   :  { %1920 = vmatpush.msrb.mxu2 %v515_v60  ;;  %1943 = vmatpush.msrb.mxu3 %v523_v61  ;;  %v591_v59 = vld [vmem:[%s4784_s1 + $0xfe0] sm:$0xff] }
  0xf8   :  { %2443 = vmatmul.msk.f32.vlgmr.msra.gmra.mxu2 %vm659_vm0, %v61_v62  ;;  %2444 = vmatmul.msk.f32.vlgmr.msra.gmra.mxu3 %vm659_vm0, %v62_v63  ;;  %v569_v62 = vld [vmem:[%s4784_s1 + $0xf30] sm:$0xff] }
  0xf9   :  { %2005 = vmatpush.msra.mxu2 %v554_v0  ;;  %2028 = vmatpush.msra.mxu3 %v562_v1  ;;  %v577_v63 = vld [vmem:[%s4784_s1 + $0xf70] sm:$0xff]  ;;  %v582_v0 = vld [vmem:[%s4784_s1 + $0xf98] sm:$0xff] }
  0xfa   :  { %1872 = vmatpush.msrb.mxu0 %v501_v2  ;;  %1895 = vmatpush.msrb.mxu1 %v509_v3  ;;  %v590_v1 = vld [vmem:[%s4784_s1 + $0xfd8] sm:$0xff]  ;;  %v568_v2 = vld [vmem:[%s4784_s1 + $0xf28] sm:$0xff] }
  0xfb   :  { %2006 = vmatpush.msra.mxu2 %v553_v4  ;;  %2029 = vmatpush.msra.mxu3 %v561_v5  ;;  %v576_v3 = vld [vmem:[%s4784_s1 + $0xf68] sm:$0xff]  ;;  %v581_v4 = vld [vmem:[%s4784_s1 + $0xf90] sm:$0xff] }
  0xfc   :  { %1873 = vmatpush.msrb.mxu0 %v500_v6  ;;  %1896 = vmatpush.msrb.mxu1 %v508_v7  ;;  %v589_v5 = vld [vmem:[%s4784_s1 + $0xfd0] sm:$0xff]  ;;  %v567_v6 = vld [vmem:[%s4784_s1 + $0xf20] sm:$0xff] }
  0xfd   :  { %2007 = vmatpush.msra.mxu2 %v552_v8  ;;  %2030 = vmatpush.msra.mxu3 %v560_v9  ;;  %v1186_v16 = vpop.f32.mrf.mxu2  ;;  %v1209_v17 = vpop.f32.mrf.mxu3  ;;  %v575_v7 = vld [vmem:[%s4784_s1 + $0xf60] sm:$0xff]  ;;  %v580_v8 = vld [vmem:[%s4784_s1 + $0xf88] sm:$0xff] }
  0xfe   :  { %1874 = vmatpush.msrb.mxu0 %v499_v10  ;;  %1897 = vmatpush.msrb.mxu1 %v507_v11  ;;  %v1140_v20 = vpop.f32.mrf.mxu0  ;;  %v1163_v21 = vpop.f32.mrf.mxu1  ;;  %2339 = vst.msk [vmem:[%s4786_s2 + $0x2c] sm:$0x3] %vm2316_vm1, %v1186_v16  ;;  %v588_v9 = vld [vmem:[%s4784_s1 + $0xfc8] sm:$0xff]  ;;  %v566_v10 = vld [vmem:[%s4784_s1 + $0xf18] sm:$0xff] }
  0xff   :  { %2441 = vmatmul.msk.f32.vlgmr.msra.gmra.mxu0 %vm659_vm0, %v59_v12  ;;  %2442 = vmatmul.msk.f32.vlgmr.msra.gmra.mxu1 %vm659_vm0, %v60_v13  ;;  %2337 = vst.msk [vmem:[%s4786_s2 + $0x28] sm:$0x3] %vm2316_vm1, %v1140_v20  ;;  %v574_v11 = vld [vmem:[%s4784_s1 + $0xf58] sm:$0xff]  ;;  %v579_v12 = vld [vmem:[%s4784_s1 + $0xf80] sm:$0xff]  ;;  %v617_v20 = vld [vmem:[%s4784_s1 + $0x10b0] sm:$0xff] }
 0x100   :  { %1959 = vmatpush.msra.mxu0 %v538_v14  ;;  %1982 = vmatpush.msra.mxu1 %v546_v15  ;;  %2338 = vst.msk [vmem:[%s4786_s2 + $0x2a] sm:$0x3] %vm2316_vm1, %v1163_v21  ;;  %v587_v13 = vld [vmem:[%s4784_s1 + $0xfc0] sm:$0xff]  ;;  %v69_v14 = vld [vmem:[%s4785_s0 + $0x74] sm:$0x3]  ;;  %v618_v16 = vld [vmem:[%s4784_s1 + $0x10b8] sm:$0xff] }
 0x101   :  { %2008 = vmatpush.msra.mxu2 %v551_v18  ;;  %2031 = vmatpush.msra.mxu3 %v559_v19  ;;  %2340 = vst.msk [vmem:[%s4786_s2 + $0x2e] sm:$0x3] %vm2316_vm1, %v1209_v17  ;;  %v70_v15 = vld [vmem:[%s4785_s0 + $0x76] sm:$0x3]  ;;  %v626_v17 = vld [vmem:[%s4784_s1 + $0x10f8] sm:$0xff] }
 0x102   :  { %1960 = vmatpush.msra.mxu0 %v537_v22  ;;  %1983 = vmatpush.msra.mxu1 %v545_v23  ;;  %v565_v18 = vld [vmem:[%s4784_s1 + $0xf10] sm:$0xff]  ;;  %v564_v22 = vld [vmem:[%s4784_s1 + $0xf08] sm:$0xff] }
 0x103   :  { %2009 = vmatpush.msra.mxu2 %v550_v24  ;;  %2032 = vmatpush.msra.mxu3 %v558_v25  ;;  %v573_v19 = vld [vmem:[%s4784_s1 + $0xf50] sm:$0xff]  ;;  %v572_v23 = vld [vmem:[%s4784_s1 + $0xf48] sm:$0xff] }
 0x104   :  { %1961 = vmatpush.msra.mxu0 %v536_v26  ;;  %1984 = vmatpush.msra.mxu1 %v544_v27  ;;  %v625_v21 = vld [vmem:[%s4784_s1 + $0x10f0] sm:$0xff]  ;;  %v616_v24 = vld [vmem:[%s4784_s1 + $0x10a8] sm:$0xff]  ;;  %v563_v26 = vld [vmem:[%s4784_s1 + $0xf00] sm:$0xff] }
 0x105   :  { %2010 = vmatpush.msra.mxu2 %v549_v28  ;;  %2033 = vmatpush.msra.mxu3 %v557_v29  ;;  %v624_v25 = vld [vmem:[%s4784_s1 + $0x10e8] sm:$0xff]  ;;  %v571_v27 = vld [vmem:[%s4784_s1 + $0xf40] sm:$0xff]  ;;  %v67_v28 = vld [vmem:[%s4785_s0 + $0x70] sm:$0x3] }
 0x106   :  { %1962 = vmatpush.msra.mxu0 %v535_v30  ;;  %1985 = vmatpush.msra.mxu1 %v543_v31  ;;  %v68_v29 = vld [vmem:[%s4785_s0 + $0x72] sm:$0x3]  ;;  %v602_v30 = vld [vmem:[%s4784_s1 + $0x1038] sm:$0xff] }
 0x107   :  { %2011 = vmatpush.msra.mxu2 %v548_v32  ;;  %2034 = vmatpush.msra.mxu3 %v556_v33  ;;  %v610_v31 = vld [vmem:[%s4784_s1 + $0x1078] sm:$0xff] }
 0x108   :  { %1963 = vmatpush.msra.mxu0 %v534_v34  ;;  %1986 = vmatpush.msra.mxu1 %v542_v35  ;;  %v615_v34 = vld [vmem:[%s4784_s1 + $0x10a0] sm:$0xff] }
 0x109   :  { %2012 = vmatpush.msra.mxu2 %v547_v36  ;;  %2035 = vmatpush.msra.mxu3 %v555_v37  ;;  %v623_v35 = vld [vmem:[%s4784_s1 + $0x10e0] sm:$0xff] }
 0x10a   :  { %2447 = vmatmul.msk.f32.vlgmr.msrb.gmra.mxu2 %vm659_vm0, %v65_v38  ;;  %2448 = vmatmul.msk.f32.vlgmr.msrb.gmra.mxu3 %vm659_vm0, %v66_v39  ;;  %v601_v38 = vld [vmem:[%s4784_s1 + $0x1030] sm:$0xff] }
 0x10b   :  { %2097 = vmatpush.msrb.mxu2 %v586_v40  ;;  %2120 = vmatpush.msrb.mxu3 %v594_v41  ;;  %v609_v39 = vld [vmem:[%s4784_s1 + $0x1070] sm:$0xff]  ;;  %v614_v40 = vld [vmem:[%s4784_s1 + $0x1098] sm:$0xff] }
 0x10c   :  { %1964 = vmatpush.msra.mxu0 %v533_v42  ;;  %1987 = vmatpush.msra.mxu1 %v541_v43  ;;  %v622_v41 = vld [vmem:[%s4784_s1 + $0x10d8] sm:$0xff]  ;;  %v600_v42 = vld [vmem:[%s4784_s1 + $0x1028] sm:$0xff] }
 0x10d   :  { %2098 = vmatpush.msrb.mxu2 %v585_v44  ;;  %2121 = vmatpush.msrb.mxu3 %v593_v45  ;;  %v608_v43 = vld [vmem:[%s4784_s1 + $0x1068] sm:$0xff]  ;;  %v613_v44 = vld [vmem:[%s4784_s1 + $0x1090] sm:$0xff] }
 0x10e   :  { %1965 = vmatpush.msra.mxu0 %v532_v46  ;;  %1988 = vmatpush.msra.mxu1 %v540_v47  ;;  %v621_v45 = vld [vmem:[%s4784_s1 + $0x10d0] sm:$0xff]  ;;  %v599_v46 = vld [vmem:[%s4784_s1 + $0x1020] sm:$0xff] }
 0x10f   :  { %2099 = vmatpush.msrb.mxu2 %v584_v48  ;;  %2122 = vmatpush.msrb.mxu3 %v592_v49  ;;  %v1278_v56 = vpop.f32.mrf.mxu2  ;;  %v1301_v57 = vpop.f32.mrf.mxu3  ;;  %v607_v47 = vld [vmem:[%s4784_s1 + $0x1060] sm:$0xff]  ;;  %v612_v48 = vld [vmem:[%s4784_s1 + $0x1088] sm:$0xff] }
 0x110   :  { %1966 = vmatpush.msra.mxu0 %v531_v50  ;;  %1989 = vmatpush.msra.mxu1 %v539_v51  ;;  %v1232_v60 = vpop.f32.mrf.mxu0  ;;  %v1255_v61 = vpop.f32.mrf.mxu1  ;;  %2343 = vst.msk [vmem:[%s4786_s2 + $0x34] sm:$0x3] %vm2316_vm1, %v1278_v56  ;;  %v620_v49 = vld [vmem:[%s4784_s1 + $0x10c8] sm:$0xff]  ;;  %v73_v50 = vld [vmem:[%s4785_s0 + $0x7c] sm:$0x3] }
 0x111   :  { %2445 = vmatmul.msk.f32.vlgmr.msrb.gmra.mxu0 %vm659_vm0, %v63_v52  ;;  %2446 = vmatmul.msk.f32.vlgmr.msrb.gmra.mxu1 %vm659_vm0, %v64_v53  ;;  %2341 = vst.msk [vmem:[%s4786_s2 + $0x30] sm:$0x3] %vm2316_vm1, %v1232_v60  ;;  %v74_v51 = vld [vmem:[%s4785_s0 + $0x7e] sm:$0x3]  ;;  %v649_v60 = vld [vmem:[%s4784_s1 + $0x11b0] sm:$0xff] }
 0x112   :  { %2051 = vmatpush.msrb.mxu0 %v570_v54  ;;  %2074 = vmatpush.msrb.mxu1 %v578_v55  ;;  %2342 = vst.msk [vmem:[%s4786_s2 + $0x32] sm:$0x3] %vm2316_vm1, %v1255_v61  ;;  %v598_v52 = vld [vmem:[%s4784_s1 + $0x1018] sm:$0xff]  ;;  %v611_v54 = vld [vmem:[%s4784_s1 + $0x1080] sm:$0xff]  ;;  %v657_v61 = vld [vmem:[%s4784_s1 + $0x11f0] sm:$0xff] }
 0x113   :  { %2100 = vmatpush.msrb.mxu2 %v583_v58  ;;  %2123 = vmatpush.msrb.mxu3 %v591_v59  ;;  %2344 = vst.msk [vmem:[%s4786_s2 + $0x36] sm:$0x3] %vm2316_vm1, %v1301_v57  ;;  %v606_v53 = vld [vmem:[%s4784_s1 + $0x1058] sm:$0xff]  ;;  %v619_v55 = vld [vmem:[%s4784_s1 + $0x10c0] sm:$0xff]  ;;  %v597_v58 = vld [vmem:[%s4784_s1 + $0x1010] sm:$0xff] }
 0x114   :  { %2052 = vmatpush.msrb.mxu0 %v569_v62  ;;  %2075 = vmatpush.msrb.mxu1 %v577_v63  ;;  %v650_v56 = vld [vmem:[%s4784_s1 + $0x11b8] sm:$0xff]  ;;  %v605_v59 = vld [vmem:[%s4784_s1 + $0x1050] sm:$0xff]  ;;  %v596_v62 = vld [vmem:[%s4784_s1 + $0x1008] sm:$0xff] }
 0x115   :  { %2101 = vmatpush.msrb.mxu2 %v582_v0  ;;  %2124 = vmatpush.msrb.mxu3 %v590_v1  ;;  %v658_v57 = vld [vmem:[%s4784_s1 + $0x11f8] sm:$0xff]  ;;  %v604_v63 = vld [vmem:[%s4784_s1 + $0x1048] sm:$0xff] }
 0x116   :  { %2053 = vmatpush.msrb.mxu0 %v568_v2  ;;  %2076 = vmatpush.msrb.mxu1 %v576_v3  ;;  %v648_v0 = vld [vmem:[%s4784_s1 + $0x11a8] sm:$0xff]  ;;  %v71_v2 = vld [vmem:[%s4785_s0 + $0x78] sm:$0x3]  ;;  %v72_v3 = vld [vmem:[%s4785_s0 + $0x7a] sm:$0x3] }
 0x117   :  { %2102 = vmatpush.msrb.mxu2 %v581_v4  ;;  %2125 = vmatpush.msrb.mxu3 %v589_v5  ;;  %v656_v1 = vld [vmem:[%s4784_s1 + $0x11e8] sm:$0xff]  ;;  %v595_v4 = vld [vmem:[%s4784_s1 + $0x1000] sm:$0xff] }
 0x118   :  { %2054 = vmatpush.msrb.mxu0 %v567_v6  ;;  %2077 = vmatpush.msrb.mxu1 %v575_v7  ;;  %v603_v5 = vld [vmem:[%s4784_s1 + $0x1040] sm:$0xff]  ;;  %v634_v6 = vld [vmem:[%s4784_s1 + $0x1138] sm:$0xff] }
 0x119   :  { %2103 = vmatpush.msrb.mxu2 %v580_v8  ;;  %2126 = vmatpush.msrb.mxu3 %v588_v9  ;;  %v642_v7 = vld [vmem:[%s4784_s1 + $0x1178] sm:$0xff] }
 0x11a   :  { %2055 = vmatpush.msrb.mxu0 %v566_v10  ;;  %2078 = vmatpush.msrb.mxu1 %v574_v11  ;;  %v647_v10 = vld [vmem:[%s4784_s1 + $0x11a0] sm:$0xff] }
 0x11b   :  { %2104 = vmatpush.msrb.mxu2 %v579_v12  ;;  %2127 = vmatpush.msrb.mxu3 %v587_v13  ;;  %v655_v11 = vld [vmem:[%s4784_s1 + $0x11e0] sm:$0xff] }
 0x11c   :  { %2451 = vmatmul.msk.f32.vlgmr.msra.gmra.mxu2 %vm659_vm0, %v69_v14  ;;  %2452 = vmatmul.msk.f32.vlgmr.msra.gmra.mxu3 %vm659_vm0, %v70_v15  ;;  %v77_v14 = vld [vmem:[%s4785_s0 + $0x84] sm:$0x3]  ;;  %v78_v15 = vld [vmem:[%s4785_s0 + $0x86] sm:$0x3] }
 0x11d   :  { %2189 = vmatpush.msra.mxu2 %v618_v16  ;;  %2212 = vmatpush.msra.mxu3 %v626_v17  ;;  %v633_v16 = vld [vmem:[%s4784_s1 + $0x1130] sm:$0xff] }
 0x11e   :  { %2056 = vmatpush.msrb.mxu0 %v565_v18  ;;  %2079 = vmatpush.msrb.mxu1 %v573_v19  ;;  %v641_v17 = vld [vmem:[%s4784_s1 + $0x1170] sm:$0xff]  ;;  %v646_v18 = vld [vmem:[%s4784_s1 + $0x1198] sm:$0xff] }
 0x11f   :  { %2190 = vmatpush.msra.mxu2 %v617_v20  ;;  %2213 = vmatpush.msra.mxu3 %v625_v21  ;;  %v654_v19 = vld [vmem:[%s4784_s1 + $0x11d8] sm:$0xff]  ;;  %v632_v20 = vld [vmem:[%s4784_s1 + $0x1128] sm:$0xff] }
 0x120   :  { %2057 = vmatpush.msrb.mxu0 %v564_v22  ;;  %2080 = vmatpush.msrb.mxu1 %v572_v23  ;;  %v640_v21 = vld [vmem:[%s4784_s1 + $0x1168] sm:$0xff]  ;;  %v645_v22 = vld [vmem:[%s4784_s1 + $0x1190] sm:$0xff] }
 0x121   :  { %2191 = vmatpush.msra.mxu2 %v616_v24  ;;  %2214 = vmatpush.msra.mxu3 %v624_v25  ;;  %v1370_v32 = vpop.f32.mrf.mxu2  ;;  %v1393_v33 = vpop.f32.mrf.mxu3  ;;  %v653_v23 = vld [vmem:[%s4784_s1 + $0x11d0] sm:$0xff]  ;;  %v631_v24 = vld [vmem:[%s4784_s1 + $0x1120] sm:$0xff] }
 0x122   :  { %2058 = vmatpush.msrb.mxu0 %v563_v26  ;;  %2081 = vmatpush.msrb.mxu1 %v571_v27  ;;  %v1324_v36 = vpop.f32.mrf.mxu0  ;;  %v1347_v37 = vpop.f32.mrf.mxu1  ;;  %2347 = vst.msk [vmem:[%s4786_s2 + $0x3c] sm:$0x3] %vm2316_vm1, %v1370_v32  ;;  %v639_v25 = vld [vmem:[%s4784_s1 + $0x1160] sm:$0xff]  ;;  %v644_v26 = vld [vmem:[%s4784_s1 + $0x1188] sm:$0xff] }
 0x123   :  { %2449 = vmatmul.msk.f32.vlgmr.msra.gmra.mxu0 %vm659_vm0, %v67_v28  ;;  %2450 = vmatmul.msk.f32.vlgmr.msra.gmra.mxu1 %vm659_vm0, %v68_v29  ;;  %2345 = vst.msk [vmem:[%s4786_s2 + $0x38] sm:$0x3] %vm2316_vm1, %v1324_v36  ;;  %v652_v27 = vld [vmem:[%s4784_s1 + $0x11c8] sm:$0xff]  ;;  %v75_v28 = vld [vmem:[%s4785_s0 + $0x80] sm:$0x3]  ;;  %v629_v36 = vld [vmem:[%s4784_s1 + $0x1110] sm:$0xff] }
 0x124   :  { %2143 = vmatpush.msra.mxu0 %v602_v30  ;;  %2166 = vmatpush.msra.mxu1 %v610_v31  ;;  %2346 = vst.msk [vmem:[%s4786_s2 + $0x3a] sm:$0x3] %vm2316_vm1, %v1347_v37  ;;  %v76_v29 = vld [vmem:[%s4785_s0 + $0x82] sm:$0x3]  ;;  %v630_v30 = vld [vmem:[%s4784_s1 + $0x1118] sm:$0xff]  ;;  %v637_v37 = vld [vmem:[%s4784_s1 + $0x1150] sm:$0xff] }
 0x125   :  { %2192 = vmatpush.msra.mxu2 %v615_v34  ;;  %2215 = vmatpush.msra.mxu3 %v623_v35  ;;  %2348 = vst.msk [vmem:[%s4786_s2 + $0x3e] sm:$0x3] %vm2316_vm1, %v1393_v33  ;;  %v638_v31 = vld [vmem:[%s4784_s1 + $0x1158] sm:$0xff]  ;;  %v643_v32 = vld [vmem:[%s4784_s1 + $0x1180] sm:$0xff]  ;;  %v81_v34 = vld [vmem:[%s4785_s0 + $0x8c] sm:$0x3] }
 0x126   :  { %2144 = vmatpush.msra.mxu0 %v601_v38  ;;  %2167 = vmatpush.msra.mxu1 %v609_v39  ;;  %v651_v33 = vld [vmem:[%s4784_s1 + $0x11c0] sm:$0xff]  ;;  %v82_v35 = vld [vmem:[%s4785_s0 + $0x8e] sm:$0x3] }
 0x127   :  { %2193 = vmatpush.msra.mxu2 %v614_v40  ;;  %2216 = vmatpush.msra.mxu3 %v622_v41  ;;  %v628_v38 = vld [vmem:[%s4784_s1 + $0x1108] sm:$0xff]  ;;  %v627_v40 = vld [vmem:[%s4784_s1 + $0x1100] sm:$0xff] }
 0x128   :  { %2145 = vmatpush.msra.mxu0 %v600_v42  ;;  %2168 = vmatpush.msra.mxu1 %v608_v43  ;;  %v636_v39 = vld [vmem:[%s4784_s1 + $0x1148] sm:$0xff]  ;;  %v635_v41 = vld [vmem:[%s4784_s1 + $0x1140] sm:$0xff] }
 0x129   :  { %2194 = vmatpush.msra.mxu2 %v613_v44  ;;  %2217 = vmatpush.msra.mxu3 %v621_v45  ;;  %v79_v42 = vld [vmem:[%s4785_s0 + $0x88] sm:$0x3]  ;;  %v80_v43 = vld [vmem:[%s4785_s0 + $0x8a] sm:$0x3] }
 0x12a   :  { %2146 = vmatpush.msra.mxu0 %v599_v46  ;;  %2169 = vmatpush.msra.mxu1 %v607_v47 }
 0x12b   :  { %2195 = vmatpush.msra.mxu2 %v612_v48  ;;  %2218 = vmatpush.msra.mxu3 %v620_v49 }
 0x12c   :  { %2455 = vmatmul.msk.f32.vlgmr.msrb.gmra.mxu2 %vm659_vm0, %v73_v50  ;;  %2456 = vmatmul.msk.f32.vlgmr.msrb.gmra.mxu3 %vm659_vm0, %v74_v51 }
 0x12d   :  { %2147 = vmatpush.msra.mxu0 %v598_v52  ;;  %2170 = vmatpush.msra.mxu1 %v606_v53 }
 0x12e   :  { %2196 = vmatpush.msra.mxu2 %v611_v54  ;;  %2219 = vmatpush.msra.mxu3 %v619_v55 }
 0x12f   :  { %2148 = vmatpush.msra.mxu0 %v597_v58  ;;  %2171 = vmatpush.msra.mxu1 %v605_v59 }
 0x130   :  { %2281 = vmatpush.msrb.mxu2 %v650_v56  ;;  %2304 = vmatpush.msrb.mxu3 %v658_v57 }
 0x131   :  { %2149 = vmatpush.msra.mxu0 %v596_v62  ;;  %2172 = vmatpush.msra.mxu1 %v604_v63 }
 0x132   :  { %2282 = vmatpush.msrb.mxu2 %v649_v60  ;;  %2305 = vmatpush.msrb.mxu3 %v657_v61 }
 0x133   :  { %v1462_v8 = vpop.f32.mrf.mxu2  ;;  %v1485_v9 = vpop.f32.mrf.mxu3  ;;  %2453 = vmatmul.msk.f32.vlgmr.msrb.gmra.mxu0 %vm659_vm0, %v71_v2  ;;  %2454 = vmatmul.msk.f32.vlgmr.msrb.gmra.mxu1 %vm659_vm0, %v72_v3 }
 0x134   :  { %2283 = vmatpush.msrb.mxu2 %v648_v0  ;;  %2306 = vmatpush.msrb.mxu3 %v656_v1  ;;  %v1416_v12 = vpop.f32.mrf.mxu0  ;;  %v1439_v13 = vpop.f32.mrf.mxu1  ;;  %2351 = vst.msk [vmem:[%s4786_s2 + $0x44] sm:$0x3] %vm2316_vm1, %v1462_v8 }
 0x135   :  { %2150 = vmatpush.msra.mxu0 %v595_v4  ;;  %2173 = vmatpush.msra.mxu1 %v603_v5  ;;  %2349 = vst.msk [vmem:[%s4786_s2 + $0x40] sm:$0x3] %vm2316_vm1, %v1416_v12 }
 0x136   :  { %2350 = vst.msk [vmem:[%s4786_s2 + $0x42] sm:$0x3] %vm2316_vm1, %v1439_v13  ;;  %2284 = vmatpush.msrb.mxu2 %v647_v10  ;;  %2307 = vmatpush.msrb.mxu3 %v655_v11 }
 0x137   :  { %2235 = vmatpush.msrb.mxu0 %v634_v6  ;;  %2258 = vmatpush.msrb.mxu1 %v642_v7  ;;  %2352 = vst.msk [vmem:[%s4786_s2 + $0x46] sm:$0x3] %vm2316_vm1, %v1485_v9 }
 0x138   :  { %2459 = vmatmul.msk.f32.vlgmr.msra.gmra.mxu2 %vm659_vm0, %v77_v14  ;;  %2460 = vmatmul.msk.f32.vlgmr.msra.gmra.mxu3 %vm659_vm0, %v78_v15 }
 0x139   :  { %2236 = vmatpush.msrb.mxu0 %v633_v16  ;;  %2259 = vmatpush.msrb.mxu1 %v641_v17 }
 0x13a   :  { %2285 = vmatpush.msrb.mxu2 %v646_v18  ;;  %2308 = vmatpush.msrb.mxu3 %v654_v19 }
 0x13b   :  { %2237 = vmatpush.msrb.mxu0 %v632_v20  ;;  %2260 = vmatpush.msrb.mxu1 %v640_v21 }
 0x13c   :  { %2286 = vmatpush.msrb.mxu2 %v645_v22  ;;  %2309 = vmatpush.msrb.mxu3 %v653_v23 }
 0x13d   :  { %2238 = vmatpush.msrb.mxu0 %v631_v24  ;;  %2261 = vmatpush.msrb.mxu1 %v639_v25 }
 0x13e   :  { %2287 = vmatpush.msrb.mxu2 %v644_v26  ;;  %2310 = vmatpush.msrb.mxu3 %v652_v27 }
 0x13f   :  { %2457 = vmatmul.msk.f32.vlgmr.msra.gmra.mxu0 %vm659_vm0, %v75_v28  ;;  %2458 = vmatmul.msk.f32.vlgmr.msra.gmra.mxu1 %vm659_vm0, %v76_v29 }
 0x140   :  { %2239 = vmatpush.msrb.mxu0 %v630_v30  ;;  %2262 = vmatpush.msrb.mxu1 %v638_v31 }
 0x141   :  { %2288 = vmatpush.msrb.mxu2 %v643_v32  ;;  %2311 = vmatpush.msrb.mxu3 %v651_v33 }
 0x142   :  { %2463 = vmatmul.msk.f32.vlgmr.msrb.gmra.mxu2 %vm659_vm0, %v81_v34  ;;  %2464 = vmatmul.msk.f32.vlgmr.msrb.gmra.mxu3 %vm659_vm0, %v82_v35 }
 0x143   :  { %2240 = vmatpush.msrb.mxu0 %v629_v36  ;;  %2263 = vmatpush.msrb.mxu1 %v637_v37 }
 0x145   :  { %2241 = vmatpush.msrb.mxu0 %v628_v38  ;;  %2264 = vmatpush.msrb.mxu1 %v636_v39  ;;  %v1554_v44 = vpop.f32.mrf.mxu2  ;;  %v1577_v45 = vpop.f32.mrf.mxu3 }
 0x146   :  { %v1508_v46 = vpop.f32.mrf.mxu0  ;;  %v1531_v47 = vpop.f32.mrf.mxu1  ;;  %2355 = vst.msk [vmem:[%s4786_s2 + $0x4c] sm:$0x3] %vm2316_vm1, %v1554_v44 }
 0x147   :  { %2242 = vmatpush.msrb.mxu0 %v627_v40  ;;  %2265 = vmatpush.msrb.mxu1 %v635_v41  ;;  %2353 = vst.msk [vmem:[%s4786_s2 + $0x48] sm:$0x3] %vm2316_vm1, %v1508_v46 }
 0x148   :  { %2461 = vmatmul.msk.f32.vlgmr.msrb.gmra.mxu0 %vm659_vm0, %v79_v42  ;;  %2462 = vmatmul.msk.f32.vlgmr.msrb.gmra.mxu1 %vm659_vm0, %v80_v43  ;;  %2354 = vst.msk [vmem:[%s4786_s2 + $0x4a] sm:$0x3] %vm2316_vm1, %v1531_v47 }
 0x149   :  { %2356 = vst.msk [vmem:[%s4786_s2 + $0x4e] sm:$0x3] %vm2316_vm1, %v1577_v45 }
 0x157   :  { %v1646_v48 = vpop.f32.mrf.mxu2  ;;  %v1669_v49 = vpop.f32.mrf.mxu3 }
 0x158   :  { %v1600_v50 = vpop.f32.mrf.mxu0  ;;  %v1623_v51 = vpop.f32.mrf.mxu1  ;;  %2359 = vst.msk [vmem:[%s4786_s2 + $0x54] sm:$0x3] %vm2316_vm1, %v1646_v48 }
 0x159   :  { %2357 = vst.msk [vmem:[%s4786_s2 + $0x50] sm:$0x3] %vm2316_vm1, %v1600_v50 }
 0x15a   :  { %2358 = vst.msk [vmem:[%s4786_s2 + $0x52] sm:$0x3] %vm2316_vm1, %v1623_v51 }
 0x15b   :  { %2360 = vst.msk [vmem:[%s4786_s2 + $0x56] sm:$0x3] %vm2316_vm1, %v1669_v49 }
 0x169   :  { %v1738_v52 = vpop.f32.mrf.mxu2  ;;  %v1761_v53 = vpop.f32.mrf.mxu3 }
 0x16a   :  { %v1692_v54 = vpop.f32.mrf.mxu0  ;;  %v1715_v55 = vpop.f32.mrf.mxu1  ;;  %2363 = vst.msk [vmem:[%s4786_s2 + $0x5c] sm:$0x3] %vm2316_vm1, %v1738_v52 }
 0x16b   :  { %2361 = vst.msk [vmem:[%s4786_s2 + $0x58] sm:$0x3] %vm2316_vm1, %v1692_v54 }
 0x16c   :  { %2362 = vst.msk [vmem:[%s4786_s2 + $0x5a] sm:$0x3] %vm2316_vm1, %v1715_v55 }
 0x16d   :  { %2364 = vst.msk [vmem:[%s4786_s2 + $0x5e] sm:$0x3] %vm2316_vm1, %v1761_v53 }
 0x17b   :  { %v1830_v56 = vpop.f32.mrf.mxu2  ;;  %v1853_v57 = vpop.f32.mrf.mxu3 }
 0x17c   :  { %v1784_v58 = vpop.f32.mrf.mxu0  ;;  %v1807_v59 = vpop.f32.mrf.mxu1  ;;  %2367 = vst.msk [vmem:[%s4786_s2 + $0x64] sm:$0x3] %vm2316_vm1, %v1830_v56 }
 0x17d   :  { %2365 = vst.msk [vmem:[%s4786_s2 + $0x60] sm:$0x3] %vm2316_vm1, %v1784_v58 }
 0x17e   :  { %2366 = vst.msk [vmem:[%s4786_s2 + $0x62] sm:$0x3] %vm2316_vm1, %v1807_v59 }
 0x17f   :  { %2368 = vst.msk [vmem:[%s4786_s2 + $0x66] sm:$0x3] %vm2316_vm1, %v1853_v57 }
 0x18d   :  { %v1922_v60 = vpop.f32.mrf.mxu2  ;;  %v1945_v61 = vpop.f32.mrf.mxu3 }
 0x18e   :  { %v1876_v62 = vpop.f32.mrf.mxu0  ;;  %v1899_v63 = vpop.f32.mrf.mxu1  ;;  %2371 = vst.msk [vmem:[%s4786_s2 + $0x6c] sm:$0x3] %vm2316_vm1, %v1922_v60 }
 0x18f   :  { %2369 = vst.msk [vmem:[%s4786_s2 + $0x68] sm:$0x3] %vm2316_vm1, %v1876_v62 }
 0x190   :  { %2370 = vst.msk [vmem:[%s4786_s2 + $0x6a] sm:$0x3] %vm2316_vm1, %v1899_v63 }
 0x191   :  { %2372 = vst.msk [vmem:[%s4786_s2 + $0x6e] sm:$0x3] %vm2316_vm1, %v1945_v61 }
 0x19f   :  { %v2014_v0 = vpop.f32.mrf.mxu2  ;;  %v2037_v1 = vpop.f32.mrf.mxu3 }
 0x1a0   :  { %v1968_v2 = vpop.f32.mrf.mxu0  ;;  %v1991_v3 = vpop.f32.mrf.mxu1  ;;  %2375 = vst.msk [vmem:[%s4786_s2 + $0x74] sm:$0x3] %vm2316_vm1, %v2014_v0 }
 0x1a1   :  { %2373 = vst.msk [vmem:[%s4786_s2 + $0x70] sm:$0x3] %vm2316_vm1, %v1968_v2 }
 0x1a2   :  { %2374 = vst.msk [vmem:[%s4786_s2 + $0x72] sm:$0x3] %vm2316_vm1, %v1991_v3 }
 0x1a3   :  { %2376 = vst.msk [vmem:[%s4786_s2 + $0x76] sm:$0x3] %vm2316_vm1, %v2037_v1 }
 0x1af   :  { %v2106_v4 = vpop.f32.mrf.mxu2  ;;  %v2129_v5 = vpop.f32.mrf.mxu3 }
 0x1b0   :  { %2379 = vst.msk [vmem:[%s4786_s2 + $0x7c] sm:$0x3] %vm2316_vm1, %v2106_v4  ;;  %v2060_v6 = vpop.f32.mrf.mxu0  ;;  %v2083_v7 = vpop.f32.mrf.mxu1 }
 0x1b1   :  { %2380 = vst.msk [vmem:[%s4786_s2 + $0x7e] sm:$0x3] %vm2316_vm1, %v2129_v5 }
 0x1b2   :  { %2377 = vst.msk [vmem:[%s4786_s2 + $0x78] sm:$0x3] %vm2316_vm1, %v2060_v6 }
 0x1b3   :  { %2378 = vst.msk [vmem:[%s4786_s2 + $0x7a] sm:$0x3] %vm2316_vm1, %v2083_v7 }
 0x1bb   :  { %v2198_v8 = vpop.f32.mrf.mxu2  ;;  %v2221_v9 = vpop.f32.mrf.mxu3 }
 0x1bc   :  { %v2152_v10 = vpop.f32.mrf.mxu0  ;;  %v2175_v11 = vpop.f32.mrf.mxu1  ;;  %2383 = vst.msk [vmem:[%s4786_s2 + $0x84] sm:$0x3] %vm2316_vm1, %v2198_v8 }
 0x1bd   :  { %2381 = vst.msk [vmem:[%s4786_s2 + $0x80] sm:$0x3] %vm2316_vm1, %v2152_v10 }
 0x1be   :  { %2382 = vst.msk [vmem:[%s4786_s2 + $0x82] sm:$0x3] %vm2316_vm1, %v2175_v11 }
 0x1bf   :  { %2384 = vst.msk [vmem:[%s4786_s2 + $0x86] sm:$0x3] %vm2316_vm1, %v2221_v9 }
 0x1c5   :  { %v2244_v12 = vpop.f32.mrf.mxu0  ;;  %v2267_v13 = vpop.f32.mrf.mxu1 }
 0x1c6   :  { %2385 = vst.msk [vmem:[%s4786_s2 + $0x88] sm:$0x3] %vm2316_vm1, %v2244_v12  ;;  %v2290_v14 = vpop.f32.mrf.mxu2  ;;  %v2313_v15 = vpop.f32.mrf.mxu3 }
 0x1c7   :  { %2386 = vst.msk [vmem:[%s4786_s2 + $0x8a] sm:$0x3] %vm2316_vm1, %v2267_v13 }
 0x1c8   :  { %2387 = vst.msk [vmem:[%s4786_s2 + $0x8c] sm:$0x3] %vm2316_vm1, %v2290_v14 }
 0x1c9   :  { %2388 = vst.msk [vmem:[%s4786_s2 + $0x8e] sm:$0x3] %vm2316_vm1, %v2313_v15 }

// kernel: reverse.4
= control target key start
LH: loop header
LB: loop body
LE: loop exit
PB: predicated region body
PF: predicated region fallthrough
CT: control target
= control target key end

     0   :  { %s344_s0 = inlined_call_operand.vmem [shape: f32[2,32,16,7], index: 0, kind: input, shape index: {}]   ;;  %s345_s1 = inlined_call_operand.vmem [shape: f32[2,32,16,7], index: 1, kind: output, shape index: {}]  }
   0x1   :  { %v112_v0 = vld [vmem:[%s344_s0 + $0x60] sm:$0xff]  ;;  %v113_v1 = vld [vmem:[%s344_s0 + $0xd0] sm:$0xff]  ;;  %v138_v14 = vld [vmem:[%s344_s0 + $0x68] sm:$0xff] }
   0x2   :  { %v115_v2 = vld [vmem:[%s344_s0 + $0x50] sm:$0xff]  ;;  %4 = vst [vmem:[%s345_s1] sm:$0xff] %v112_v0  ;;  %v117_v3 = vld [vmem:[%s344_s0 + $0xc0] sm:$0xff]  ;;  %v140_v15 = vld [vmem:[%s344_s0 + $0xd8] sm:$0xff] }
   0x3   :  { %114 = vst [vmem:[%s345_s1 + $0x70] sm:$0xff] %v113_v1  ;;  %v119_v4 = vld [vmem:[%s344_s0 + $0x40] sm:$0xff]  ;;  %v121_v5 = vld [vmem:[%s344_s0 + $0xb0] sm:$0xff]  ;;  %v142_v16 = vld [vmem:[%s344_s0 + $0x58] sm:$0xff] }
   0x4   :  { %116 = vst [vmem:[%s345_s1 + $0x10] sm:$0xff] %v115_v2  ;;  %v123_v6 = vld [vmem:[%s344_s0 + $0x30] sm:$0xff]  ;;  %v125_v7 = vld [vmem:[%s344_s0 + $0xa0] sm:$0xff]  ;;  %v144_v17 = vld [vmem:[%s344_s0 + $0xc8] sm:$0xff] }
   0x5   :  { %118 = vst [vmem:[%s345_s1 + $0x80] sm:$0xff] %v117_v3  ;;  %v127_v8 = vld [vmem:[%s344_s0 + $0x20] sm:$0xff]  ;;  %v129_v9 = vld [vmem:[%s344_s0 + $0x90] sm:$0xff]  ;;  %v146_v18 = vld [vmem:[%s344_s0 + $0x48] sm:$0xff] }
   0x6   :  { %120 = vst [vmem:[%s345_s1 + $0x20] sm:$0xff] %v119_v4  ;;  %v131_v10 = vld [vmem:[%s344_s0 + $0x10] sm:$0xff]  ;;  %v133_v11 = vld [vmem:[%s344_s0 + $0x80] sm:$0xff]  ;;  %v148_v19 = vld [vmem:[%s344_s0 + $0xb8] sm:$0xff] }
   0x7   :  { %122 = vst [vmem:[%s345_s1 + $0x90] sm:$0xff] %v121_v5  ;;  %v49_v12 = vld [vmem:[%s344_s0] sm:$0xff]  ;;  %v136_v13 = vld [vmem:[%s344_s0 + $0x70] sm:$0xff]  ;;  %v150_v20 = vld [vmem:[%s344_s0 + $0x38] sm:$0xff] }
   0x8   :  { %124 = vst [vmem:[%s345_s1 + $0x30] sm:$0xff] %v123_v6  ;;  %v152_v21 = vld [vmem:[%s344_s0 + $0xa8] sm:$0xff]  ;;  %v156_v23 = vld [vmem:[%s344_s0 + $0x98] sm:$0xff] }
   0x9   :  { %126 = vst [vmem:[%s345_s1 + $0xa0] sm:$0xff] %v125_v7  ;;  %v154_v22 = vld [vmem:[%s344_s0 + $0x28] sm:$0xff]  ;;  %v158_v24 = vld [vmem:[%s344_s0 + $0x18] sm:$0xff] }
   0xa   :  { %128 = vst [vmem:[%s345_s1 + $0x40] sm:$0xff] %v127_v8  ;;  %v160_v25 = vld [vmem:[%s344_s0 + $0x88] sm:$0xff]  ;;  %v164_v27 = vld [vmem:[%s344_s0 + $0x78] sm:$0xff] }
   0xb   :  { %130 = vst [vmem:[%s345_s1 + $0xb0] sm:$0xff] %v129_v9  ;;  %v162_v26 = vld [vmem:[%s344_s0 + $0x8] sm:$0xff] }
   0xc   :  { %132 = vst [vmem:[%s345_s1 + $0x50] sm:$0xff] %v131_v10 }
   0xd   :  { %134 = vst [vmem:[%s345_s1 + $0xc0] sm:$0xff] %v133_v11 }
   0xe   :  { %135 = vst [vmem:[%s345_s1 + $0x60] sm:$0xff] %v49_v12 }
   0xf   :  { %137 = vst [vmem:[%s345_s1 + $0xd0] sm:$0xff] %v136_v13 }
  0x10   :  { %139 = vst [vmem:[%s345_s1 + $0x8] sm:$0xff] %v138_v14 }
  0x11   :  { %141 = vst [vmem:[%s345_s1 + $0x78] sm:$0xff] %v140_v15 }
  0x12   :  { %143 = vst [vmem:[%s345_s1 + $0x18] sm:$0xff] %v142_v16 }
  0x13   :  { %145 = vst [vmem:[%s345_s1 + $0x88] sm:$0xff] %v144_v17 }
  0x14   :  { %147 = vst [vmem:[%s345_s1 + $0x28] sm:$0xff] %v146_v18 }
  0x15   :  { %149 = vst [vmem:[%s345_s1 + $0x98] sm:$0xff] %v148_v19 }
  0x16   :  { %151 = vst [vmem:[%s345_s1 + $0x38] sm:$0xff] %v150_v20 }
  0x17   :  { %153 = vst [vmem:[%s345_s1 + $0xa8] sm:$0xff] %v152_v21 }
  0x18   :  { %155 = vst [vmem:[%s345_s1 + $0x48] sm:$0xff] %v154_v22 }
  0x19   :  { %157 = vst [vmem:[%s345_s1 + $0xb8] sm:$0xff] %v156_v23 }
  0x1a   :  { %159 = vst [vmem:[%s345_s1 + $0x58] sm:$0xff] %v158_v24 }
  0x1b   :  { %161 = vst [vmem:[%s345_s1 + $0xc8] sm:$0xff] %v160_v25 }
  0x1c   :  { %163 = vst [vmem:[%s345_s1 + $0x68] sm:$0xff] %v162_v26 }
  0x1d   :  { %165 = vst [vmem:[%s345_s1 + $0xd8] sm:$0xff] %v164_v27 }

// kernel: fno2d_forward.8
= control target key start
LH: loop header
LB: loop body
LE: loop exit
PB: predicated region body
PF: predicated region fallthrough
CT: control target
= control target key end

     0   :  { %s473_s2 = inlined_call_operand.vmem [shape: f32[128,128], index: 2, kind: input, shape index: {}]   ;;  %s474_s3 = inlined_call_operand.vmem [shape: f32[1,128], index: 3, kind: input, shape index: {}]   ;;  %s475_s0 = inlined_call_operand.vmem [shape: f32[128,128], index: 0, kind: input, shape index: {}]   ;;  %s476_s1 = inlined_call_operand.vmem [shape: f32[128,128], index: 1, kind: input, shape index: {}]   ;;  %s477_s4 = inlined_call_operand.vmem [shape: f32[128,128], index: 4, kind: output, shape index: {}]  }
   0x1   :  { %v48_v0 = vld [vmem:[%s473_s2 + $0x78] sm:$0xff]  ;;  %v47_v1 = vld [vmem:[%s473_s2 + $0x70] sm:$0xff]  ;;  %v46_v2 = vld [vmem:[%s473_s2 + $0x68] sm:$0xff] }
   0x2   :  { %187 = vmatpush.msra.mxu2 %v48_v0  ;;  %188 = vmatpush.msra.mxu3 %v48_v0  ;;  %v45_v3 = vld [vmem:[%s473_s2 + $0x60] sm:$0xff]  ;;  %v44_v4 = vld [vmem:[%s473_s2 + $0x58] sm:$0xff]  ;;  %v43_v5 = vld [vmem:[%s473_s2 + $0x50] sm:$0xff] }
   0x3   :  { %53 = vmatpush.msra.mxu0 %v48_v0  ;;  %186 = vmatpush.msra.mxu1 %v48_v0  ;;  %v42_v6 = vld [vmem:[%s473_s2 + $0x48] sm:$0xff]  ;;  %v41_v7 = vld [vmem:[%s473_s2 + $0x40] sm:$0xff]  ;;  %v40_v8 = vld [vmem:[%s473_s2 + $0x38] sm:$0xff] }
   0x4   :  { %190 = vmatpush.msra.mxu2 %v47_v1  ;;  %191 = vmatpush.msra.mxu3 %v47_v1  ;;  %v39_v9 = vld [vmem:[%s473_s2 + $0x30] sm:$0xff]  ;;  %v38_v10 = vld [vmem:[%s473_s2 + $0x28] sm:$0xff]  ;;  %v37_v11 = vld [vmem:[%s473_s2 + $0x20] sm:$0xff] }
   0x5   :  { %54 = vmatpush.msra.mxu0 %v47_v1  ;;  %189 = vmatpush.msra.mxu1 %v47_v1  ;;  %v36_v12 = vld [vmem:[%s473_s2 + $0x18] sm:$0xff]  ;;  %v35_v13 = vld [vmem:[%s473_s2 + $0x10] sm:$0xff]  ;;  %v34_v14 = vld [vmem:[%s473_s2 + $0x8] sm:$0xff] }
   0x6   :  { %193 = vmatpush.msra.mxu2 %v46_v2  ;;  %194 = vmatpush.msra.mxu3 %v46_v2  ;;  %v33_v15 = vld [vmem:[%s473_s2] sm:$0xff]  ;;  %v26_v20 = vld [vmem:[%s475_s0 + $0x48] sm:$0xff]  ;;  %v27_v24 = vld [vmem:[%s475_s0 + $0x50] sm:$0xff] }
   0x7   :  { %55 = vmatpush.msra.mxu0 %v46_v2  ;;  %192 = vmatpush.msra.mxu1 %v46_v2  ;;  %v25_v16 = vld [vmem:[%s475_s0 + $0x40] sm:$0xff]  ;;  %v30_v21 = vld [vmem:[%s475_s0 + $0x68] sm:$0xff]  ;;  %v31_v25 = vld [vmem:[%s475_s0 + $0x70] sm:$0xff] }
   0x8   :  { %196 = vmatpush.msra.mxu2 %v45_v3  ;;  %197 = vmatpush.msra.mxu3 %v45_v3  ;;  %v29_v17 = vld [vmem:[%s475_s0 + $0x60] sm:$0xff]  ;;  %v18_v22 = vld [vmem:[%s475_s0 + $0x8] sm:$0xff]  ;;  %v19_v26 = vld [vmem:[%s475_s0 + $0x10] sm:$0xff] }
   0x9   :  { %56 = vmatpush.msra.mxu0 %v45_v3  ;;  %195 = vmatpush.msra.mxu1 %v45_v3  ;;  %v17_v18 = vld [vmem:[%s475_s0] sm:$0xff]  ;;  %v22_v23 = vld [vmem:[%s475_s0 + $0x28] sm:$0xff]  ;;  %v23_v27 = vld [vmem:[%s475_s0 + $0x30] sm:$0xff] }
   0xa   :  { %199 = vmatpush.msra.mxu2 %v44_v4  ;;  %200 = vmatpush.msra.mxu3 %v44_v4  ;;  %v21_v19 = vld [vmem:[%s475_s0 + $0x20] sm:$0xff]  ;;  %v28_v28 = vld [vmem:[%s475_s0 + $0x58] sm:$0xff]  ;;  %v119_v52 = vld [vmem:[%s476_s1 + $0x8] sm:$0xff] }
   0xb   :  { %57 = vmatpush.msra.mxu0 %v44_v4  ;;  %198 = vmatpush.msra.mxu1 %v44_v4  ;;  %v32_v29 = vld [vmem:[%s475_s0 + $0x78] sm:$0xff]  ;;  %v359_v32 = vld [vmem:[%s474_s3] ss:$0 sm:$0xff]  ;;  %v123_v54 = vld [vmem:[%s476_s1 + $0x28] sm:$0xff] }
   0xc   :  { %202 = vmatpush.msra.mxu2 %v43_v5  ;;  %203 = vmatpush.msra.mxu3 %v43_v5  ;;  %v20_v30 = vld [vmem:[%s475_s0 + $0x18] sm:$0xff]  ;;  %v118_v34 = vld [vmem:[%s476_s1] sm:$0xff]  ;;  %v127_v62 = vld [vmem:[%s476_s1 + $0x48] sm:$0xff] }
   0xd   :  { %58 = vmatpush.msra.mxu0 %v43_v5  ;;  %201 = vmatpush.msra.mxu1 %v43_v5  ;;  %v24_v31 = vld [vmem:[%s475_s0 + $0x38] sm:$0xff]  ;;  %v122_v36 = vld [vmem:[%s476_s1 + $0x20] sm:$0xff]  ;;  %v131_v0 = vld [vmem:[%s476_s1 + $0x68] sm:$0xff] }
   0xe   :  { %205 = vmatpush.msra.mxu2 %v42_v6  ;;  %206 = vmatpush.msra.mxu3 %v42_v6  ;;  %v126_v42 = vld [vmem:[%s476_s1 + $0x40] sm:$0xff] }
   0xf   :  { %59 = vmatpush.msra.mxu0 %v42_v6  ;;  %204 = vmatpush.msra.mxu1 %v42_v6  ;;  %v130_v44 = vld [vmem:[%s476_s1 + $0x60] sm:$0xff] }
  0x10   :  { %208 = vmatpush.msra.mxu2 %v41_v7  ;;  %209 = vmatpush.msra.mxu3 %v41_v7 }
  0x11   :  { %60 = vmatpush.msra.mxu0 %v41_v7  ;;  %207 = vmatpush.msra.mxu1 %v41_v7 }
  0x12   :  { %211 = vmatpush.msra.mxu2 %v40_v8  ;;  %212 = vmatpush.msra.mxu3 %v40_v8 }
  0x13   :  { %61 = vmatpush.msra.mxu0 %v40_v8  ;;  %210 = vmatpush.msra.mxu1 %v40_v8  ;;  %v120_v8 = vld [vmem:[%s476_s1 + $0x10] sm:$0xff] }
  0x14   :  { %214 = vmatpush.msra.mxu2 %v39_v9  ;;  %215 = vmatpush.msra.mxu3 %v39_v9 }
  0x15   :  { %62 = vmatpush.msra.mxu0 %v39_v9  ;;  %213 = vmatpush.msra.mxu1 %v39_v9 }
  0x16   :  { %217 = vmatpush.msra.mxu2 %v38_v10  ;;  %218 = vmatpush.msra.mxu3 %v38_v10 }
  0x17   :  { %63 = vmatpush.msra.mxu0 %v38_v10  ;;  %216 = vmatpush.msra.mxu1 %v38_v10  ;;  %v124_v10 = vld [vmem:[%s476_s1 + $0x30] sm:$0xff] }
  0x18   :  { %220 = vmatpush.msra.mxu2 %v37_v11  ;;  %221 = vmatpush.msra.mxu3 %v37_v11 }
  0x19   :  { %64 = vmatpush.msra.mxu0 %v37_v11  ;;  %219 = vmatpush.msra.mxu1 %v37_v11 }
  0x1a   :  { %223 = vmatpush.msra.mxu2 %v36_v12  ;;  %224 = vmatpush.msra.mxu3 %v36_v12 }
  0x1b   :  { %65 = vmatpush.msra.mxu0 %v36_v12  ;;  %222 = vmatpush.msra.mxu1 %v36_v12 }
  0x1c   :  { %226 = vmatpush.msra.mxu2 %v35_v13  ;;  %227 = vmatpush.msra.mxu3 %v35_v13 }
  0x1d   :  { %66 = vmatpush.msra.mxu0 %v35_v13  ;;  %225 = vmatpush.msra.mxu1 %v35_v13 }
  0x1e   :  { %229 = vmatpush.msra.mxu2 %v34_v14  ;;  %230 = vmatpush.msra.mxu3 %v34_v14 }
  0x1f   :  { %67 = vmatpush.msra.mxu0 %v34_v14  ;;  %228 = vmatpush.msra.mxu1 %v34_v14 }
  0x20   :  { %232 = vmatpush.msra.mxu2 %v33_v15  ;;  %233 = vmatpush.msra.mxu3 %v33_v15 }
  0x21   :  { %93 = vmatmul.f32.vlgmr.msra.gmra.mxu2 %v25_v16  ;;  %105 = vmatmul.f32.vlgmr.msra.gmra.mxu3 %v29_v17 }
  0x22   :  { %68 = vmatpush.msra.mxu0 %v33_v15  ;;  %231 = vmatpush.msra.mxu1 %v33_v15 }
  0x23   :  { %69 = vmatmul.f32.vlgmr.msra.gmra.mxu0 %v17_v18  ;;  %81 = vmatmul.f32.vlgmr.msra.gmra.mxu1 %v21_v19  ;;  %v128_v18 = vld [vmem:[%s476_s1 + $0x50] sm:$0xff] }
  0x29   :  { %96 = vmatmul.f32.gmra.mxu2 %v26_v20  ;;  %108 = vmatmul.f32.gmra.mxu3 %v30_v21  ;;  %v132_v20 = vld [vmem:[%s476_s1 + $0x70] sm:$0xff] }
  0x2b   :  { %72 = vmatmul.f32.gmra.mxu0 %v18_v22  ;;  %84 = vmatmul.f32.gmra.mxu1 %v22_v23 }
  0x31   :  { %99 = vmatmul.f32.gmra.mxu2 %v27_v24  ;;  %111 = vmatmul.f32.gmra.mxu3 %v31_v25 }
  0x33   :  { %75 = vmatmul.f32.gmra.mxu0 %v19_v26  ;;  %87 = vmatmul.f32.gmra.mxu1 %v23_v27 }
  0x39   :  { %102 = vmatmul.f32.gmra.mxu2 %v28_v28  ;;  %114 = vmatmul.f32.gmra.mxu3 %v32_v29  ;;  %v121_v28 = vld [vmem:[%s476_s1 + $0x18] sm:$0xff] }
  0x3b   :  { %78 = vmatmul.f32.gmra.mxu0 %v20_v30  ;;  %90 = vmatmul.f32.gmra.mxu1 %v24_v31  ;;  %v125_v30 = vld [vmem:[%s476_s1 + $0x38] sm:$0xff] }
  0xa0   :  { %v70_v33 = vpop.f32.mrf.mxu0  ;;  %v82_v35 = vpop.f32.mrf.mxu1 }
  0xa1   :  { %v71_v37 = vadd.f32 %v359_v32, %v70_v33  ;;  %v83_v38 = vadd.f32 %v359_v32, %v82_v35 }
  0xa3   :  { %v134_v39 = vadd.f32 %v118_v34, %v71_v37  ;;  %v138_v40 = vadd.f32 %v122_v36, %v83_v38 }
  0xa4   :  { %v94_v41 = vpop.f32.mrf.mxu2  ;;  %v106_v43 = vpop.f32.mrf.mxu3 }
  0xa5   :  { %v150_v45 = vmax.f32 %v134_v39, 0.0  ;;  %v154_v46 = vmax.f32 %v138_v40, 0.0  ;;  %v95_v47 = vadd.f32 %v359_v32, %v94_v41  ;;  %v107_v48 = vadd.f32 %v359_v32, %v106_v43  ;;  %v129_v39 = vld [vmem:[%s476_s1 + $0x58] sm:$0xff] }
  0xa6   :  { %v133_v41 = vld [vmem:[%s476_s1 + $0x78] sm:$0xff] }
  0xa7   :  { %166 = vst [vmem:[%s477_s4] sm:$0xff] %v150_v45  ;;  %v142_v49 = vadd.f32 %v126_v42, %v95_v47  ;;  %v146_v50 = vadd.f32 %v130_v44, %v107_v48 }
  0xa8   :  { %170 = vst [vmem:[%s477_s4 + $0x20] sm:$0xff] %v154_v46  ;;  %v73_v51 = vpop.f32.mrf.mxu0  ;;  %v85_v53 = vpop.f32.mrf.mxu1 }
  0xa9   :  { %v158_v55 = vmax.f32 %v142_v49, 0.0  ;;  %v162_v56 = vmax.f32 %v146_v50, 0.0  ;;  %v74_v57 = vadd.f32 %v359_v32, %v73_v51  ;;  %v86_v58 = vadd.f32 %v359_v32, %v85_v53 }
  0xab   :  { %174 = vst [vmem:[%s477_s4 + $0x40] sm:$0xff] %v158_v55  ;;  %v135_v59 = vadd.f32 %v119_v52, %v74_v57  ;;  %v139_v60 = vadd.f32 %v123_v54, %v86_v58 }
  0xac   :  { %178 = vst [vmem:[%s477_s4 + $0x60] sm:$0xff] %v162_v56  ;;  %v97_v61 = vpop.f32.mrf.mxu2  ;;  %v109_v63 = vpop.f32.mrf.mxu3 }
  0xad   :  { %v151_v1 = vmax.f32 %v135_v59, 0.0  ;;  %v155_v2 = vmax.f32 %v139_v60, 0.0  ;;  %v98_v3 = vadd.f32 %v359_v32, %v97_v61  ;;  %v110_v4 = vadd.f32 %v359_v32, %v109_v63 }
  0xaf   :  { %167 = vst [vmem:[%s477_s4 + $0x8] sm:$0xff] %v151_v1  ;;  %v143_v5 = vadd.f32 %v127_v62, %v98_v3  ;;  %v147_v6 = vadd.f32 %v131_v0, %v110_v4 }
  0xb0   :  { %171 = vst [vmem:[%s477_s4 + $0x28] sm:$0xff] %v155_v2  ;;  %v76_v7 = vpop.f32.mrf.mxu0  ;;  %v88_v9 = vpop.f32.mrf.mxu1 }
  0xb1   :  { %v159_v11 = vmax.f32 %v143_v5, 0.0  ;;  %v163_v12 = vmax.f32 %v147_v6, 0.0  ;;  %v77_v13 = vadd.f32 %v359_v32, %v76_v7  ;;  %v89_v14 = vadd.f32 %v359_v32, %v88_v9 }
  0xb3   :  { %175 = vst [vmem:[%s477_s4 + $0x48] sm:$0xff] %v159_v11  ;;  %v136_v15 = vadd.f32 %v120_v8, %v77_v13  ;;  %v140_v16 = vadd.f32 %v124_v10, %v89_v14 }
  0xb4   :  { %179 = vst [vmem:[%s477_s4 + $0x68] sm:$0xff] %v163_v12  ;;  %v100_v17 = vpop.f32.mrf.mxu2  ;;  %v112_v19 = vpop.f32.mrf.mxu3 }
  0xb5   :  { %v152_v21 = vmax.f32 %v136_v15, 0.0  ;;  %v156_v22 = vmax.f32 %v140_v16, 0.0  ;;  %v101_v23 = vadd.f32 %v359_v32, %v100_v17  ;;  %v113_v24 = vadd.f32 %v359_v32, %v112_v19 }
  0xb7   :  { %168 = vst [vmem:[%s477_s4 + $0x10] sm:$0xff] %v152_v21  ;;  %v144_v25 = vadd.f32 %v128_v18, %v101_v23  ;;  %v148_v26 = vadd.f32 %v132_v20, %v113_v24 }
  0xb8   :  { %172 = vst [vmem:[%s477_s4 + $0x30] sm:$0xff] %v156_v22  ;;  %v79_v27 = vpop.f32.mrf.mxu0  ;;  %v91_v29 = vpop.f32.mrf.mxu1 }
  0xb9   :  { %v160_v31 = vmax.f32 %v144_v25, 0.0  ;;  %v164_v33 = vmax.f32 %v148_v26, 0.0  ;;  %v80_v34 = vadd.f32 %v359_v32, %v79_v27  ;;  %v92_v35 = vadd.f32 %v359_v32, %v91_v29 }
  0xbb   :  { %176 = vst [vmem:[%s477_s4 + $0x50] sm:$0xff] %v160_v31  ;;  %v137_v36 = vadd.f32 %v121_v28, %v80_v34  ;;  %v141_v37 = vadd.f32 %v125_v30, %v92_v35 }
  0xbc   :  { %180 = vst [vmem:[%s477_s4 + $0x70] sm:$0xff] %v164_v33  ;;  %v103_v38 = vpop.f32.mrf.mxu2  ;;  %v115_v40 = vpop.f32.mrf.mxu3 }
  0xbd   :  { %v153_v42 = vmax.f32 %v137_v36, 0.0  ;;  %v157_v43 = vmax.f32 %v141_v37, 0.0  ;;  %v104_v44 = vadd.f32 %v359_v32, %v103_v38  ;;  %v116_v45 = vadd.f32 %v359_v32, %v115_v40 }
  0xbf   :  { %169 = vst [vmem:[%s477_s4 + $0x18] sm:$0xff] %v153_v42  ;;  %v145_v46 = vadd.f32 %v129_v39, %v104_v44  ;;  %v149_v47 = vadd.f32 %v133_v41, %v116_v45 }
  0xc0   :  { %173 = vst [vmem:[%s477_s4 + $0x38] sm:$0xff] %v157_v43 }
  0xc1   :  { %v161_v48 = vmax.f32 %v145_v46, 0.0  ;;  %v165_v49 = vmax.f32 %v149_v47, 0.0 }
  0xc3   :  { %177 = vst [vmem:[%s477_s4 + $0x58] sm:$0xff] %v161_v48 }
  0xc4   :  { %181 = vst [vmem:[%s477_s4 + $0x78] sm:$0xff] %v165_v49 }

// kernel: fno2d_forward.10
= control target key start
LH: loop header
LB: loop body
LE: loop exit
PB: predicated region body
PF: predicated region fallthrough
CT: control target
= control target key end

     0   :  { %s457_s2 = inlined_call_operand.vmem [shape: f32[128,128], index: 2, kind: input, shape index: {}]   ;;  %s458_s3 = inlined_call_operand.vmem [shape: f32[1,128], index: 3, kind: input, shape index: {}]   ;;  %s459_s0 = inlined_call_operand.vmem [shape: f32[128,128], index: 0, kind: input, shape index: {}]   ;;  %s460_s1 = inlined_call_operand.vmem [shape: f32[128,128], index: 1, kind: input, shape index: {}]   ;;  %s461_s4 = inlined_call_operand.vmem [shape: f32[128,128], index: 4, kind: output, shape index: {}]  }
   0x1   :  { %v48_v0 = vld [vmem:[%s457_s2 + $0x78] sm:$0xff]  ;;  %v47_v1 = vld [vmem:[%s457_s2 + $0x70] sm:$0xff]  ;;  %v46_v2 = vld [vmem:[%s457_s2 + $0x68] sm:$0xff] }
   0x2   :  { %171 = vmatpush.msra.mxu2 %v48_v0  ;;  %172 = vmatpush.msra.mxu3 %v48_v0  ;;  %v45_v3 = vld [vmem:[%s457_s2 + $0x60] sm:$0xff]  ;;  %v44_v4 = vld [vmem:[%s457_s2 + $0x58] sm:$0xff]  ;;  %v43_v5 = vld [vmem:[%s457_s2 + $0x50] sm:$0xff] }
   0x3   :  { %53 = vmatpush.msra.mxu0 %v48_v0  ;;  %170 = vmatpush.msra.mxu1 %v48_v0  ;;  %v42_v6 = vld [vmem:[%s457_s2 + $0x48] sm:$0xff]  ;;  %v41_v7 = vld [vmem:[%s457_s2 + $0x40] sm:$0xff]  ;;  %v40_v8 = vld [vmem:[%s457_s2 + $0x38] sm:$0xff] }
   0x4   :  { %174 = vmatpush.msra.mxu2 %v47_v1  ;;  %175 = vmatpush.msra.mxu3 %v47_v1  ;;  %v39_v9 = vld [vmem:[%s457_s2 + $0x30] sm:$0xff]  ;;  %v38_v10 = vld [vmem:[%s457_s2 + $0x28] sm:$0xff]  ;;  %v37_v11 = vld [vmem:[%s457_s2 + $0x20] sm:$0xff] }
   0x5   :  { %54 = vmatpush.msra.mxu0 %v47_v1  ;;  %173 = vmatpush.msra.mxu1 %v47_v1  ;;  %v36_v12 = vld [vmem:[%s457_s2 + $0x18] sm:$0xff]  ;;  %v35_v13 = vld [vmem:[%s457_s2 + $0x10] sm:$0xff]  ;;  %v34_v14 = vld [vmem:[%s457_s2 + $0x8] sm:$0xff] }
   0x6   :  { %177 = vmatpush.msra.mxu2 %v46_v2  ;;  %178 = vmatpush.msra.mxu3 %v46_v2  ;;  %v33_v15 = vld [vmem:[%s457_s2] sm:$0xff]  ;;  %v26_v20 = vld [vmem:[%s459_s0 + $0x48] sm:$0xff]  ;;  %v27_v24 = vld [vmem:[%s459_s0 + $0x50] sm:$0xff] }
   0x7   :  { %55 = vmatpush.msra.mxu0 %v46_v2  ;;  %176 = vmatpush.msra.mxu1 %v46_v2  ;;  %v25_v16 = vld [vmem:[%s459_s0 + $0x40] sm:$0xff]  ;;  %v30_v21 = vld [vmem:[%s459_s0 + $0x68] sm:$0xff]  ;;  %v31_v25 = vld [vmem:[%s459_s0 + $0x70] sm:$0xff] }
   0x8   :  { %180 = vmatpush.msra.mxu2 %v45_v3  ;;  %181 = vmatpush.msra.mxu3 %v45_v3  ;;  %v29_v17 = vld [vmem:[%s459_s0 + $0x60] sm:$0xff]  ;;  %v18_v22 = vld [vmem:[%s459_s0 + $0x8] sm:$0xff]  ;;  %v19_v26 = vld [vmem:[%s459_s0 + $0x10] sm:$0xff] }
   0x9   :  { %56 = vmatpush.msra.mxu0 %v45_v3  ;;  %179 = vmatpush.msra.mxu1 %v45_v3  ;;  %v17_v18 = vld [vmem:[%s459_s0] sm:$0xff]  ;;  %v22_v23 = vld [vmem:[%s459_s0 + $0x28] sm:$0xff]  ;;  %v23_v27 = vld [vmem:[%s459_s0 + $0x30] sm:$0xff] }
   0xa   :  { %183 = vmatpush.msra.mxu2 %v44_v4  ;;  %184 = vmatpush.msra.mxu3 %v44_v4  ;;  %v21_v19 = vld [vmem:[%s459_s0 + $0x20] sm:$0xff]  ;;  %v28_v28 = vld [vmem:[%s459_s0 + $0x58] sm:$0xff]  ;;  %v119_v50 = vld [vmem:[%s460_s1 + $0x8] sm:$0xff] }
   0xb   :  { %57 = vmatpush.msra.mxu0 %v44_v4  ;;  %182 = vmatpush.msra.mxu1 %v44_v4  ;;  %v32_v29 = vld [vmem:[%s459_s0 + $0x78] sm:$0xff]  ;;  %v343_v32 = vld [vmem:[%s458_s3] ss:$0 sm:$0xff]  ;;  %v123_v52 = vld [vmem:[%s460_s1 + $0x28] sm:$0xff] }
   0xc   :  { %186 = vmatpush.msra.mxu2 %v43_v5  ;;  %187 = vmatpush.msra.mxu3 %v43_v5  ;;  %v20_v30 = vld [vmem:[%s459_s0 + $0x18] sm:$0xff]  ;;  %v118_v34 = vld [vmem:[%s460_s1] sm:$0xff]  ;;  %v127_v58 = vld [vmem:[%s460_s1 + $0x48] sm:$0xff] }
   0xd   :  { %58 = vmatpush.msra.mxu0 %v43_v5  ;;  %185 = vmatpush.msra.mxu1 %v43_v5  ;;  %v24_v31 = vld [vmem:[%s459_s0 + $0x38] sm:$0xff]  ;;  %v122_v36 = vld [vmem:[%s460_s1 + $0x20] sm:$0xff]  ;;  %v131_v60 = vld [vmem:[%s460_s1 + $0x68] sm:$0xff] }
   0xe   :  { %189 = vmatpush.msra.mxu2 %v42_v6  ;;  %190 = vmatpush.msra.mxu3 %v42_v6  ;;  %v126_v42 = vld [vmem:[%s460_s1 + $0x40] sm:$0xff]  ;;  %v120_v2 = vld [vmem:[%s460_s1 + $0x10] sm:$0xff] }
   0xf   :  { %59 = vmatpush.msra.mxu0 %v42_v6  ;;  %188 = vmatpush.msra.mxu1 %v42_v6  ;;  %v130_v44 = vld [vmem:[%s460_s1 + $0x60] sm:$0xff]  ;;  %v124_v4 = vld [vmem:[%s460_s1 + $0x30] sm:$0xff] }
  0x10   :  { %192 = vmatpush.msra.mxu2 %v41_v7  ;;  %193 = vmatpush.msra.mxu3 %v41_v7 }
  0x11   :  { %60 = vmatpush.msra.mxu0 %v41_v7  ;;  %191 = vmatpush.msra.mxu1 %v41_v7 }
  0x12   :  { %195 = vmatpush.msra.mxu2 %v40_v8  ;;  %196 = vmatpush.msra.mxu3 %v40_v8 }
  0x13   :  { %61 = vmatpush.msra.mxu0 %v40_v8  ;;  %194 = vmatpush.msra.mxu1 %v40_v8 }
  0x14   :  { %198 = vmatpush.msra.mxu2 %v39_v9  ;;  %199 = vmatpush.msra.mxu3 %v39_v9 }
  0x15   :  { %62 = vmatpush.msra.mxu0 %v39_v9  ;;  %197 = vmatpush.msra.mxu1 %v39_v9 }
  0x16   :  { %201 = vmatpush.msra.mxu2 %v38_v10  ;;  %202 = vmatpush.msra.mxu3 %v38_v10 }
  0x17   :  { %63 = vmatpush.msra.mxu0 %v38_v10  ;;  %200 = vmatpush.msra.mxu1 %v38_v10  ;;  %v128_v10 = vld [vmem:[%s460_s1 + $0x50] sm:$0xff] }
  0x18   :  { %204 = vmatpush.msra.mxu2 %v37_v11  ;;  %205 = vmatpush.msra.mxu3 %v37_v11 }
  0x19   :  { %64 = vmatpush.msra.mxu0 %v37_v11  ;;  %203 = vmatpush.msra.mxu1 %v37_v11 }
  0x1a   :  { %207 = vmatpush.msra.mxu2 %v36_v12  ;;  %208 = vmatpush.msra.mxu3 %v36_v12 }
  0x1b   :  { %65 = vmatpush.msra.mxu0 %v36_v12  ;;  %206 = vmatpush.msra.mxu1 %v36_v12  ;;  %v132_v12 = vld [vmem:[%s460_s1 + $0x70] sm:$0xff] }
  0x1c   :  { %210 = vmatpush.msra.mxu2 %v35_v13  ;;  %211 = vmatpush.msra.mxu3 %v35_v13 }
  0x1d   :  { %66 = vmatpush.msra.mxu0 %v35_v13  ;;  %209 = vmatpush.msra.mxu1 %v35_v13 }
  0x1e   :  { %213 = vmatpush.msra.mxu2 %v34_v14  ;;  %214 = vmatpush.msra.mxu3 %v34_v14 }
  0x1f   :  { %67 = vmatpush.msra.mxu0 %v34_v14  ;;  %212 = vmatpush.msra.mxu1 %v34_v14 }
  0x20   :  { %216 = vmatpush.msra.mxu2 %v33_v15  ;;  %217 = vmatpush.msra.mxu3 %v33_v15 }
  0x21   :  { %93 = vmatmul.f32.vlgmr.msra.gmra.mxu2 %v25_v16  ;;  %105 = vmatmul.f32.vlgmr.msra.gmra.mxu3 %v29_v17 }
  0x22   :  { %68 = vmatpush.msra.mxu0 %v33_v15  ;;  %215 = vmatpush.msra.mxu1 %v33_v15 }
  0x23   :  { %69 = vmatmul.f32.vlgmr.msra.gmra.mxu0 %v17_v18  ;;  %81 = vmatmul.f32.vlgmr.msra.gmra.mxu1 %v21_v19  ;;  %v121_v18 = vld [vmem:[%s460_s1 + $0x18] sm:$0xff] }
  0x29   :  { %96 = vmatmul.f32.gmra.mxu2 %v26_v20  ;;  %108 = vmatmul.f32.gmra.mxu3 %v30_v21  ;;  %v125_v20 = vld [vmem:[%s460_s1 + $0x38] sm:$0xff] }
  0x2b   :  { %72 = vmatmul.f32.gmra.mxu0 %v18_v22  ;;  %84 = vmatmul.f32.gmra.mxu1 %v22_v23 }
  0x31   :  { %99 = vmatmul.f32.gmra.mxu2 %v27_v24  ;;  %111 = vmatmul.f32.gmra.mxu3 %v31_v25 }
  0x33   :  { %75 = vmatmul.f32.gmra.mxu0 %v19_v26  ;;  %87 = vmatmul.f32.gmra.mxu1 %v23_v27  ;;  %v129_v26 = vld [vmem:[%s460_s1 + $0x58] sm:$0xff] }
  0x39   :  { %102 = vmatmul.f32.gmra.mxu2 %v28_v28  ;;  %114 = vmatmul.f32.gmra.mxu3 %v32_v29  ;;  %v133_v28 = vld [vmem:[%s460_s1 + $0x78] sm:$0xff] }
  0x3b   :  { %78 = vmatmul.f32.gmra.mxu0 %v20_v30  ;;  %90 = vmatmul.f32.gmra.mxu1 %v24_v31 }
  0xa0   :  { %v70_v33 = vpop.f32.mrf.mxu0  ;;  %v82_v35 = vpop.f32.mrf.mxu1 }
  0xa1   :  { %v71_v37 = vadd.f32 %v343_v32, %v70_v33  ;;  %v83_v38 = vadd.f32 %v343_v32, %v82_v35 }
  0xa3   :  { %v134_v39 = vadd.f32 %v118_v34, %v71_v37  ;;  %v138_v40 = vadd.f32 %v122_v36, %v83_v38 }
  0xa4   :  { %v94_v41 = vpop.f32.mrf.mxu2  ;;  %v106_v43 = vpop.f32.mrf.mxu3 }
  0xa5   :  { %150 = vst [vmem:[%s461_s4] sm:$0xff] %v134_v39  ;;  %v95_v45 = vadd.f32 %v343_v32, %v94_v41  ;;  %v107_v46 = vadd.f32 %v343_v32, %v106_v43 }
  0xa6   :  { %154 = vst [vmem:[%s461_s4 + $0x20] sm:$0xff] %v138_v40 }
  0xa7   :  { %v142_v47 = vadd.f32 %v126_v42, %v95_v45  ;;  %v146_v48 = vadd.f32 %v130_v44, %v107_v46 }
  0xa8   :  { %v73_v49 = vpop.f32.mrf.mxu0  ;;  %v85_v51 = vpop.f32.mrf.mxu1 }
  0xa9   :  { %158 = vst [vmem:[%s461_s4 + $0x40] sm:$0xff] %v142_v47  ;;  %v74_v53 = vadd.f32 %v343_v32, %v73_v49  ;;  %v86_v54 = vadd.f32 %v343_v32, %v85_v51 }
  0xaa   :  { %162 = vst [vmem:[%s461_s4 + $0x60] sm:$0xff] %v146_v48 }
  0xab   :  { %v135_v55 = vadd.f32 %v119_v50, %v74_v53  ;;  %v139_v56 = vadd.f32 %v123_v52, %v86_v54 }
  0xac   :  { %v97_v57 = vpop.f32.mrf.mxu2  ;;  %v109_v59 = vpop.f32.mrf.mxu3 }
  0xad   :  { %151 = vst [vmem:[%s461_s4 + $0x8] sm:$0xff] %v135_v55  ;;  %v98_v61 = vadd.f32 %v343_v32, %v97_v57  ;;  %v110_v62 = vadd.f32 %v343_v32, %v109_v59 }
  0xae   :  { %155 = vst [vmem:[%s461_s4 + $0x28] sm:$0xff] %v139_v56 }
  0xaf   :  { %v143_v63 = vadd.f32 %v127_v58, %v98_v61  ;;  %v147_v0 = vadd.f32 %v131_v60, %v110_v62 }
  0xb0   :  { %v76_v1 = vpop.f32.mrf.mxu0  ;;  %v88_v3 = vpop.f32.mrf.mxu1 }
  0xb1   :  { %159 = vst [vmem:[%s461_s4 + $0x48] sm:$0xff] %v143_v63  ;;  %v77_v5 = vadd.f32 %v343_v32, %v76_v1  ;;  %v89_v6 = vadd.f32 %v343_v32, %v88_v3 }
  0xb2   :  { %163 = vst [vmem:[%s461_s4 + $0x68] sm:$0xff] %v147_v0 }
  0xb3   :  { %v136_v7 = vadd.f32 %v120_v2, %v77_v5  ;;  %v140_v8 = vadd.f32 %v124_v4, %v89_v6 }
  0xb4   :  { %v100_v9 = vpop.f32.mrf.mxu2  ;;  %v112_v11 = vpop.f32.mrf.mxu3 }
  0xb5   :  { %152 = vst [vmem:[%s461_s4 + $0x10] sm:$0xff] %v136_v7  ;;  %v101_v13 = vadd.f32 %v343_v32, %v100_v9  ;;  %v113_v14 = vadd.f32 %v343_v32, %v112_v11 }
  0xb6   :  { %156 = vst [vmem:[%s461_s4 + $0x30] sm:$0xff] %v140_v8 }
  0xb7   :  { %v144_v15 = vadd.f32 %v128_v10, %v101_v13  ;;  %v148_v16 = vadd.f32 %v132_v12, %v113_v14 }
  0xb8   :  { %v79_v17 = vpop.f32.mrf.mxu0  ;;  %v91_v19 = vpop.f32.mrf.mxu1 }
  0xb9   :  { %160 = vst [vmem:[%s461_s4 + $0x50] sm:$0xff] %v144_v15  ;;  %v80_v21 = vadd.f32 %v343_v32, %v79_v17  ;;  %v92_v22 = vadd.f32 %v343_v32, %v91_v19 }
  0xba   :  { %164 = vst [vmem:[%s461_s4 + $0x70] sm:$0xff] %v148_v16 }
  0xbb   :  { %v137_v23 = vadd.f32 %v121_v18, %v80_v21  ;;  %v141_v24 = vadd.f32 %v125_v20, %v92_v22 }
  0xbc   :  { %v103_v25 = vpop.f32.mrf.mxu2  ;;  %v115_v27 = vpop.f32.mrf.mxu3 }
  0xbd   :  { %153 = vst [vmem:[%s461_s4 + $0x18] sm:$0xff] %v137_v23  ;;  %v104_v29 = vadd.f32 %v343_v32, %v103_v25  ;;  %v116_v30 = vadd.f32 %v343_v32, %v115_v27 }
  0xbe   :  { %157 = vst [vmem:[%s461_s4 + $0x38] sm:$0xff] %v141_v24 }
  0xbf   :  { %v145_v31 = vadd.f32 %v129_v26, %v104_v29  ;;  %v149_v33 = vadd.f32 %v133_v28, %v116_v30 }
  0xc1   :  { %161 = vst [vmem:[%s461_s4 + $0x58] sm:$0xff] %v145_v31 }
  0xc2   :  { %165 = vst [vmem:[%s461_s4 + $0x78] sm:$0xff] %v149_v33 }

// kernel: fno2d_forward.11
= control target key start
LH: loop header
LB: loop body
LE: loop exit
PB: predicated region body
PF: predicated region fallthrough
CT: control target
= control target key end

     0   :  { %vm222_vm0 = vcmask 31744   ;;  %s521_s1 = inlined_call_operand.vmem [shape: f32[128,128], index: 1, kind: input, shape index: {}]   ;;  %s522_s2 = inlined_call_operand.vmem [shape: f32[1,128], index: 2, kind: input, shape index: {}]   ;;  %s523_s0 = inlined_call_operand.vmem [shape: f32[128,128], index: 0, kind: input, shape index: {}]   ;;  %s524_s3 = inlined_call_operand.vmem [shape: f32[128,4], index: 3, kind: input, shape index: {}]   ;;  %s525_s4 = inlined_call_operand.vmem [shape: f32[1,4], index: 4, kind: input, shape index: {}]   ;;  %s526_s5 = inlined_call_operand.vmem [shape: f32[128,4], index: 5, kind: output, shape index: {}]  }
   0x1   :  { %v51_v0 = vld [vmem:[%s521_s1 + $0x78] sm:$0xff]  ;;  %v50_v1 = vld [vmem:[%s521_s1 + $0x70] sm:$0xff]  ;;  %v49_v2 = vld [vmem:[%s521_s1 + $0x68] sm:$0xff] }
   0x2   :  { %243 = vmatpush.msra.mxu2 %v51_v0  ;;  %56 = vmatpush.msra.mxu0 %v51_v0  ;;  %v48_v3 = vld [vmem:[%s521_s1 + $0x60] sm:$0xff]  ;;  %v47_v4 = vld [vmem:[%s521_s1 + $0x58] sm:$0xff]  ;;  %v46_v5 = vld [vmem:[%s521_s1 + $0x50] sm:$0xff] }
   0x3   :  { %v45_v6 = vld [vmem:[%s521_s1 + $0x48] sm:$0xff]  ;;  %v44_v7 = vld [vmem:[%s521_s1 + $0x40] sm:$0xff]  ;;  %v43_v8 = vld [vmem:[%s521_s1 + $0x38] sm:$0xff] }
   0x4   :  { %244 = vmatpush.msra.mxu2 %v50_v1  ;;  %57 = vmatpush.msra.mxu0 %v50_v1  ;;  %v42_v9 = vld [vmem:[%s521_s1 + $0x30] sm:$0xff]  ;;  %v41_v10 = vld [vmem:[%s521_s1 + $0x28] sm:$0xff]  ;;  %v40_v11 = vld [vmem:[%s521_s1 + $0x20] sm:$0xff] }
   0x5   :  { %v39_v12 = vld [vmem:[%s521_s1 + $0x18] sm:$0xff]  ;;  %v38_v13 = vld [vmem:[%s521_s1 + $0x10] sm:$0xff]  ;;  %v37_v14 = vld [vmem:[%s521_s1 + $0x8] sm:$0xff] }
   0x6   :  { %245 = vmatpush.msra.mxu2 %v49_v2  ;;  %58 = vmatpush.msra.mxu0 %v49_v2  ;;  %v36_v15 = vld [vmem:[%s521_s1] sm:$0xff]  ;;  %v29_v18 = vld [vmem:[%s523_s0 + $0x48] sm:$0xff]  ;;  %v30_v20 = vld [vmem:[%s523_s0 + $0x50] sm:$0xff] }
   0x7   :  { %v28_v16 = vld [vmem:[%s523_s0 + $0x40] sm:$0xff]  ;;  %v21_v19 = vld [vmem:[%s523_s0 + $0x8] sm:$0xff]  ;;  %v22_v21 = vld [vmem:[%s523_s0 + $0x10] sm:$0xff] }
   0x8   :  { %246 = vmatpush.msra.mxu2 %v48_v3  ;;  %59 = vmatpush.msra.mxu0 %v48_v3  ;;  %v20_v17 = vld [vmem:[%s523_s0] sm:$0xff]  ;;  %v31_v22 = vld [vmem:[%s523_s0 + $0x58] sm:$0xff]  ;;  %v151_v25 = vld [vmem:[%s524_s3 + $0x70] sm:$0xff] }
   0x9   :  { %v23_v23 = vld [vmem:[%s523_s0 + $0x18] sm:$0xff]  ;;  %v150_v26 = vld [vmem:[%s524_s3 + $0x68] sm:$0xff]  ;;  %v149_v27 = vld [vmem:[%s524_s3 + $0x60] sm:$0xff] }
   0xa   :  { %247 = vmatpush.msra.mxu2 %v47_v4  ;;  %60 = vmatpush.msra.mxu0 %v47_v4  ;;  %v152_v24 = vld [vmem:[%s524_s3 + $0x78] sm:$0xff]  ;;  %v32_v28 = vld [vmem:[%s523_s0 + $0x60] sm:$0xff]  ;;  %v147_v31 = vld [vmem:[%s524_s3 + $0x50] sm:$0xff] }
   0xb   :  { %259 = vmatpush.msra.mxu3 %v152_v24  ;;  %157 = vmatpush.msra.mxu1 %v152_v24  ;;  %v24_v29 = vld [vmem:[%s523_s0 + $0x20] sm:$0xff]  ;;  %v148_v30 = vld [vmem:[%s524_s3 + $0x58] sm:$0xff]  ;;  %v146_v32 = vld [vmem:[%s524_s3 + $0x48] sm:$0xff] }
   0xc   :  { %248 = vmatpush.msra.mxu2 %v46_v5  ;;  %61 = vmatpush.msra.mxu0 %v46_v5  ;;  %v145_v33 = vld [vmem:[%s524_s3 + $0x40] sm:$0xff]  ;;  %v33_v34 = vld [vmem:[%s523_s0 + $0x68] sm:$0xff]  ;;  %v144_v36 = vld [vmem:[%s524_s3 + $0x38] sm:$0xff] }
   0xd   :  { %260 = vmatpush.msra.mxu3 %v151_v25  ;;  %158 = vmatpush.msra.mxu1 %v151_v25  ;;  %v25_v35 = vld [vmem:[%s523_s0 + $0x28] sm:$0xff]  ;;  %v143_v37 = vld [vmem:[%s524_s3 + $0x30] sm:$0xff]  ;;  %v141_v39 = vld [vmem:[%s524_s3 + $0x20] sm:$0xff] }
   0xe   :  { %249 = vmatpush.msra.mxu2 %v45_v6  ;;  %62 = vmatpush.msra.mxu0 %v45_v6  ;;  %v142_v38 = vld [vmem:[%s524_s3 + $0x28] sm:$0xff]  ;;  %v34_v40 = vld [vmem:[%s523_s0 + $0x70] sm:$0xff]  ;;  %v140_v42 = vld [vmem:[%s524_s3 + $0x18] sm:$0xff] }
   0xf   :  { %261 = vmatpush.msra.mxu3 %v150_v26  ;;  %159 = vmatpush.msra.mxu1 %v150_v26  ;;  %v26_v41 = vld [vmem:[%s523_s0 + $0x30] sm:$0xff]  ;;  %v35_v43 = vld [vmem:[%s523_s0 + $0x78] sm:$0xff]  ;;  %v138_v46 = vld [vmem:[%s524_s3 + $0x8] sm:$0xff] }
  0x10   :  { %250 = vmatpush.msra.mxu2 %v44_v7  ;;  %63 = vmatpush.msra.mxu0 %v44_v7  ;;  %v27_v44 = vld [vmem:[%s523_s0 + $0x38] sm:$0xff]  ;;  %v139_v45 = vld [vmem:[%s524_s3 + $0x10] sm:$0xff]  ;;  %v137_v47 = vld [vmem:[%s524_s3] sm:$0xff] }
  0x11   :  { %262 = vmatpush.msra.mxu3 %v149_v27  ;;  %160 = vmatpush.msra.mxu1 %v149_v27  ;;  %v275_v48 = vld [vmem:[%s522_s2] ss:$0 sm:$0xff] }
  0x12   :  { %251 = vmatpush.msra.mxu2 %v43_v8  ;;  %64 = vmatpush.msra.mxu0 %v43_v8 }
  0x13   :  { %263 = vmatpush.msra.mxu3 %v148_v30  ;;  %161 = vmatpush.msra.mxu1 %v148_v30 }
  0x14   :  { %252 = vmatpush.msra.mxu2 %v42_v9  ;;  %65 = vmatpush.msra.mxu0 %v42_v9 }
  0x15   :  { %264 = vmatpush.msra.mxu3 %v147_v31  ;;  %162 = vmatpush.msra.mxu1 %v147_v31 }
  0x16   :  { %253 = vmatpush.msra.mxu2 %v41_v10  ;;  %66 = vmatpush.msra.mxu0 %v41_v10 }
  0x17   :  { %265 = vmatpush.msra.mxu3 %v146_v32  ;;  %163 = vmatpush.msra.mxu1 %v146_v32 }
  0x18   :  { %254 = vmatpush.msra.mxu2 %v40_v11  ;;  %67 = vmatpush.msra.mxu0 %v40_v11 }
  0x19   :  { %266 = vmatpush.msra.mxu3 %v145_v33  ;;  %164 = vmatpush.msra.mxu1 %v145_v33  ;;  %v276_v33 = vld [vmem:[%s525_s4] ss:$0 sm:$0xff] }
  0x1a   :  { %255 = vmatpush.msra.mxu2 %v39_v12  ;;  %68 = vmatpush.msra.mxu0 %v39_v12 }
  0x1b   :  { %267 = vmatpush.msra.mxu3 %v144_v36  ;;  %165 = vmatpush.msra.mxu1 %v144_v36 }
  0x1c   :  { %256 = vmatpush.msra.mxu2 %v38_v13  ;;  %69 = vmatpush.msra.mxu0 %v38_v13 }
  0x1d   :  { %268 = vmatpush.msra.mxu3 %v143_v37  ;;  %166 = vmatpush.msra.mxu1 %v143_v37 }
  0x1e   :  { %257 = vmatpush.msra.mxu2 %v37_v14  ;;  %70 = vmatpush.msra.mxu0 %v37_v14 }
  0x1f   :  { %269 = vmatpush.msra.mxu3 %v142_v38  ;;  %167 = vmatpush.msra.mxu1 %v142_v38 }
  0x20   :  { %258 = vmatpush.msra.mxu2 %v36_v15  ;;  %71 = vmatpush.msra.mxu0 %v36_v15 }
  0x21   :  { %96 = vmatmul.f32.vlgmr.msra.gmra.mxu2 %v28_v16  ;;  %72 = vmatmul.f32.vlgmr.msra.gmra.mxu0 %v20_v17 }
  0x22   :  { %270 = vmatpush.msra.mxu3 %v141_v39  ;;  %168 = vmatpush.msra.mxu1 %v141_v39 }
  0x24   :  { %271 = vmatpush.msra.mxu3 %v140_v42  ;;  %169 = vmatpush.msra.mxu1 %v140_v42 }
  0x26   :  { %272 = vmatpush.msra.mxu3 %v139_v45  ;;  %170 = vmatpush.msra.mxu1 %v139_v45 }
  0x28   :  { %273 = vmatpush.msra.mxu3 %v138_v46  ;;  %171 = vmatpush.msra.mxu1 %v138_v46 }
  0x29   :  { %99 = vmatmul.f32.gmra.mxu2 %v29_v18  ;;  %75 = vmatmul.f32.gmra.mxu0 %v21_v19 }
  0x2a   :  { %274 = vmatpush.msra.mxu3 %v137_v47  ;;  %172 = vmatpush.msra.mxu1 %v137_v47 }
  0x31   :  { %102 = vmatmul.f32.gmra.mxu2 %v30_v20  ;;  %78 = vmatmul.f32.gmra.mxu0 %v22_v21 }
  0x39   :  { %105 = vmatmul.f32.gmra.mxu2 %v31_v22  ;;  %81 = vmatmul.f32.gmra.mxu0 %v23_v23 }
  0x41   :  { %108 = vmatmul.f32.gmra.mxu2 %v32_v28  ;;  %84 = vmatmul.f32.gmra.mxu0 %v24_v29 }
  0x49   :  { %111 = vmatmul.f32.gmra.mxu2 %v33_v34  ;;  %87 = vmatmul.f32.gmra.mxu0 %v25_v35 }
  0x51   :  { %114 = vmatmul.f32.gmra.mxu2 %v34_v40  ;;  %90 = vmatmul.f32.gmra.mxu0 %v26_v41 }
  0x59   :  { %117 = vmatmul.f32.gmra.mxu2 %v35_v43  ;;  %93 = vmatmul.f32.gmra.mxu0 %v27_v44 }
  0x9e   :  { %v73_v49 = vpop.f32.mrf.mxu0 }
  0x9f   :  { %v74_v50 = vadd.f32 %v275_v48, %v73_v49 }
  0xa1   :  { %v121_v51 = vmax.f32 %v74_v50, 0.0 }
  0xa3   :  { %173 = vmatmul.f32.vlgmr.msra.gmra.mxu1 %v121_v51 }
  0xa4   :  { %v97_v52 = vpop.f32.mrf.mxu2 }
  0xa5   :  { %v98_v53 = vadd.f32 %v275_v48, %v97_v52 }
  0xa6   :  { %v76_v54 = vpop.f32.mrf.mxu0 }
  0xa7   :  { %v129_v55 = vmax.f32 %v98_v53, 0.0  ;;  %v77_v56 = vadd.f32 %v275_v48, %v76_v54 }
  0xa9   :  { %197 = vmatmul.f32.vlgmr.msra.gmra.mxu3 %v129_v55  ;;  %v122_v57 = vmax.f32 %v77_v56, 0.0 }
  0xab   :  { %176 = vmatmul.f32.gmra.mxu1 %v122_v57 }
  0xac   :  { %v100_v58 = vpop.f32.mrf.mxu2 }
  0xad   :  { %v101_v59 = vadd.f32 %v275_v48, %v100_v58 }
  0xae   :  { %v79_v60 = vpop.f32.mrf.mxu0 }
  0xaf   :  { %v130_v61 = vmax.f32 %v101_v59, 0.0  ;;  %v80_v62 = vadd.f32 %v275_v48, %v79_v60 }
  0xb1   :  { %200 = vmatmul.f32.gmra.mxu3 %v130_v61  ;;  %v123_v63 = vmax.f32 %v80_v62, 0.0 }
  0xb3   :  { %179 = vmatmul.f32.gmra.mxu1 %v123_v63 }
  0xb4   :  { %v103_v0 = vpop.f32.mrf.mxu2 }
  0xb5   :  { %v104_v1 = vadd.f32 %v275_v48, %v103_v0 }
  0xb6   :  { %v82_v2 = vpop.f32.mrf.mxu0 }
  0xb7   :  { %v131_v3 = vmax.f32 %v104_v1, 0.0  ;;  %v83_v4 = vadd.f32 %v275_v48, %v82_v2 }
  0xb9   :  { %203 = vmatmul.f32.gmra.mxu3 %v131_v3  ;;  %v124_v5 = vmax.f32 %v83_v4, 0.0 }
  0xbb   :  { %182 = vmatmul.f32.gmra.mxu1 %v124_v5 }
  0xbc   :  { %v106_v6 = vpop.f32.mrf.mxu2 }
  0xbd   :  { %v107_v7 = vadd.f32 %v275_v48, %v106_v6 }
  0xbe   :  { %v85_v8 = vpop.f32.mrf.mxu0 }
  0xbf   :  { %v132_v9 = vmax.f32 %v107_v7, 0.0  ;;  %v86_v10 = vadd.f32 %v275_v48, %v85_v8 }
  0xc1   :  { %206 = vmatmul.f32.gmra.mxu3 %v132_v9  ;;  %v125_v11 = vmax.f32 %v86_v10, 0.0 }
  0xc3   :  { %185 = vmatmul.f32.gmra.mxu1 %v125_v11 }
  0xc4   :  { %v109_v12 = vpop.f32.mrf.mxu2 }
  0xc5   :  { %v110_v13 = vadd.f32 %v275_v48, %v109_v12 }
  0xc6   :  { %v88_v14 = vpop.f32.mrf.mxu0 }
  0xc7   :  { %v133_v15 = vmax.f32 %v110_v13, 0.0  ;;  %v89_v16 = vadd.f32 %v275_v48, %v88_v14 }
  0xc9   :  { %209 = vmatmul.f32.gmra.mxu3 %v133_v15  ;;  %v126_v17 = vmax.f32 %v89_v16, 0.0 }
  0xcb   :  { %188 = vmatmul.f32.gmra.mxu1 %v126_v17 }
  0xcc   :  { %v112_v18 = vpop.f32.mrf.mxu2 }
  0xcd   :  { %v113_v19 = vadd.f32 %v275_v48, %v112_v18 }
  0xce   :  { %v91_v20 = vpop.f32.mrf.mxu0 }
  0xcf   :  { %v134_v21 = vmax.f32 %v113_v19, 0.0  ;;  %v92_v22 = vadd.f32 %v275_v48, %v91_v20 }
  0xd1   :  { %212 = vmatmul.f32.gmra.mxu3 %v134_v21  ;;  %v127_v23 = vmax.f32 %v92_v22, 0.0 }
  0xd3   :  { %191 = vmatmul.f32.gmra.mxu1 %v127_v23 }
  0xd4   :  { %v115_v24 = vpop.f32.mrf.mxu2 }
  0xd5   :  { %v116_v25 = vadd.f32 %v275_v48, %v115_v24 }
  0xd6   :  { %v94_v26 = vpop.f32.mrf.mxu0 }
  0xd7   :  { %v135_v27 = vmax.f32 %v116_v25, 0.0  ;;  %v95_v28 = vadd.f32 %v275_v48, %v94_v26 }
  0xd9   :  { %215 = vmatmul.f32.gmra.mxu3 %v135_v27  ;;  %v128_v29 = vmax.f32 %v95_v28, 0.0 }
  0xdb   :  { %194 = vmatmul.f32.gmra.mxu1 %v128_v29 }
  0xdc   :  { %v118_v30 = vpop.f32.mrf.mxu2 }
  0xdd   :  { %v119_v31 = vadd.f32 %v275_v48, %v118_v30 }
  0xdf   :  { %v136_v32 = vmax.f32 %v119_v31, 0.0 }
  0xe1   :  { %218 = vmatmul.f32.gmra.mxu3 %v136_v32 }
 0x120   :  { %v174_v34 = vpop.f32.mrf.mxu1 }
 0x121   :  { %v175_v35 = vadd.f32 %v276_v33, %v174_v34 }
 0x123   :  { %223 = vst.msk [vmem:[%s526_s5] sm:$0xff] %vm222_vm0, %v175_v35 }
 0x128   :  { %v177_v36 = vpop.f32.mrf.mxu1 }
 0x129   :  { %v178_v37 = vadd.f32 %v276_v33, %v177_v36 }
 0x12b   :  { %224 = vst.msk [vmem:[%s526_s5 + $0x8] sm:$0xff] %vm222_vm0, %v178_v37 }
 0x12c   :  { %v198_v38 = vpop.f32.mrf.mxu3 }
 0x12d   :  { %v199_v39 = vadd.f32 %v276_v33, %v198_v38 }
 0x12f   :  { %231 = vst.msk [vmem:[%s526_s5 + $0x40] sm:$0xff] %vm222_vm0, %v199_v39 }
 0x130   :  { %v180_v40 = vpop.f32.mrf.mxu1 }
 0x131   :  { %v181_v41 = vadd.f32 %v276_v33, %v180_v40 }
 0x133   :  { %225 = vst.msk [vmem:[%s526_s5 + $0x10] sm:$0xff] %vm222_vm0, %v181_v41 }
 0x134   :  { %v201_v42 = vpop.f32.mrf.mxu3 }
 0x135   :  { %v202_v43 = vadd.f32 %v276_v33, %v201_v42 }
 0x137   :  { %232 = vst.msk [vmem:[%s526_s5 + $0x48] sm:$0xff] %vm222_vm0, %v202_v43 }
 0x138   :  { %v183_v44 = vpop.f32.mrf.mxu1 }
 0x139   :  { %v184_v45 = vadd.f32 %v276_v33, %v183_v44 }
 0x13b   :  { %226 = vst.msk [vmem:[%s526_s5 + $0x18] sm:$0xff] %vm222_vm0, %v184_v45 }
 0x13c   :  { %v204_v46 = vpop.f32.mrf.mxu3 }
 0x13d   :  { %v205_v47 = vadd.f32 %v276_v33, %v204_v46 }
 0x13f   :  { %233 = vst.msk [vmem:[%s526_s5 + $0x50] sm:$0xff] %vm222_vm0, %v205_v47 }
 0x140   :  { %v186_v48 = vpop.f32.mrf.mxu1 }
 0x141   :  { %v187_v49 = vadd.f32 %v276_v33, %v186_v48 }
 0x143   :  { %227 = vst.msk [vmem:[%s526_s5 + $0x20] sm:$0xff] %vm222_vm0, %v187_v49 }
 0x144   :  { %v207_v50 = vpop.f32.mrf.mxu3 }
 0x145   :  { %v208_v51 = vadd.f32 %v276_v33, %v207_v50 }
 0x147   :  { %234 = vst.msk [vmem:[%s526_s5 + $0x58] sm:$0xff] %vm222_vm0, %v208_v51 }
 0x148   :  { %v189_v52 = vpop.f32.mrf.mxu1 }
 0x149   :  { %v190_v53 = vadd.f32 %v276_v33, %v189_v52 }
 0x14b   :  { %228 = vst.msk [vmem:[%s526_s5 + $0x28] sm:$0xff] %vm222_vm0, %v190_v53 }
 0x14c   :  { %v210_v54 = vpop.f32.mrf.mxu3 }
 0x14d   :  { %v211_v55 = vadd.f32 %v276_v33, %v210_v54 }
 0x14f   :  { %235 = vst.msk [vmem:[%s526_s5 + $0x60] sm:$0xff] %vm222_vm0, %v211_v55 }
 0x150   :  { %v192_v56 = vpop.f32.mrf.mxu1 }
 0x151   :  { %v193_v57 = vadd.f32 %v276_v33, %v192_v56 }
 0x153   :  { %229 = vst.msk [vmem:[%s526_s5 + $0x30] sm:$0xff] %vm222_vm0, %v193_v57 }
 0x154   :  { %v213_v58 = vpop.f32.mrf.mxu3 }
 0x155   :  { %v214_v59 = vadd.f32 %v276_v33, %v213_v58 }
 0x157   :  { %236 = vst.msk [vmem:[%s526_s5 + $0x68] sm:$0xff] %vm222_vm0, %v214_v59 }
 0x158   :  { %v195_v60 = vpop.f32.mrf.mxu1 }
 0x159   :  { %v196_v61 = vadd.f32 %v276_v33, %v195_v60 }
 0x15b   :  { %230 = vst.msk [vmem:[%s526_s5 + $0x38] sm:$0xff] %vm222_vm0, %v196_v61 }
 0x15c   :  { %v216_v62 = vpop.f32.mrf.mxu3 }
 0x15d   :  { %v217_v63 = vadd.f32 %v276_v33, %v216_v62 }
 0x15f   :  { %237 = vst.msk [vmem:[%s526_s5 + $0x70] sm:$0xff] %vm222_vm0, %v217_v63 }
 0x164   :  { %v219_v0 = vpop.f32.mrf.mxu3 }
 0x165   :  { %v220_v1 = vadd.f32 %v276_v33, %v219_v0 }
 0x167   :  { %238 = vst.msk [vmem:[%s526_s5 + $0x78] sm:$0xff] %vm222_vm0, %v220_v1 }

</bundles_post_ra>
